<compile_context>
chip_gen: v5e
topology: v5e:2x2
jax: 0.10.0
libtpu: 0.0.40
codegen_flags: <defaults>
</compile_context>

<pallas_src>
import jax
import jax.numpy as jnp
from jax.experimental import pallas as pl
from jax.experimental.pallas import tpu as pltpu  # noqa: F401  (TPU backend)

# ---- model hyperparameters (from the PyTorch module) ----
block_size = 32
n_embd = 64
num_kv_groups = 2
n_head = 4
n_layer = 4
head_size = n_embd // n_head                  # 16
ffn_dim = 4 * n_embd                          # 256
REPEATS = n_head // num_kv_groups             # repeat_interleave factor
EPS = 1e-6
NEG_INF = -1e30                               # finite mask fill (robust vs -inf)

QKV_W = n_embd + 2 * num_kv_groups * head_size   # 64 + 32 + 32 = 128
K_OFF = n_embd                                    # start of K lanes (64)
V_OFF = K_OFF + num_kv_groups * head_size         # start of V lanes (96)


# ---------------------------------------------------------------------------
# Fused forward kernel: all layers + final RMSNorm + lm head, one invocation.
# ---------------------------------------------------------------------------
def fused_forward_kernel(x_ref, rope_ref, p_ref, maskadd_ref,
                         wqkv_ref, wo_ref, w1_ref, w2_ref,
                         vecs_ref, b1_ref, wh_ref, bh_ref,
                         o_ref):
    x = x_ref[...]                                   # (BT, C) f32
    BT = x.shape[0]

    # shared constants (hoisted out of the layer loop)
    cos = rope_ref[0]                                # (BT, 128); scale folded into Q lanes
    sin = rope_ref[1]                                # (BT, 128); zeros over V lanes
    p128 = p_ref[...]                                # (128, 128) block-diag signed pair-swap
    mask_add = maskadd_ref[...]                      # (n_head*BT, BT) additive causal mask

    def rmsnorm(y, gamma):
        # rsqrt -> EUP slot; elementwise math kept in f32
        return y * jax.lax.rsqrt(jnp.mean(y * y, axis=-1, keepdims=True) + EPS) * gamma

    def bdot(a, b):
        # bf16 MXU matmul with f32 accumulation (b is already bf16)
        return jnp.dot(a.astype(jnp.bfloat16), b, preferred_element_type=jnp.float32)

    for l in range(n_layer):
        vc = vecs_ref[l]                             # (8, C): [g1, g2, bo, b2, pad...]
        g1, g2, bo, b2 = vc[0:1], vc[1:2], vc[2:3], vc[3:4]

        # ---------------- attention sublayer ----------------
        xn = rmsnorm(x, g1)                          # (BT, C)

        # fused Q|K|V projection: one 128-lane-dense MXU pass
        qkv = bdot(xn, wqkv_ref[l])                  # (BT, 128) f32

        # fused RoPE (interleaved pair rotation) over Q/K lanes; V lanes untouched
        # (cos=1, sin=0, zero P block).  Attention scale pre-folded into Q lanes.
        qkv = qkv * cos + jnp.dot(qkv, p128, preferred_element_type=jnp.float32) * sin

        q = qkv[:, :K_OFF]                                                   # (BT, 64)
        kg = [qkv[:, K_OFF + g * head_size:K_OFF + (g + 1) * head_size]
              for g in range(num_kv_groups)]                                 # (BT, hs) each
        vg = [qkv[:, V_OFF + g * head_size:V_OFF + (g + 1) * head_size]
              for g in range(num_kv_groups)]                                 # (BT, hs) each

        # per-head scores stacked along sublanes -> one batched masked softmax
        wei = jnp.concatenate(
            [jax.lax.dot_general(q[:, h * head_size:(h + 1) * head_size],
                                 kg[h // REPEATS],
                                 (((1,), (1,)), ((), ())),
                                 preferred_element_type=jnp.float32)
             for h in range(n_head)], axis=0)                                # (H*BT, BT)
        wei = wei + mask_add
        wei = wei - jnp.max(wei, axis=-1, keepdims=True)
        pexp = jnp.exp(wei)
        pexp = pexp * pl.reciprocal(jnp.sum(pexp, axis=-1, keepdims=True), approx=False)

        # per-head V aggregation + out-proj accumulation (no lane concat)
        wo_l = wo_ref[l]                             # (64, 64) bf16
        att = bo                                     # (1, C) -> broadcast
        for h in range(n_head):
            ph = pexp[h * BT:(h + 1) * BT, :]                                # (BT, BT)
            oh = jnp.dot(ph, vg[h // REPEATS], preferred_element_type=jnp.float32)
            att = att + bdot(oh, wo_l[h * head_size:(h + 1) * head_size, :])
        x = x + att                                  # residual 1

        # ---------------- feed-forward sublayer ----------------
        xn2 = rmsnorm(x, g2)
        h1 = jnp.maximum(bdot(xn2, w1_ref[l]) + b1_ref[l], 0.0)              # (BT, 256)
        x = x + bdot(h1, w2_ref[l]) + b2             # residual 2

    # ---------------- final RMSNorm + lane-padded lm head ----------------
    gf = vecs_ref[n_layer][0:1]
    xf = rmsnorm(x, gf)
    o_ref[...] = bdot(xf, wh_ref[...]) + bh_ref[...]


# ---------------------------------------------------------------------------
# RoPE helpers (glue)
# ---------------------------------------------------------------------------
def rope_tables(dim, T, theta=10000.0):
    freqs = 1.0 / theta ** (jnp.arange(0, dim, 2, dtype=jnp.float32) / dim)
    m = jnp.arange(T, dtype=jnp.float32)
    angle = m[:, None] * freqs[None, :]                  # (T, dim/2)
    cos = jnp.repeat(jnp.cos(angle), 2, axis=-1)         # (T, dim) interleaved
    sin = jnp.repeat(jnp.sin(angle), 2, axis=-1)
    return cos, sin


def rope_perm(dim):
    # (x @ P)[2j]   = -x[2j+1]
    # (x @ P)[2j+1] =  x[2j]
    P = jnp.zeros((dim, dim), jnp.float32)
    idx = jnp.arange(0, dim, 2)
    P = P.at[idx + 1, idx].set(-1.0)
    P = P.at[idx, idx + 1].set(1.0)
    return P


# ---------------------------------------------------------------------------
# Forward wrapper
# ---------------------------------------------------------------------------
def bigram_lm_forward(idx, params):
    B, T = idx.shape
    BT = B * T

    # token embedding gather (plain-JAX glue)
    x = params["emb"][idx].reshape(BT, n_embd).astype(jnp.float32)

    # --- fused RoPE tables over the Q|K|V lane layout, attention scale folded into Q lanes ---
    cos_h, sin_h = rope_tables(head_size, T)                 # (T, hs)
    scale = head_size ** -0.5
    kv_w = num_kv_groups * head_size
    cos128 = jnp.concatenate([jnp.tile(cos_h, (1, n_head)) * scale,
                              jnp.tile(cos_h, (1, num_kv_groups)),
                              jnp.ones((T, kv_w), jnp.float32)], axis=1)     # (T, 128)
    sin128 = jnp.concatenate([jnp.tile(sin_h, (1, n_head)) * scale,
                              jnp.tile(sin_h, (1, num_kv_groups)),
                              jnp.zeros((T, kv_w), jnp.float32)], axis=1)    # (T, 128)
    rope = jnp.stack([jnp.tile(cos128, (B, 1)),
                      jnp.tile(sin128, (B, 1))], axis=0)                     # (2, BT, 128)

    p_h = rope_perm(head_size)
    p128 = jnp.zeros((QKV_W, QKV_W), jnp.float32)
    p128 = p128.at[:K_OFF, :K_OFF].set(jnp.kron(jnp.eye(n_head, dtype=jnp.float32), p_h))
    p128 = p128.at[K_OFF:V_OFF, K_OFF:V_OFF].set(
        jnp.kron(jnp.eye(num_kv_groups, dtype=jnp.float32), p_h))

    # --- additive block-diagonal causal mask, pre-tiled for head-stacked scores ---
    r = jnp.arange(BT)
    keep = ((r[:, None] // T) == (r[None, :] // T)) & \
           ((r[:, None] % T) >= (r[None, :] % T))
    mask_add = jnp.where(keep, 0.0, NEG_INF).astype(jnp.float32)
    mask_add = jnp.tile(mask_add, (n_head, 1))                               # (H*BT, BT)

    # --- fused / bf16 weights ---
    wqkv = jnp.concatenate([params["WQ"], params["WK"], params["WV"]],
                           axis=2).astype(jnp.bfloat16)                      # (L, 64, 128)
    wo = params["WO"].astype(jnp.bfloat16)                                   # (L, 64, 64)
    w1 = params["W1"].astype(jnp.bfloat16)                                   # (L, 64, 256)
    w2 = params["W2"].astype(jnp.bfloat16)                                   # (L, 256, 64)

    # --- pack per-layer (1, C) vectors: [g1, g2, bo, b2] per layer, gf in trailing slot ---
    vecs_layers = jnp.concatenate(
        [params["G1"], params["G2"], params["BO"], params["B2"],
         jnp.zeros((n_layer, 4, n_embd), jnp.float32)], axis=1)              # (L, 8, C)
    vecs_final = jnp.concatenate(
        [params["gf"][None], jnp.zeros((1, 7, n_embd), jnp.float32)], axis=1)  # (1, 8, C)
    vecs = jnp.concatenate([vecs_layers, vecs_final], axis=0)                # (L+1, 8, C)

    b1 = params["B1"]                                                        # (L, 1, 256) f32

    # --- lm head lane-padded to a multiple of 128 for a dense final store ---
    wh, bh = params["wh"], params["bh"]
    V = wh.shape[1]
    V_pad = ((V + 127) // 128) * 128
    wh_pad = jnp.pad(wh, ((0, 0), (0, V_pad - V))).astype(jnp.bfloat16)
    bh_pad = jnp.pad(bh, ((0, 0), (0, V_pad - V)))

    logits_pad = pl.pallas_call(
        fused_forward_kernel,
        out_shape=jax.ShapeDtypeStruct((BT, V_pad), jnp.float32),
    )(x, rope, p128, mask_add, wqkv, wo, w1, w2, vecs, b1, wh_pad, bh_pad)

    return logits_pad.reshape(B, T, V_pad)[:, :, :V]


# ---------------------------------------------------------------------------
# Parameter setup (deterministic, synthetic); layer params stacked on axis 0
# ---------------------------------------------------------------------------
def init_stacked_layers(key, scale=0.02):
    def nrm(k, s):
        return scale * jax.random.normal(k, s, jnp.float32)

    keys = jax.random.split(key, n_layer)
    G1, WQ, WK, WV, WO, BO, G2, W1, B1, W2, B2 = ([] for _ in range(11))
    for kl in keys:
        ks = jax.random.split(kl, 9)
        G1.append(jnp.ones((1, n_embd), jnp.float32))
        WQ.append(nrm(ks[0], (n_embd, n_head * head_size)))
        WK.append(nrm(ks[1], (n_embd, num_kv_groups * head_size)))
        WV.append(nrm(ks[2], (n_embd, num_kv_groups * head_size)))
        WO.append(nrm(ks[3], (n_head * head_size, n_embd)))
        BO.append(nrm(ks[4], (1, n_embd)))
        G2.append(jnp.ones((1, n_embd), jnp.float32))
        W1.append(nrm(ks[5], (n_embd, ffn_dim)))
        B1.append(nrm(ks[6], (1, ffn_dim)))
        W2.append(nrm(ks[7], (ffn_dim, n_embd)))
        B2.append(nrm(ks[8], (1, n_embd)))
    st = lambda xs: jnp.stack(xs, axis=0)
    return dict(G1=st(G1), WQ=st(WQ), WK=st(WK), WV=st(WV), WO=st(WO), BO=st(BO),
                G2=st(G2), W1=st(W1), B1=st(B1), W2=st(W2), B2=st(B2))


if __name__ == "__main__":
    vocab_size = 65
    B, T = 2, 8                                     # T <= block_size

    key = jax.random.PRNGKey(0)
    k_emb, k_idx, k_wh, k_bh, k_layers = jax.random.split(key, 5)

    params = init_stacked_layers(k_layers)
    params.update(
        emb=0.02 * jax.random.normal(k_emb, (vocab_size, n_embd), jnp.float32),
        gf=jnp.ones((1, n_embd), jnp.float32),
        wh=0.02 * jax.random.normal(k_wh, (n_embd, vocab_size), jnp.float32),
        bh=0.02 * jax.random.normal(k_bh, (1, vocab_size), jnp.float32),
    )
    idx = jax.random.randint(k_idx, (B, T), 0, vocab_size, dtype=jnp.int32)

    # ---- forward pass (targets=None -> loss is None, only logits) ----
    # TODO(synk): cross-entropy loss branch and generate() sampling loop are
    # host-side / training-time logic and are not part of the Pallas kernel.
    logits = bigram_lm_forward(idx, params)

    jax.block_until_ready(logits)
    assert logits.shape == (B, T, vocab_size)
    assert bool(jnp.all(jnp.isfinite(logits)))
    print("KERNEL_OK")
</pallas_src>

<mosaic_0001>
module attributes {stable_mosaic.version = 11 : i64} {
  func.func @fused_forward_kernel(%arg0: memref<16x64xf32, #tpu.memory_space<vmem>>, %arg1: memref<2x16x128xf32, #tpu.memory_space<vmem>>, %arg2: memref<128x128xf32, #tpu.memory_space<vmem>>, %arg3: memref<64x16xf32, #tpu.memory_space<vmem>>, %arg4: memref<4x64x128xbf16, #tpu.memory_space<vmem>>, %arg5: memref<4x64x64xbf16, #tpu.memory_space<vmem>>, %arg6: memref<4x64x256xbf16, #tpu.memory_space<vmem>>, %arg7: memref<4x256x64xbf16, #tpu.memory_space<vmem>>, %arg8: memref<5x8x64xf32, #tpu.memory_space<vmem>>, %arg9: memref<4x1x256xf32, #tpu.memory_space<vmem>>, %arg10: memref<64x128xbf16, #tpu.memory_space<vmem>>, %arg11: memref<1x128xf32, #tpu.memory_space<vmem>>, %arg12: memref<16x128xf32, #tpu.memory_space<vmem>>) attributes {dimension_semantics = [], scalar_prefetch = 0 : i64, scratch_operands = 0 : i64, tpu.core_type = #tpu.core_type<tc>} {
    %c0 = arith.constant 0 : index
    %c0_0 = arith.constant 0 : index
    %0 = vector.load %arg0[%c0, %c0_0] : memref<16x64xf32, #tpu.memory_space<vmem>>, vector<16x64xf32>
    %c0_1 = arith.constant 0 : index
    %c0_2 = arith.constant 0 : index
    %c0_3 = arith.constant 0 : index
    %1 = vector.load %arg1[%c0_1, %c0_2, %c0_3] : memref<2x16x128xf32, #tpu.memory_space<vmem>>, vector<1x16x128xf32>
    %2 = vector.shape_cast %1 : vector<1x16x128xf32> to vector<16x128xf32>
    %c1 = arith.constant 1 : index
    %c0_4 = arith.constant 0 : index
    %c0_5 = arith.constant 0 : index
    %3 = vector.load %arg1[%c1, %c0_4, %c0_5] : memref<2x16x128xf32, #tpu.memory_space<vmem>>, vector<1x16x128xf32>
    %4 = vector.shape_cast %3 : vector<1x16x128xf32> to vector<16x128xf32>
    %c0_6 = arith.constant 0 : index
    %c0_7 = arith.constant 0 : index
    %5 = vector.load %arg2[%c0_6, %c0_7] : memref<128x128xf32, #tpu.memory_space<vmem>>, vector<128x128xf32>
    %c0_8 = arith.constant 0 : index
    %c0_9 = arith.constant 0 : index
    %6 = vector.load %arg3[%c0_8, %c0_9] : memref<64x16xf32, #tpu.memory_space<vmem>>, vector<64x16xf32>
    %c0_10 = arith.constant 0 : index
    %c0_11 = arith.constant 0 : index
    %c0_12 = arith.constant 0 : index
    %7 = vector.load %arg8[%c0_10, %c0_11, %c0_12] : memref<5x8x64xf32, #tpu.memory_space<vmem>>, vector<1x8x64xf32>
    %8 = vector.shape_cast %7 : vector<1x8x64xf32> to vector<8x64xf32>
    %9 = vector.extract_strided_slice %8 {offsets = [0, 0], sizes = [1, 64], strides = [1, 1]} : vector<8x64xf32> to vector<1x64xf32>
    %10 = vector.extract_strided_slice %8 {offsets = [1, 0], sizes = [1, 64], strides = [1, 1]} : vector<8x64xf32> to vector<1x64xf32>
    %11 = vector.extract_strided_slice %8 {offsets = [2, 0], sizes = [1, 64], strides = [1, 1]} : vector<8x64xf32> to vector<1x64xf32>
    %12 = vector.extract_strided_slice %8 {offsets = [3, 0], sizes = [1, 64], strides = [1, 1]} : vector<8x64xf32> to vector<1x64xf32>
    %13 = arith.mulf %0, %0 : vector<16x64xf32>
    %cst = arith.constant dense<0.000000e+00> : vector<16xf32>
    %14 = vector.multi_reduction <add>, %13, %cst [1] : vector<16x64xf32> to vector<16xf32>
    %15 = vector.shape_cast %14 : vector<16xf32> to vector<16x1xf32>
    %cst_13 = arith.constant 6.400000e+01 : f32
    %16 = vector.broadcast %cst_13 : f32 to vector<16x1xf32>
    %17 = arith.divf %15, %16 : vector<16x1xf32>
    %cst_14 = arith.constant 9.99999997E-7 : f32
    %18 = vector.broadcast %cst_14 : f32 to vector<16x1xf32>
    %19 = arith.addf %17, %18 : vector<16x1xf32>
    %20 = math.rsqrt %19 : vector<16x1xf32>
    %21 = vector.broadcast %20 : vector<16x1xf32> to vector<16x64xf32>
    %22 = arith.mulf %0, %21 : vector<16x64xf32>
    %23 = vector.broadcast %9 : vector<1x64xf32> to vector<16x64xf32>
    %24 = arith.mulf %22, %23 : vector<16x64xf32>
    %c0_15 = arith.constant 0 : index
    %c0_16 = arith.constant 0 : index
    %c0_17 = arith.constant 0 : index
    %25 = vector.load %arg4[%c0_15, %c0_16, %c0_17] : memref<4x64x128xbf16, #tpu.memory_space<vmem>>, vector<1x64x128xbf16>
    %26 = vector.shape_cast %25 : vector<1x64x128xbf16> to vector<64x128xbf16>
    %27 = arith.truncf %24 : vector<16x64xf32> to vector<16x64xbf16>
    %cst_18 = arith.constant dense<0.000000e+00> : vector<16x128xf32>
    %28 = tpu.matmul %27, %26, %cst_18 {dimension_numbers = #tpu.dot_dimension_numbers<[1], [0], [0], [1], [0, 0, 1, 1], [], []>} : vector<16x64xbf16>, vector<64x128xbf16>, vector<16x128xf32> -> vector<16x128xf32>
    %29 = arith.mulf %28, %2 : vector<16x128xf32>
    %cst_19 = arith.constant dense<0.000000e+00> : vector<16x128xf32>
    %30 = tpu.matmul %28, %5, %cst_19 {dimension_numbers = #tpu.dot_dimension_numbers<[1], [0], [0], [1], [0, 0, 1, 1], [], []>} : vector<16x128xf32>, vector<128x128xf32>, vector<16x128xf32> -> vector<16x128xf32>
    %31 = arith.mulf %30, %4 : vector<16x128xf32>
    %32 = arith.addf %29, %31 : vector<16x128xf32>
    %33 = vector.extract_strided_slice %32 {offsets = [0, 0], sizes = [16, 64], strides = [1, 1]} : vector<16x128xf32> to vector<16x64xf32>
    %34 = vector.extract_strided_slice %32 {offsets = [0, 64], sizes = [16, 16], strides = [1, 1]} : vector<16x128xf32> to vector<16x16xf32>
    %35 = vector.extract_strided_slice %32 {offsets = [0, 80], sizes = [16, 16], strides = [1, 1]} : vector<16x128xf32> to vector<16x16xf32>
    %36 = vector.extract_strided_slice %32 {offsets = [0, 96], sizes = [16, 16], strides = [1, 1]} : vector<16x128xf32> to vector<16x16xf32>
    %37 = vector.extract_strided_slice %32 {offsets = [0, 112], sizes = [16, 16], strides = [1, 1]} : vector<16x128xf32> to vector<16x16xf32>
    %38 = vector.extract_strided_slice %33 {offsets = [0, 0], sizes = [16, 16], strides = [1, 1]} : vector<16x64xf32> to vector<16x16xf32>
    %cst_20 = arith.constant dense<0.000000e+00> : vector<16x16xf32>
    %39 = tpu.matmul %38, %34, %cst_20 {dimension_numbers = #tpu.dot_dimension_numbers<[1], [1], [0], [0], [0, 0, 1, 0], [], []>} : vector<16x16xf32>, vector<16x16xf32>, vector<16x16xf32> -> vector<16x16xf32>
    %40 = vector.extract_strided_slice %33 {offsets = [0, 16], sizes = [16, 16], strides = [1, 1]} : vector<16x64xf32> to vector<16x16xf32>
    %cst_21 = arith.constant dense<0.000000e+00> : vector<16x16xf32>
    %41 = tpu.matmul %40, %34, %cst_21 {dimension_numbers = #tpu.dot_dimension_numbers<[1], [1], [0], [0], [0, 0, 1, 0], [], []>} : vector<16x16xf32>, vector<16x16xf32>, vector<16x16xf32> -> vector<16x16xf32>
    %42 = vector.extract_strided_slice %33 {offsets = [0, 32], sizes = [16, 16], strides = [1, 1]} : vector<16x64xf32> to vector<16x16xf32>
    %cst_22 = arith.constant dense<0.000000e+00> : vector<16x16xf32>
    %43 = tpu.matmul %42, %35, %cst_22 {dimension_numbers = #tpu.dot_dimension_numbers<[1], [1], [0], [0], [0, 0, 1, 0], [], []>} : vector<16x16xf32>, vector<16x16xf32>, vector<16x16xf32> -> vector<16x16xf32>
    %44 = vector.extract_strided_slice %33 {offsets = [0, 48], sizes = [16, 16], strides = [1, 1]} : vector<16x64xf32> to vector<16x16xf32>
    %cst_23 = arith.constant dense<0.000000e+00> : vector<16x16xf32>
    %45 = tpu.matmul %44, %35, %cst_23 {dimension_numbers = #tpu.dot_dimension_numbers<[1], [1], [0], [0], [0, 0, 1, 0], [], []>} : vector<16x16xf32>, vector<16x16xf32>, vector<16x16xf32> -> vector<16x16xf32>
    %46 = tpu.concatenate %39, %41, %43, %45 in 0 : vector<16x16xf32>, vector<16x16xf32>, vector<16x16xf32>, vector<16x16xf32> -> vector<64x16xf32>
    %47 = arith.addf %46, %6 : vector<64x16xf32>
    %cst_24 = arith.constant dense<0xFF800000> : vector<64xf32>
    %48 = vector.multi_reduction <maximumf>, %47, %cst_24 [1] : vector<64x16xf32> to vector<64xf32>
    %49 = vector.shape_cast %48 : vector<64xf32> to vector<64x1xf32>
    %50 = vector.broadcast %49 : vector<64x1xf32> to vector<64x16xf32>
    %51 = arith.subf %47, %50 : vector<64x16xf32>
    %52 = math.exp %51 : vector<64x16xf32>
    %cst_25 = arith.constant dense<0.000000e+00> : vector<64xf32>
    %53 = vector.multi_reduction <add>, %52, %cst_25 [1] : vector<64x16xf32> to vector<64xf32>
    %54 = vector.shape_cast %53 : vector<64xf32> to vector<64x1xf32>
    %55 = tpu.reciprocal %54 : vector<64x1xf32> -> vector<64x1xf32>
    %56 = vector.broadcast %55 : vector<64x1xf32> to vector<64x16xf32>
    %57 = arith.mulf %52, %56 : vector<64x16xf32>
    %c0_26 = arith.constant 0 : index
    %c0_27 = arith.constant 0 : index
    %c0_28 = arith.constant 0 : index
    %58 = vector.load %arg5[%c0_26, %c0_27, %c0_28] : memref<4x64x64xbf16, #tpu.memory_space<vmem>>, vector<1x64x64xbf16>
    %59 = vector.shape_cast %58 : vector<1x64x64xbf16> to vector<64x64xbf16>
    %60 = vector.extract_strided_slice %57 {offsets = [0, 0], sizes = [16, 16], strides = [1, 1]} : vector<64x16xf32> to vector<16x16xf32>
    %cst_29 = arith.constant dense<0.000000e+00> : vector<16x16xf32>
    %61 = tpu.matmul %60, %36, %cst_29 {dimension_numbers = #tpu.dot_dimension_numbers<[1], [0], [0], [1], [0, 0, 1, 1], [], []>} : vector<16x16xf32>, vector<16x16xf32>, vector<16x16xf32> -> vector<16x16xf32>
    %62 = vector.extract_strided_slice %59 {offsets = [0, 0], sizes = [16, 64], strides = [1, 1]} : vector<64x64xbf16> to vector<16x64xbf16>
    %63 = arith.truncf %61 : vector<16x16xf32> to vector<16x16xbf16>
    %cst_30 = arith.constant dense<0.000000e+00> : vector<16x64xf32>
    %64 = tpu.matmul %63, %62, %cst_30 {dimension_numbers = #tpu.dot_dimension_numbers<[1], [0], [0], [1], [0, 0, 1, 1], [], []>} : vector<16x16xbf16>, vector<16x64xbf16>, vector<16x64xf32> -> vector<16x64xf32>
    %65 = vector.broadcast %11 : vector<1x64xf32> to vector<16x64xf32>
    %66 = arith.addf %65, %64 : vector<16x64xf32>
    %67 = vector.extract_strided_slice %57 {offsets = [16, 0], sizes = [16, 16], strides = [1, 1]} : vector<64x16xf32> to vector<16x16xf32>
    %cst_31 = arith.constant dense<0.000000e+00> : vector<16x16xf32>
    %68 = tpu.matmul %67, %36, %cst_31 {dimension_numbers = #tpu.dot_dimension_numbers<[1], [0], [0], [1], [0, 0, 1, 1], [], []>} : vector<16x16xf32>, vector<16x16xf32>, vector<16x16xf32> -> vector<16x16xf32>
    %69 = vector.extract_strided_slice %59 {offsets = [16, 0], sizes = [16, 64], strides = [1, 1]} : vector<64x64xbf16> to vector<16x64xbf16>
    %70 = arith.truncf %68 : vector<16x16xf32> to vector<16x16xbf16>
    %cst_32 = arith.constant dense<0.000000e+00> : vector<16x64xf32>
    %71 = tpu.matmul %70, %69, %cst_32 {dimension_numbers = #tpu.dot_dimension_numbers<[1], [0], [0], [1], [0, 0, 1, 1], [], []>} : vector<16x16xbf16>, vector<16x64xbf16>, vector<16x64xf32> -> vector<16x64xf32>
    %72 = arith.addf %66, %71 : vector<16x64xf32>
    %73 = vector.extract_strided_slice %57 {offsets = [32, 0], sizes = [16, 16], strides = [1, 1]} : vector<64x16xf32> to vector<16x16xf32>
    %cst_33 = arith.constant dense<0.000000e+00> : vector<16x16xf32>
    %74 = tpu.matmul %73, %37, %cst_33 {dimension_numbers = #tpu.dot_dimension_numbers<[1], [0], [0], [1], [0, 0, 1, 1], [], []>} : vector<16x16xf32>, vector<16x16xf32>, vector<16x16xf32> -> vector<16x16xf32>
    %75 = vector.extract_strided_slice %59 {offsets = [32, 0], sizes = [16, 64], strides = [1, 1]} : vector<64x64xbf16> to vector<16x64xbf16>
    %76 = arith.truncf %74 : vector<16x16xf32> to vector<16x16xbf16>
    %cst_34 = arith.constant dense<0.000000e+00> : vector<16x64xf32>
    %77 = tpu.matmul %76, %75, %cst_34 {dimension_numbers = #tpu.dot_dimension_numbers<[1], [0], [0], [1], [0, 0, 1, 1], [], []>} : vector<16x16xbf16>, vector<16x64xbf16>, vector<16x64xf32> -> vector<16x64xf32>
    %78 = arith.addf %72, %77 : vector<16x64xf32>
    %79 = vector.extract_strided_slice %57 {offsets = [48, 0], sizes = [16, 16], strides = [1, 1]} : vector<64x16xf32> to vector<16x16xf32>
    %cst_35 = arith.constant dense<0.000000e+00> : vector<16x16xf32>
    %80 = tpu.matmul %79, %37, %cst_35 {dimension_numbers = #tpu.dot_dimension_numbers<[1], [0], [0], [1], [0, 0, 1, 1], [], []>} : vector<16x16xf32>, vector<16x16xf32>, vector<16x16xf32> -> vector<16x16xf32>
    %81 = vector.extract_strided_slice %59 {offsets = [48, 0], sizes = [16, 64], strides = [1, 1]} : vector<64x64xbf16> to vector<16x64xbf16>
    %82 = arith.truncf %80 : vector<16x16xf32> to vector<16x16xbf16>
    %cst_36 = arith.constant dense<0.000000e+00> : vector<16x64xf32>
    %83 = tpu.matmul %82, %81, %cst_36 {dimension_numbers = #tpu.dot_dimension_numbers<[1], [0], [0], [1], [0, 0, 1, 1], [], []>} : vector<16x16xbf16>, vector<16x64xbf16>, vector<16x64xf32> -> vector<16x64xf32>
    %84 = arith.addf %78, %83 : vector<16x64xf32>
    %85 = arith.addf %0, %84 : vector<16x64xf32>
    %86 = arith.mulf %85, %85 : vector<16x64xf32>
    %cst_37 = arith.constant dense<0.000000e+00> : vector<16xf32>
    %87 = vector.multi_reduction <add>, %86, %cst_37 [1] : vector<16x64xf32> to vector<16xf32>
    %88 = vector.shape_cast %87 : vector<16xf32> to vector<16x1xf32>
    %cst_38 = arith.constant 6.400000e+01 : f32
    %89 = vector.broadcast %cst_38 : f32 to vector<16x1xf32>
    %90 = arith.divf %88, %89 : vector<16x1xf32>
    %cst_39 = arith.constant 9.99999997E-7 : f32
    %91 = vector.broadcast %cst_39 : f32 to vector<16x1xf32>
    %92 = arith.addf %90, %91 : vector<16x1xf32>
    %93 = math.rsqrt %92 : vector<16x1xf32>
    %94 = vector.broadcast %93 : vector<16x1xf32> to vector<16x64xf32>
    %95 = arith.mulf %85, %94 : vector<16x64xf32>
    %96 = vector.broadcast %10 : vector<1x64xf32> to vector<16x64xf32>
    %97 = arith.mulf %95, %96 : vector<16x64xf32>
    %c0_40 = arith.constant 0 : index
    %c0_41 = arith.constant 0 : index
    %c0_42 = arith.constant 0 : index
    %98 = vector.load %arg6[%c0_40, %c0_41, %c0_42] : memref<4x64x256xbf16, #tpu.memory_space<vmem>>, vector<1x64x256xbf16>
    %99 = vector.shape_cast %98 : vector<1x64x256xbf16> to vector<64x256xbf16>
    %100 = arith.truncf %97 : vector<16x64xf32> to vector<16x64xbf16>
    %cst_43 = arith.constant dense<0.000000e+00> : vector<16x256xf32>
    %101 = tpu.matmul %100, %99, %cst_43 {dimension_numbers = #tpu.dot_dimension_numbers<[1], [0], [0], [1], [0, 0, 1, 1], [], []>} : vector<16x64xbf16>, vector<64x256xbf16>, vector<16x256xf32> -> vector<16x256xf32>
    %c0_44 = arith.constant 0 : index
    %c0_45 = arith.constant 0 : index
    %c0_46 = arith.constant 0 : index
    %102 = vector.load %arg9[%c0_44, %c0_45, %c0_46] : memref<4x1x256xf32, #tpu.memory_space<vmem>>, vector<1x1x256xf32>
    %103 = vector.shape_cast %102 : vector<1x1x256xf32> to vector<1x256xf32>
    %104 = vector.broadcast %103 : vector<1x256xf32> to vector<16x256xf32>
    %105 = arith.addf %101, %104 : vector<16x256xf32>
    %cst_47 = arith.constant 0.000000e+00 : f32
    %106 = vector.broadcast %cst_47 : f32 to vector<16x256xf32>
    %107 = arith.maximumf %105, %106 : vector<16x256xf32>
    %c0_48 = arith.constant 0 : index
    %c0_49 = arith.constant 0 : index
    %c0_50 = arith.constant 0 : index
    %108 = vector.load %arg7[%c0_48, %c0_49, %c0_50] : memref<4x256x64xbf16, #tpu.memory_space<vmem>>, vector<1x256x64xbf16>
    %109 = vector.shape_cast %108 : vector<1x256x64xbf16> to vector<256x64xbf16>
    %110 = arith.truncf %107 : vector<16x256xf32> to vector<16x256xbf16>
    %cst_51 = arith.constant dense<0.000000e+00> : vector<16x64xf32>
    %111 = tpu.matmul %110, %109, %cst_51 {dimension_numbers = #tpu.dot_dimension_numbers<[1], [0], [0], [1], [0, 0, 1, 1], [], []>} : vector<16x256xbf16>, vector<256x64xbf16>, vector<16x64xf32> -> vector<16x64xf32>
    %112 = arith.addf %85, %111 : vector<16x64xf32>
    %113 = vector.broadcast %12 : vector<1x64xf32> to vector<16x64xf32>
    %114 = arith.addf %112, %113 : vector<16x64xf32>
    %c1_52 = arith.constant 1 : index
    %c0_53 = arith.constant 0 : index
    %c0_54 = arith.constant 0 : index
    %115 = vector.load %arg8[%c1_52, %c0_53, %c0_54] : memref<5x8x64xf32, #tpu.memory_space<vmem>>, vector<1x8x64xf32>
    %116 = vector.shape_cast %115 : vector<1x8x64xf32> to vector<8x64xf32>
    %117 = vector.extract_strided_slice %116 {offsets = [0, 0], sizes = [1, 64], strides = [1, 1]} : vector<8x64xf32> to vector<1x64xf32>
    %118 = vector.extract_strided_slice %116 {offsets = [1, 0], sizes = [1, 64], strides = [1, 1]} : vector<8x64xf32> to vector<1x64xf32>
    %119 = vector.extract_strided_slice %116 {offsets = [2, 0], sizes = [1, 64], strides = [1, 1]} : vector<8x64xf32> to vector<1x64xf32>
    %120 = vector.extract_strided_slice %116 {offsets = [3, 0], sizes = [1, 64], strides = [1, 1]} : vector<8x64xf32> to vector<1x64xf32>
    %121 = arith.mulf %114, %114 : vector<16x64xf32>
    %cst_55 = arith.constant dense<0.000000e+00> : vector<16xf32>
    %122 = vector.multi_reduction <add>, %121, %cst_55 [1] : vector<16x64xf32> to vector<16xf32>
    %123 = vector.shape_cast %122 : vector<16xf32> to vector<16x1xf32>
    %cst_56 = arith.constant 6.400000e+01 : f32
    %124 = vector.broadcast %cst_56 : f32 to vector<16x1xf32>
    %125 = arith.divf %123, %124 : vector<16x1xf32>
    %cst_57 = arith.constant 9.99999997E-7 : f32
    %126 = vector.broadcast %cst_57 : f32 to vector<16x1xf32>
    %127 = arith.addf %125, %126 : vector<16x1xf32>
    %128 = math.rsqrt %127 : vector<16x1xf32>
    %129 = vector.broadcast %128 : vector<16x1xf32> to vector<16x64xf32>
    %130 = arith.mulf %114, %129 : vector<16x64xf32>
    %131 = vector.broadcast %117 : vector<1x64xf32> to vector<16x64xf32>
    %132 = arith.mulf %130, %131 : vector<16x64xf32>
    %c1_58 = arith.constant 1 : index
    %c0_59 = arith.constant 0 : index
    %c0_60 = arith.constant 0 : index
    %133 = vector.load %arg4[%c1_58, %c0_59, %c0_60] : memref<4x64x128xbf16, #tpu.memory_space<vmem>>, vector<1x64x128xbf16>
    %134 = vector.shape_cast %133 : vector<1x64x128xbf16> to vector<64x128xbf16>
    %135 = arith.truncf %132 : vector<16x64xf32> to vector<16x64xbf16>
    %cst_61 = arith.constant dense<0.000000e+00> : vector<16x128xf32>
    %136 = tpu.matmul %135, %134, %cst_61 {dimension_numbers = #tpu.dot_dimension_numbers<[1], [0], [0], [1], [0, 0, 1, 1], [], []>} : vector<16x64xbf16>, vector<64x128xbf16>, vector<16x128xf32> -> vector<16x128xf32>
    %137 = arith.mulf %136, %2 : vector<16x128xf32>
    %cst_62 = arith.constant dense<0.000000e+00> : vector<16x128xf32>
    %138 = tpu.matmul %136, %5, %cst_62 {dimension_numbers = #tpu.dot_dimension_numbers<[1], [0], [0], [1], [0, 0, 1, 1], [], []>} : vector<16x128xf32>, vector<128x128xf32>, vector<16x128xf32> -> vector<16x128xf32>
    %139 = arith.mulf %138, %4 : vector<16x128xf32>
    %140 = arith.addf %137, %139 : vector<16x128xf32>
    %141 = vector.extract_strided_slice %140 {offsets = [0, 0], sizes = [16, 64], strides = [1, 1]} : vector<16x128xf32> to vector<16x64xf32>
    %142 = vector.extract_strided_slice %140 {offsets = [0, 64], sizes = [16, 16], strides = [1, 1]} : vector<16x128xf32> to vector<16x16xf32>
    %143 = vector.extract_strided_slice %140 {offsets = [0, 80], sizes = [16, 16], strides = [1, 1]} : vector<16x128xf32> to vector<16x16xf32>
    %144 = vector.extract_strided_slice %140 {offsets = [0, 96], sizes = [16, 16], strides = [1, 1]} : vector<16x128xf32> to vector<16x16xf32>
    %145 = vector.extract_strided_slice %140 {offsets = [0, 112], sizes = [16, 16], strides = [1, 1]} : vector<16x128xf32> to vector<16x16xf32>
    %146 = vector.extract_strided_slice %141 {offsets = [0, 0], sizes = [16, 16], strides = [1, 1]} : vector<16x64xf32> to vector<16x16xf32>
    %cst_63 = arith.constant dense<0.000000e+00> : vector<16x16xf32>
    %147 = tpu.matmul %146, %142, %cst_63 {dimension_numbers = #tpu.dot_dimension_numbers<[1], [1], [0], [0], [0, 0, 1, 0], [], []>} : vector<16x16xf32>, vector<16x16xf32>, vector<16x16xf32> -> vector<16x16xf32>
    %148 = vector.extract_strided_slice %141 {offsets = [0, 16], sizes = [16, 16], strides = [1, 1]} : vector<16x64xf32> to vector<16x16xf32>
    %cst_64 = arith.constant dense<0.000000e+00> : vector<16x16xf32>
    %149 = tpu.matmul %148, %142, %cst_64 {dimension_numbers = #tpu.dot_dimension_numbers<[1], [1], [0], [0], [0, 0, 1, 0], [], []>} : vector<16x16xf32>, vector<16x16xf32>, vector<16x16xf32> -> vector<16x16xf32>
    %150 = vector.extract_strided_slice %141 {offsets = [0, 32], sizes = [16, 16], strides = [1, 1]} : vector<16x64xf32> to vector<16x16xf32>
    %cst_65 = arith.constant dense<0.000000e+00> : vector<16x16xf32>
    %151 = tpu.matmul %150, %143, %cst_65 {dimension_numbers = #tpu.dot_dimension_numbers<[1], [1], [0], [0], [0, 0, 1, 0], [], []>} : vector<16x16xf32>, vector<16x16xf32>, vector<16x16xf32> -> vector<16x16xf32>
    %152 = vector.extract_strided_slice %141 {offsets = [0, 48], sizes = [16, 16], strides = [1, 1]} : vector<16x64xf32> to vector<16x16xf32>
    %cst_66 = arith.constant dense<0.000000e+00> : vector<16x16xf32>
    %153 = tpu.matmul %152, %143, %cst_66 {dimension_numbers = #tpu.dot_dimension_numbers<[1], [1], [0], [0], [0, 0, 1, 0], [], []>} : vector<16x16xf32>, vector<16x16xf32>, vector<16x16xf32> -> vector<16x16xf32>
    %154 = tpu.concatenate %147, %149, %151, %153 in 0 : vector<16x16xf32>, vector<16x16xf32>, vector<16x16xf32>, vector<16x16xf32> -> vector<64x16xf32>
    %155 = arith.addf %154, %6 : vector<64x16xf32>
    %cst_67 = arith.constant dense<0xFF800000> : vector<64xf32>
    %156 = vector.multi_reduction <maximumf>, %155, %cst_67 [1] : vector<64x16xf32> to vector<64xf32>
    %157 = vector.shape_cast %156 : vector<64xf32> to vector<64x1xf32>
    %158 = vector.broadcast %157 : vector<64x1xf32> to vector<64x16xf32>
    %159 = arith.subf %155, %158 : vector<64x16xf32>
    %160 = math.exp %159 : vector<64x16xf32>
    %cst_68 = arith.constant dense<0.000000e+00> : vector<64xf32>
    %161 = vector.multi_reduction <add>, %160, %cst_68 [1] : vector<64x16xf32> to vector<64xf32>
    %162 = vector.shape_cast %161 : vector<64xf32> to vector<64x1xf32>
    %163 = tpu.reciprocal %162 : vector<64x1xf32> -> vector<64x1xf32>
    %164 = vector.broadcast %163 : vector<64x1xf32> to vector<64x16xf32>
    %165 = arith.mulf %160, %164 : vector<64x16xf32>
    %c1_69 = arith.constant 1 : index
    %c0_70 = arith.constant 0 : index
    %c0_71 = arith.constant 0 : index
    %166 = vector.load %arg5[%c1_69, %c0_70, %c0_71] : memref<4x64x64xbf16, #tpu.memory_space<vmem>>, vector<1x64x64xbf16>
    %167 = vector.shape_cast %166 : vector<1x64x64xbf16> to vector<64x64xbf16>
    %168 = vector.extract_strided_slice %165 {offsets = [0, 0], sizes = [16, 16], strides = [1, 1]} : vector<64x16xf32> to vector<16x16xf32>
    %cst_72 = arith.constant dense<0.000000e+00> : vector<16x16xf32>
    %169 = tpu.matmul %168, %144, %cst_72 {dimension_numbers = #tpu.dot_dimension_numbers<[1], [0], [0], [1], [0, 0, 1, 1], [], []>} : vector<16x16xf32>, vector<16x16xf32>, vector<16x16xf32> -> vector<16x16xf32>
    %170 = vector.extract_strided_slice %167 {offsets = [0, 0], sizes = [16, 64], strides = [1, 1]} : vector<64x64xbf16> to vector<16x64xbf16>
    %171 = arith.truncf %169 : vector<16x16xf32> to vector<16x16xbf16>
    %cst_73 = arith.constant dense<0.000000e+00> : vector<16x64xf32>
    %172 = tpu.matmul %171, %170, %cst_73 {dimension_numbers = #tpu.dot_dimension_numbers<[1], [0], [0], [1], [0, 0, 1, 1], [], []>} : vector<16x16xbf16>, vector<16x64xbf16>, vector<16x64xf32> -> vector<16x64xf32>
    %173 = vector.broadcast %119 : vector<1x64xf32> to vector<16x64xf32>
    %174 = arith.addf %173, %172 : vector<16x64xf32>
    %175 = vector.extract_strided_slice %165 {offsets = [16, 0], sizes = [16, 16], strides = [1, 1]} : vector<64x16xf32> to vector<16x16xf32>
    %cst_74 = arith.constant dense<0.000000e+00> : vector<16x16xf32>
    %176 = tpu.matmul %175, %144, %cst_74 {dimension_numbers = #tpu.dot_dimension_numbers<[1], [0], [0], [1], [0, 0, 1, 1], [], []>} : vector<16x16xf32>, vector<16x16xf32>, vector<16x16xf32> -> vector<16x16xf32>
    %177 = vector.extract_strided_slice %167 {offsets = [16, 0], sizes = [16, 64], strides = [1, 1]} : vector<64x64xbf16> to vector<16x64xbf16>
    %178 = arith.truncf %176 : vector<16x16xf32> to vector<16x16xbf16>
    %cst_75 = arith.constant dense<0.000000e+00> : vector<16x64xf32>
    %179 = tpu.matmul %178, %177, %cst_75 {dimension_numbers = #tpu.dot_dimension_numbers<[1], [0], [0], [1], [0, 0, 1, 1], [], []>} : vector<16x16xbf16>, vector<16x64xbf16>, vector<16x64xf32> -> vector<16x64xf32>
    %180 = arith.addf %174, %179 : vector<16x64xf32>
    %181 = vector.extract_strided_slice %165 {offsets = [32, 0], sizes = [16, 16], strides = [1, 1]} : vector<64x16xf32> to vector<16x16xf32>
    %cst_76 = arith.constant dense<0.000000e+00> : vector<16x16xf32>
    %182 = tpu.matmul %181, %145, %cst_76 {dimension_numbers = #tpu.dot_dimension_numbers<[1], [0], [0], [1], [0, 0, 1, 1], [], []>} : vector<16x16xf32>, vector<16x16xf32>, vector<16x16xf32> -> vector<16x16xf32>
    %183 = vector.extract_strided_slice %167 {offsets = [32, 0], sizes = [16, 64], strides = [1, 1]} : vector<64x64xbf16> to vector<16x64xbf16>
    %184 = arith.truncf %182 : vector<16x16xf32> to vector<16x16xbf16>
    %cst_77 = arith.constant dense<0.000000e+00> : vector<16x64xf32>
    %185 = tpu.matmul %184, %183, %cst_77 {dimension_numbers = #tpu.dot_dimension_numbers<[1], [0], [0], [1], [0, 0, 1, 1], [], []>} : vector<16x16xbf16>, vector<16x64xbf16>, vector<16x64xf32> -> vector<16x64xf32>
    %186 = arith.addf %180, %185 : vector<16x64xf32>
    %187 = vector.extract_strided_slice %165 {offsets = [48, 0], sizes = [16, 16], strides = [1, 1]} : vector<64x16xf32> to vector<16x16xf32>
    %cst_78 = arith.constant dense<0.000000e+00> : vector<16x16xf32>
    %188 = tpu.matmul %187, %145, %cst_78 {dimension_numbers = #tpu.dot_dimension_numbers<[1], [0], [0], [1], [0, 0, 1, 1], [], []>} : vector<16x16xf32>, vector<16x16xf32>, vector<16x16xf32> -> vector<16x16xf32>
    %189 = vector.extract_strided_slice %167 {offsets = [48, 0], sizes = [16, 64], strides = [1, 1]} : vector<64x64xbf16> to vector<16x64xbf16>
    %190 = arith.truncf %188 : vector<16x16xf32> to vector<16x16xbf16>
    %cst_79 = arith.constant dense<0.000000e+00> : vector<16x64xf32>
    %191 = tpu.matmul %190, %189, %cst_79 {dimension_numbers = #tpu.dot_dimension_numbers<[1], [0], [0], [1], [0, 0, 1, 1], [], []>} : vector<16x16xbf16>, vector<16x64xbf16>, vector<16x64xf32> -> vector<16x64xf32>
    %192 = arith.addf %186, %191 : vector<16x64xf32>
    %193 = arith.addf %114, %192 : vector<16x64xf32>
    %194 = arith.mulf %193, %193 : vector<16x64xf32>
    %cst_80 = arith.constant dense<0.000000e+00> : vector<16xf32>
    %195 = vector.multi_reduction <add>, %194, %cst_80 [1] : vector<16x64xf32> to vector<16xf32>
    %196 = vector.shape_cast %195 : vector<16xf32> to vector<16x1xf32>
    %cst_81 = arith.constant 6.400000e+01 : f32
    %197 = vector.broadcast %cst_81 : f32 to vector<16x1xf32>
    %198 = arith.divf %196, %197 : vector<16x1xf32>
    %cst_82 = arith.constant 9.99999997E-7 : f32
    %199 = vector.broadcast %cst_82 : f32 to vector<16x1xf32>
    %200 = arith.addf %198, %199 : vector<16x1xf32>
    %201 = math.rsqrt %200 : vector<16x1xf32>
    %202 = vector.broadcast %201 : vector<16x1xf32> to vector<16x64xf32>
    %203 = arith.mulf %193, %202 : vector<16x64xf32>
    %204 = vector.broadcast %118 : vector<1x64xf32> to vector<16x64xf32>
    %205 = arith.mulf %203, %204 : vector<16x64xf32>
    %c1_83 = arith.constant 1 : index
    %c0_84 = arith.constant 0 : index
    %c0_85 = arith.constant 0 : index
    %206 = vector.load %arg6[%c1_83, %c0_84, %c0_85] : memref<4x64x256xbf16, #tpu.memory_space<vmem>>, vector<1x64x256xbf16>
    %207 = vector.shape_cast %206 : vector<1x64x256xbf16> to vector<64x256xbf16>
    %208 = arith.truncf %205 : vector<16x64xf32> to vector<16x64xbf16>
    %cst_86 = arith.constant dense<0.000000e+00> : vector<16x256xf32>
    %209 = tpu.matmul %208, %207, %cst_86 {dimension_numbers = #tpu.dot_dimension_numbers<[1], [0], [0], [1], [0, 0, 1, 1], [], []>} : vector<16x64xbf16>, vector<64x256xbf16>, vector<16x256xf32> -> vector<16x256xf32>
    %c1_87 = arith.constant 1 : index
    %c0_88 = arith.constant 0 : index
    %c0_89 = arith.constant 0 : index
    %210 = vector.load %arg9[%c1_87, %c0_88, %c0_89] : memref<4x1x256xf32, #tpu.memory_space<vmem>>, vector<1x1x256xf32>
    %211 = vector.shape_cast %210 : vector<1x1x256xf32> to vector<1x256xf32>
    %212 = vector.broadcast %211 : vector<1x256xf32> to vector<16x256xf32>
    %213 = arith.addf %209, %212 : vector<16x256xf32>
    %cst_90 = arith.constant 0.000000e+00 : f32
    %214 = vector.broadcast %cst_90 : f32 to vector<16x256xf32>
    %215 = arith.maximumf %213, %214 : vector<16x256xf32>
    %c1_91 = arith.constant 1 : index
    %c0_92 = arith.constant 0 : index
    %c0_93 = arith.constant 0 : index
    %216 = vector.load %arg7[%c1_91, %c0_92, %c0_93] : memref<4x256x64xbf16, #tpu.memory_space<vmem>>, vector<1x256x64xbf16>
    %217 = vector.shape_cast %216 : vector<1x256x64xbf16> to vector<256x64xbf16>
    %218 = arith.truncf %215 : vector<16x256xf32> to vector<16x256xbf16>
    %cst_94 = arith.constant dense<0.000000e+00> : vector<16x64xf32>
    %219 = tpu.matmul %218, %217, %cst_94 {dimension_numbers = #tpu.dot_dimension_numbers<[1], [0], [0], [1], [0, 0, 1, 1], [], []>} : vector<16x256xbf16>, vector<256x64xbf16>, vector<16x64xf32> -> vector<16x64xf32>
    %220 = arith.addf %193, %219 : vector<16x64xf32>
    %221 = vector.broadcast %120 : vector<1x64xf32> to vector<16x64xf32>
    %222 = arith.addf %220, %221 : vector<16x64xf32>
    %c2 = arith.constant 2 : index
    %c0_95 = arith.constant 0 : index
    %c0_96 = arith.constant 0 : index
    %223 = vector.load %arg8[%c2, %c0_95, %c0_96] : memref<5x8x64xf32, #tpu.memory_space<vmem>>, vector<1x8x64xf32>
    %224 = vector.shape_cast %223 : vector<1x8x64xf32> to vector<8x64xf32>
    %225 = vector.extract_strided_slice %224 {offsets = [0, 0], sizes = [1, 64], strides = [1, 1]} : vector<8x64xf32> to vector<1x64xf32>
    %226 = vector.extract_strided_slice %224 {offsets = [1, 0], sizes = [1, 64], strides = [1, 1]} : vector<8x64xf32> to vector<1x64xf32>
    %227 = vector.extract_strided_slice %224 {offsets = [2, 0], sizes = [1, 64], strides = [1, 1]} : vector<8x64xf32> to vector<1x64xf32>
    %228 = vector.extract_strided_slice %224 {offsets = [3, 0], sizes = [1, 64], strides = [1, 1]} : vector<8x64xf32> to vector<1x64xf32>
    %229 = arith.mulf %222, %222 : vector<16x64xf32>
    %cst_97 = arith.constant dense<0.000000e+00> : vector<16xf32>
    %230 = vector.multi_reduction <add>, %229, %cst_97 [1] : vector<16x64xf32> to vector<16xf32>
    %231 = vector.shape_cast %230 : vector<16xf32> to vector<16x1xf32>
    %cst_98 = arith.constant 6.400000e+01 : f32
    %232 = vector.broadcast %cst_98 : f32 to vector<16x1xf32>
    %233 = arith.divf %231, %232 : vector<16x1xf32>
    %cst_99 = arith.constant 9.99999997E-7 : f32
    %234 = vector.broadcast %cst_99 : f32 to vector<16x1xf32>
    %235 = arith.addf %233, %234 : vector<16x1xf32>
    %236 = math.rsqrt %235 : vector<16x1xf32>
    %237 = vector.broadcast %236 : vector<16x1xf32> to vector<16x64xf32>
    %238 = arith.mulf %222, %237 : vector<16x64xf32>
    %239 = vector.broadcast %225 : vector<1x64xf32> to vector<16x64xf32>
    %240 = arith.mulf %238, %239 : vector<16x64xf32>
    %c2_100 = arith.constant 2 : index
    %c0_101 = arith.constant 0 : index
    %c0_102 = arith.constant 0 : index
    %241 = vector.load %arg4[%c2_100, %c0_101, %c0_102] : memref<4x64x128xbf16, #tpu.memory_space<vmem>>, vector<1x64x128xbf16>
    %242 = vector.shape_cast %241 : vector<1x64x128xbf16> to vector<64x128xbf16>
    %243 = arith.truncf %240 : vector<16x64xf32> to vector<16x64xbf16>
    %cst_103 = arith.constant dense<0.000000e+00> : vector<16x128xf32>
    %244 = tpu.matmul %243, %242, %cst_103 {dimension_numbers = #tpu.dot_dimension_numbers<[1], [0], [0], [1], [0, 0, 1, 1], [], []>} : vector<16x64xbf16>, vector<64x128xbf16>, vector<16x128xf32> -> vector<16x128xf32>
    %245 = arith.mulf %244, %2 : vector<16x128xf32>
    %cst_104 = arith.constant dense<0.000000e+00> : vector<16x128xf32>
    %246 = tpu.matmul %244, %5, %cst_104 {dimension_numbers = #tpu.dot_dimension_numbers<[1], [0], [0], [1], [0, 0, 1, 1], [], []>} : vector<16x128xf32>, vector<128x128xf32>, vector<16x128xf32> -> vector<16x128xf32>
    %247 = arith.mulf %246, %4 : vector<16x128xf32>
    %248 = arith.addf %245, %247 : vector<16x128xf32>
    %249 = vector.extract_strided_slice %248 {offsets = [0, 0], sizes = [16, 64], strides = [1, 1]} : vector<16x128xf32> to vector<16x64xf32>
    %250 = vector.extract_strided_slice %248 {offsets = [0, 64], sizes = [16, 16], strides = [1, 1]} : vector<16x128xf32> to vector<16x16xf32>
    %251 = vector.extract_strided_slice %248 {offsets = [0, 80], sizes = [16, 16], strides = [1, 1]} : vector<16x128xf32> to vector<16x16xf32>
    %252 = vector.extract_strided_slice %248 {offsets = [0, 96], sizes = [16, 16], strides = [1, 1]} : vector<16x128xf32> to vector<16x16xf32>
    %253 = vector.extract_strided_slice %248 {offsets = [0, 112], sizes = [16, 16], strides = [1, 1]} : vector<16x128xf32> to vector<16x16xf32>
    %254 = vector.extract_strided_slice %249 {offsets = [0, 0], sizes = [16, 16], strides = [1, 1]} : vector<16x64xf32> to vector<16x16xf32>
    %cst_105 = arith.constant dense<0.000000e+00> : vector<16x16xf32>
    %255 = tpu.matmul %254, %250, %cst_105 {dimension_numbers = #tpu.dot_dimension_numbers<[1], [1], [0], [0], [0, 0, 1, 0], [], []>} : vector<16x16xf32>, vector<16x16xf32>, vector<16x16xf32> -> vector<16x16xf32>
    %256 = vector.extract_strided_slice %249 {offsets = [0, 16], sizes = [16, 16], strides = [1, 1]} : vector<16x64xf32> to vector<16x16xf32>
    %cst_106 = arith.constant dense<0.000000e+00> : vector<16x16xf32>
    %257 = tpu.matmul %256, %250, %cst_106 {dimension_numbers = #tpu.dot_dimension_numbers<[1], [1], [0], [0], [0, 0, 1, 0], [], []>} : vector<16x16xf32>, vector<16x16xf32>, vector<16x16xf32> -> vector<16x16xf32>
    %258 = vector.extract_strided_slice %249 {offsets = [0, 32], sizes = [16, 16], strides = [1, 1]} : vector<16x64xf32> to vector<16x16xf32>
    %cst_107 = arith.constant dense<0.000000e+00> : vector<16x16xf32>
    %259 = tpu.matmul %258, %251, %cst_107 {dimension_numbers = #tpu.dot_dimension_numbers<[1], [1], [0], [0], [0, 0, 1, 0], [], []>} : vector<16x16xf32>, vector<16x16xf32>, vector<16x16xf32> -> vector<16x16xf32>
    %260 = vector.extract_strided_slice %249 {offsets = [0, 48], sizes = [16, 16], strides = [1, 1]} : vector<16x64xf32> to vector<16x16xf32>
    %cst_108 = arith.constant dense<0.000000e+00> : vector<16x16xf32>
    %261 = tpu.matmul %260, %251, %cst_108 {dimension_numbers = #tpu.dot_dimension_numbers<[1], [1], [0], [0], [0, 0, 1, 0], [], []>} : vector<16x16xf32>, vector<16x16xf32>, vector<16x16xf32> -> vector<16x16xf32>
    %262 = tpu.concatenate %255, %257, %259, %261 in 0 : vector<16x16xf32>, vector<16x16xf32>, vector<16x16xf32>, vector<16x16xf32> -> vector<64x16xf32>
    %263 = arith.addf %262, %6 : vector<64x16xf32>
    %cst_109 = arith.constant dense<0xFF800000> : vector<64xf32>
    %264 = vector.multi_reduction <maximumf>, %263, %cst_109 [1] : vector<64x16xf32> to vector<64xf32>
    %265 = vector.shape_cast %264 : vector<64xf32> to vector<64x1xf32>
    %266 = vector.broadcast %265 : vector<64x1xf32> to vector<64x16xf32>
    %267 = arith.subf %263, %266 : vector<64x16xf32>
    %268 = math.exp %267 : vector<64x16xf32>
    %cst_110 = arith.constant dense<0.000000e+00> : vector<64xf32>
    %269 = vector.multi_reduction <add>, %268, %cst_110 [1] : vector<64x16xf32> to vector<64xf32>
    %270 = vector.shape_cast %269 : vector<64xf32> to vector<64x1xf32>
    %271 = tpu.reciprocal %270 : vector<64x1xf32> -> vector<64x1xf32>
    %272 = vector.broadcast %271 : vector<64x1xf32> to vector<64x16xf32>
    %273 = arith.mulf %268, %272 : vector<64x16xf32>
    %c2_111 = arith.constant 2 : index
    %c0_112 = arith.constant 0 : index
    %c0_113 = arith.constant 0 : index
    %274 = vector.load %arg5[%c2_111, %c0_112, %c0_113] : memref<4x64x64xbf16, #tpu.memory_space<vmem>>, vector<1x64x64xbf16>
    %275 = vector.shape_cast %274 : vector<1x64x64xbf16> to vector<64x64xbf16>
    %276 = vector.extract_strided_slice %273 {offsets = [0, 0], sizes = [16, 16], strides = [1, 1]} : vector<64x16xf32> to vector<16x16xf32>
    %cst_114 = arith.constant dense<0.000000e+00> : vector<16x16xf32>
    %277 = tpu.matmul %276, %252, %cst_114 {dimension_numbers = #tpu.dot_dimension_numbers<[1], [0], [0], [1], [0, 0, 1, 1], [], []>} : vector<16x16xf32>, vector<16x16xf32>, vector<16x16xf32> -> vector<16x16xf32>
    %278 = vector.extract_strided_slice %275 {offsets = [0, 0], sizes = [16, 64], strides = [1, 1]} : vector<64x64xbf16> to vector<16x64xbf16>
    %279 = arith.truncf %277 : vector<16x16xf32> to vector<16x16xbf16>
    %cst_115 = arith.constant dense<0.000000e+00> : vector<16x64xf32>
    %280 = tpu.matmul %279, %278, %cst_115 {dimension_numbers = #tpu.dot_dimension_numbers<[1], [0], [0], [1], [0, 0, 1, 1], [], []>} : vector<16x16xbf16>, vector<16x64xbf16>, vector<16x64xf32> -> vector<16x64xf32>
    %281 = vector.broadcast %227 : vector<1x64xf32> to vector<16x64xf32>
    %282 = arith.addf %281, %280 : vector<16x64xf32>
    %283 = vector.extract_strided_slice %273 {offsets = [16, 0], sizes = [16, 16], strides = [1, 1]} : vector<64x16xf32> to vector<16x16xf32>
    %cst_116 = arith.constant dense<0.000000e+00> : vector<16x16xf32>
    %284 = tpu.matmul %283, %252, %cst_116 {dimension_numbers = #tpu.dot_dimension_numbers<[1], [0], [0], [1], [0, 0, 1, 1], [], []>} : vector<16x16xf32>, vector<16x16xf32>, vector<16x16xf32> -> vector<16x16xf32>
    %285 = vector.extract_strided_slice %275 {offsets = [16, 0], sizes = [16, 64], strides = [1, 1]} : vector<64x64xbf16> to vector<16x64xbf16>
    %286 = arith.truncf %284 : vector<16x16xf32> to vector<16x16xbf16>
    %cst_117 = arith.constant dense<0.000000e+00> : vector<16x64xf32>
    %287 = tpu.matmul %286, %285, %cst_117 {dimension_numbers = #tpu.dot_dimension_numbers<[1], [0], [0], [1], [0, 0, 1, 1], [], []>} : vector<16x16xbf16>, vector<16x64xbf16>, vector<16x64xf32> -> vector<16x64xf32>
    %288 = arith.addf %282, %287 : vector<16x64xf32>
    %289 = vector.extract_strided_slice %273 {offsets = [32, 0], sizes = [16, 16], strides = [1, 1]} : vector<64x16xf32> to vector<16x16xf32>
    %cst_118 = arith.constant dense<0.000000e+00> : vector<16x16xf32>
    %290 = tpu.matmul %289, %253, %cst_118 {dimension_numbers = #tpu.dot_dimension_numbers<[1], [0], [0], [1], [0, 0, 1, 1], [], []>} : vector<16x16xf32>, vector<16x16xf32>, vector<16x16xf32> -> vector<16x16xf32>
    %291 = vector.extract_strided_slice %275 {offsets = [32, 0], sizes = [16, 64], strides = [1, 1]} : vector<64x64xbf16> to vector<16x64xbf16>
    %292 = arith.truncf %290 : vector<16x16xf32> to vector<16x16xbf16>
    %cst_119 = arith.constant dense<0.000000e+00> : vector<16x64xf32>
    %293 = tpu.matmul %292, %291, %cst_119 {dimension_numbers = #tpu.dot_dimension_numbers<[1], [0], [0], [1], [0, 0, 1, 1], [], []>} : vector<16x16xbf16>, vector<16x64xbf16>, vector<16x64xf32> -> vector<16x64xf32>
    %294 = arith.addf %288, %293 : vector<16x64xf32>
    %295 = vector.extract_strided_slice %273 {offsets = [48, 0], sizes = [16, 16], strides = [1, 1]} : vector<64x16xf32> to vector<16x16xf32>
    %cst_120 = arith.constant dense<0.000000e+00> : vector<16x16xf32>
    %296 = tpu.matmul %295, %253, %cst_120 {dimension_numbers = #tpu.dot_dimension_numbers<[1], [0], [0], [1], [0, 0, 1, 1], [], []>} : vector<16x16xf32>, vector<16x16xf32>, vector<16x16xf32> -> vector<16x16xf32>
    %297 = vector.extract_strided_slice %275 {offsets = [48, 0], sizes = [16, 64], strides = [1, 1]} : vector<64x64xbf16> to vector<16x64xbf16>
    %298 = arith.truncf %296 : vector<16x16xf32> to vector<16x16xbf16>
    %cst_121 = arith.constant dense<0.000000e+00> : vector<16x64xf32>
    %299 = tpu.matmul %298, %297, %cst_121 {dimension_numbers = #tpu.dot_dimension_numbers<[1], [0], [0], [1], [0, 0, 1, 1], [], []>} : vector<16x16xbf16>, vector<16x64xbf16>, vector<16x64xf32> -> vector<16x64xf32>
    %300 = arith.addf %294, %299 : vector<16x64xf32>
    %301 = arith.addf %222, %300 : vector<16x64xf32>
    %302 = arith.mulf %301, %301 : vector<16x64xf32>
    %cst_122 = arith.constant dense<0.000000e+00> : vector<16xf32>
    %303 = vector.multi_reduction <add>, %302, %cst_122 [1] : vector<16x64xf32> to vector<16xf32>
    %304 = vector.shape_cast %303 : vector<16xf32> to vector<16x1xf32>
    %cst_123 = arith.constant 6.400000e+01 : f32
    %305 = vector.broadcast %cst_123 : f32 to vector<16x1xf32>
    %306 = arith.divf %304, %305 : vector<16x1xf32>
    %cst_124 = arith.constant 9.99999997E-7 : f32
    %307 = vector.broadcast %cst_124 : f32 to vector<16x1xf32>
    %308 = arith.addf %306, %307 : vector<16x1xf32>
    %309 = math.rsqrt %308 : vector<16x1xf32>
    %310 = vector.broadcast %309 : vector<16x1xf32> to vector<16x64xf32>
    %311 = arith.mulf %301, %310 : vector<16x64xf32>
    %312 = vector.broadcast %226 : vector<1x64xf32> to vector<16x64xf32>
    %313 = arith.mulf %311, %312 : vector<16x64xf32>
    %c2_125 = arith.constant 2 : index
    %c0_126 = arith.constant 0 : index
    %c0_127 = arith.constant 0 : index
    %314 = vector.load %arg6[%c2_125, %c0_126, %c0_127] : memref<4x64x256xbf16, #tpu.memory_space<vmem>>, vector<1x64x256xbf16>
    %315 = vector.shape_cast %314 : vector<1x64x256xbf16> to vector<64x256xbf16>
    %316 = arith.truncf %313 : vector<16x64xf32> to vector<16x64xbf16>
    %cst_128 = arith.constant dense<0.000000e+00> : vector<16x256xf32>
    %317 = tpu.matmul %316, %315, %cst_128 {dimension_numbers = #tpu.dot_dimension_numbers<[1], [0], [0], [1], [0, 0, 1, 1], [], []>} : vector<16x64xbf16>, vector<64x256xbf16>, vector<16x256xf32> -> vector<16x256xf32>
    %c2_129 = arith.constant 2 : index
    %c0_130 = arith.constant 0 : index
    %c0_131 = arith.constant 0 : index
    %318 = vector.load %arg9[%c2_129, %c0_130, %c0_131] : memref<4x1x256xf32, #tpu.memory_space<vmem>>, vector<1x1x256xf32>
    %319 = vector.shape_cast %318 : vector<1x1x256xf32> to vector<1x256xf32>
    %320 = vector.broadcast %319 : vector<1x256xf32> to vector<16x256xf32>
    %321 = arith.addf %317, %320 : vector<16x256xf32>
    %cst_132 = arith.constant 0.000000e+00 : f32
    %322 = vector.broadcast %cst_132 : f32 to vector<16x256xf32>
    %323 = arith.maximumf %321, %322 : vector<16x256xf32>
    %c2_133 = arith.constant 2 : index
    %c0_134 = arith.constant 0 : index
    %c0_135 = arith.constant 0 : index
    %324 = vector.load %arg7[%c2_133, %c0_134, %c0_135] : memref<4x256x64xbf16, #tpu.memory_space<vmem>>, vector<1x256x64xbf16>
    %325 = vector.shape_cast %324 : vector<1x256x64xbf16> to vector<256x64xbf16>
    %326 = arith.truncf %323 : vector<16x256xf32> to vector<16x256xbf16>
    %cst_136 = arith.constant dense<0.000000e+00> : vector<16x64xf32>
    %327 = tpu.matmul %326, %325, %cst_136 {dimension_numbers = #tpu.dot_dimension_numbers<[1], [0], [0], [1], [0, 0, 1, 1], [], []>} : vector<16x256xbf16>, vector<256x64xbf16>, vector<16x64xf32> -> vector<16x64xf32>
    %328 = arith.addf %301, %327 : vector<16x64xf32>
    %329 = vector.broadcast %228 : vector<1x64xf32> to vector<16x64xf32>
    %330 = arith.addf %328, %329 : vector<16x64xf32>
    %c3 = arith.constant 3 : index
    %c0_137 = arith.constant 0 : index
    %c0_138 = arith.constant 0 : index
    %331 = vector.load %arg8[%c3, %c0_137, %c0_138] : memref<5x8x64xf32, #tpu.memory_space<vmem>>, vector<1x8x64xf32>
    %332 = vector.shape_cast %331 : vector<1x8x64xf32> to vector<8x64xf32>
    %333 = vector.extract_strided_slice %332 {offsets = [0, 0], sizes = [1, 64], strides = [1, 1]} : vector<8x64xf32> to vector<1x64xf32>
    %334 = vector.extract_strided_slice %332 {offsets = [1, 0], sizes = [1, 64], strides = [1, 1]} : vector<8x64xf32> to vector<1x64xf32>
    %335 = vector.extract_strided_slice %332 {offsets = [2, 0], sizes = [1, 64], strides = [1, 1]} : vector<8x64xf32> to vector<1x64xf32>
    %336 = vector.extract_strided_slice %332 {offsets = [3, 0], sizes = [1, 64], strides = [1, 1]} : vector<8x64xf32> to vector<1x64xf32>
    %337 = arith.mulf %330, %330 : vector<16x64xf32>
    %cst_139 = arith.constant dense<0.000000e+00> : vector<16xf32>
    %338 = vector.multi_reduction <add>, %337, %cst_139 [1] : vector<16x64xf32> to vector<16xf32>
    %339 = vector.shape_cast %338 : vector<16xf32> to vector<16x1xf32>
    %cst_140 = arith.constant 6.400000e+01 : f32
    %340 = vector.broadcast %cst_140 : f32 to vector<16x1xf32>
    %341 = arith.divf %339, %340 : vector<16x1xf32>
    %cst_141 = arith.constant 9.99999997E-7 : f32
    %342 = vector.broadcast %cst_141 : f32 to vector<16x1xf32>
    %343 = arith.addf %341, %342 : vector<16x1xf32>
    %344 = math.rsqrt %343 : vector<16x1xf32>
    %345 = vector.broadcast %344 : vector<16x1xf32> to vector<16x64xf32>
    %346 = arith.mulf %330, %345 : vector<16x64xf32>
    %347 = vector.broadcast %333 : vector<1x64xf32> to vector<16x64xf32>
    %348 = arith.mulf %346, %347 : vector<16x64xf32>
    %c3_142 = arith.constant 3 : index
    %c0_143 = arith.constant 0 : index
    %c0_144 = arith.constant 0 : index
    %349 = vector.load %arg4[%c3_142, %c0_143, %c0_144] : memref<4x64x128xbf16, #tpu.memory_space<vmem>>, vector<1x64x128xbf16>
    %350 = vector.shape_cast %349 : vector<1x64x128xbf16> to vector<64x128xbf16>
    %351 = arith.truncf %348 : vector<16x64xf32> to vector<16x64xbf16>
    %cst_145 = arith.constant dense<0.000000e+00> : vector<16x128xf32>
    %352 = tpu.matmul %351, %350, %cst_145 {dimension_numbers = #tpu.dot_dimension_numbers<[1], [0], [0], [1], [0, 0, 1, 1], [], []>} : vector<16x64xbf16>, vector<64x128xbf16>, vector<16x128xf32> -> vector<16x128xf32>
    %353 = arith.mulf %352, %2 : vector<16x128xf32>
    %cst_146 = arith.constant dense<0.000000e+00> : vector<16x128xf32>
    %354 = tpu.matmul %352, %5, %cst_146 {dimension_numbers = #tpu.dot_dimension_numbers<[1], [0], [0], [1], [0, 0, 1, 1], [], []>} : vector<16x128xf32>, vector<128x128xf32>, vector<16x128xf32> -> vector<16x128xf32>
    %355 = arith.mulf %354, %4 : vector<16x128xf32>
    %356 = arith.addf %353, %355 : vector<16x128xf32>
    %357 = vector.extract_strided_slice %356 {offsets = [0, 0], sizes = [16, 64], strides = [1, 1]} : vector<16x128xf32> to vector<16x64xf32>
    %358 = vector.extract_strided_slice %356 {offsets = [0, 64], sizes = [16, 16], strides = [1, 1]} : vector<16x128xf32> to vector<16x16xf32>
    %359 = vector.extract_strided_slice %356 {offsets = [0, 80], sizes = [16, 16], strides = [1, 1]} : vector<16x128xf32> to vector<16x16xf32>
    %360 = vector.extract_strided_slice %356 {offsets = [0, 96], sizes = [16, 16], strides = [1, 1]} : vector<16x128xf32> to vector<16x16xf32>
    %361 = vector.extract_strided_slice %356 {offsets = [0, 112], sizes = [16, 16], strides = [1, 1]} : vector<16x128xf32> to vector<16x16xf32>
    %362 = vector.extract_strided_slice %357 {offsets = [0, 0], sizes = [16, 16], strides = [1, 1]} : vector<16x64xf32> to vector<16x16xf32>
    %cst_147 = arith.constant dense<0.000000e+00> : vector<16x16xf32>
    %363 = tpu.matmul %362, %358, %cst_147 {dimension_numbers = #tpu.dot_dimension_numbers<[1], [1], [0], [0], [0, 0, 1, 0], [], []>} : vector<16x16xf32>, vector<16x16xf32>, vector<16x16xf32> -> vector<16x16xf32>
    %364 = vector.extract_strided_slice %357 {offsets = [0, 16], sizes = [16, 16], strides = [1, 1]} : vector<16x64xf32> to vector<16x16xf32>
    %cst_148 = arith.constant dense<0.000000e+00> : vector<16x16xf32>
    %365 = tpu.matmul %364, %358, %cst_148 {dimension_numbers = #tpu.dot_dimension_numbers<[1], [1], [0], [0], [0, 0, 1, 0], [], []>} : vector<16x16xf32>, vector<16x16xf32>, vector<16x16xf32> -> vector<16x16xf32>
    %366 = vector.extract_strided_slice %357 {offsets = [0, 32], sizes = [16, 16], strides = [1, 1]} : vector<16x64xf32> to vector<16x16xf32>
    %cst_149 = arith.constant dense<0.000000e+00> : vector<16x16xf32>
    %367 = tpu.matmul %366, %359, %cst_149 {dimension_numbers = #tpu.dot_dimension_numbers<[1], [1], [0], [0], [0, 0, 1, 0], [], []>} : vector<16x16xf32>, vector<16x16xf32>, vector<16x16xf32> -> vector<16x16xf32>
    %368 = vector.extract_strided_slice %357 {offsets = [0, 48], sizes = [16, 16], strides = [1, 1]} : vector<16x64xf32> to vector<16x16xf32>
    %cst_150 = arith.constant dense<0.000000e+00> : vector<16x16xf32>
    %369 = tpu.matmul %368, %359, %cst_150 {dimension_numbers = #tpu.dot_dimension_numbers<[1], [1], [0], [0], [0, 0, 1, 0], [], []>} : vector<16x16xf32>, vector<16x16xf32>, vector<16x16xf32> -> vector<16x16xf32>
    %370 = tpu.concatenate %363, %365, %367, %369 in 0 : vector<16x16xf32>, vector<16x16xf32>, vector<16x16xf32>, vector<16x16xf32> -> vector<64x16xf32>
    %371 = arith.addf %370, %6 : vector<64x16xf32>
    %cst_151 = arith.constant dense<0xFF800000> : vector<64xf32>
    %372 = vector.multi_reduction <maximumf>, %371, %cst_151 [1] : vector<64x16xf32> to vector<64xf32>
    %373 = vector.shape_cast %372 : vector<64xf32> to vector<64x1xf32>
    %374 = vector.broadcast %373 : vector<64x1xf32> to vector<64x16xf32>
    %375 = arith.subf %371, %374 : vector<64x16xf32>
    %376 = math.exp %375 : vector<64x16xf32>
    %cst_152 = arith.constant dense<0.000000e+00> : vector<64xf32>
    %377 = vector.multi_reduction <add>, %376, %cst_152 [1] : vector<64x16xf32> to vector<64xf32>
    %378 = vector.shape_cast %377 : vector<64xf32> to vector<64x1xf32>
    %379 = tpu.reciprocal %378 : vector<64x1xf32> -> vector<64x1xf32>
    %380 = vector.broadcast %379 : vector<64x1xf32> to vector<64x16xf32>
    %381 = arith.mulf %376, %380 : vector<64x16xf32>
    %c3_153 = arith.constant 3 : index
    %c0_154 = arith.constant 0 : index
    %c0_155 = arith.constant 0 : index
    %382 = vector.load %arg5[%c3_153, %c0_154, %c0_155] : memref<4x64x64xbf16, #tpu.memory_space<vmem>>, vector<1x64x64xbf16>
    %383 = vector.shape_cast %382 : vector<1x64x64xbf16> to vector<64x64xbf16>
    %384 = vector.extract_strided_slice %381 {offsets = [0, 0], sizes = [16, 16], strides = [1, 1]} : vector<64x16xf32> to vector<16x16xf32>
    %cst_156 = arith.constant dense<0.000000e+00> : vector<16x16xf32>
    %385 = tpu.matmul %384, %360, %cst_156 {dimension_numbers = #tpu.dot_dimension_numbers<[1], [0], [0], [1], [0, 0, 1, 1], [], []>} : vector<16x16xf32>, vector<16x16xf32>, vector<16x16xf32> -> vector<16x16xf32>
    %386 = vector.extract_strided_slice %383 {offsets = [0, 0], sizes = [16, 64], strides = [1, 1]} : vector<64x64xbf16> to vector<16x64xbf16>
    %387 = arith.truncf %385 : vector<16x16xf32> to vector<16x16xbf16>
    %cst_157 = arith.constant dense<0.000000e+00> : vector<16x64xf32>
    %388 = tpu.matmul %387, %386, %cst_157 {dimension_numbers = #tpu.dot_dimension_numbers<[1], [0], [0], [1], [0, 0, 1, 1], [], []>} : vector<16x16xbf16>, vector<16x64xbf16>, vector<16x64xf32> -> vector<16x64xf32>
    %389 = vector.broadcast %335 : vector<1x64xf32> to vector<16x64xf32>
    %390 = arith.addf %389, %388 : vector<16x64xf32>
    %391 = vector.extract_strided_slice %381 {offsets = [16, 0], sizes = [16, 16], strides = [1, 1]} : vector<64x16xf32> to vector<16x16xf32>
    %cst_158 = arith.constant dense<0.000000e+00> : vector<16x16xf32>
    %392 = tpu.matmul %391, %360, %cst_158 {dimension_numbers = #tpu.dot_dimension_numbers<[1], [0], [0], [1], [0, 0, 1, 1], [], []>} : vector<16x16xf32>, vector<16x16xf32>, vector<16x16xf32> -> vector<16x16xf32>
    %393 = vector.extract_strided_slice %383 {offsets = [16, 0], sizes = [16, 64], strides = [1, 1]} : vector<64x64xbf16> to vector<16x64xbf16>
    %394 = arith.truncf %392 : vector<16x16xf32> to vector<16x16xbf16>
    %cst_159 = arith.constant dense<0.000000e+00> : vector<16x64xf32>
    %395 = tpu.matmul %394, %393, %cst_159 {dimension_numbers = #tpu.dot_dimension_numbers<[1], [0], [0], [1], [0, 0, 1, 1], [], []>} : vector<16x16xbf16>, vector<16x64xbf16>, vector<16x64xf32> -> vector<16x64xf32>
    %396 = arith.addf %390, %395 : vector<16x64xf32>
    %397 = vector.extract_strided_slice %381 {offsets = [32, 0], sizes = [16, 16], strides = [1, 1]} : vector<64x16xf32> to vector<16x16xf32>
    %cst_160 = arith.constant dense<0.000000e+00> : vector<16x16xf32>
    %398 = tpu.matmul %397, %361, %cst_160 {dimension_numbers = #tpu.dot_dimension_numbers<[1], [0], [0], [1], [0, 0, 1, 1], [], []>} : vector<16x16xf32>, vector<16x16xf32>, vector<16x16xf32> -> vector<16x16xf32>
    %399 = vector.extract_strided_slice %383 {offsets = [32, 0], sizes = [16, 64], strides = [1, 1]} : vector<64x64xbf16> to vector<16x64xbf16>
    %400 = arith.truncf %398 : vector<16x16xf32> to vector<16x16xbf16>
    %cst_161 = arith.constant dense<0.000000e+00> : vector<16x64xf32>
    %401 = tpu.matmul %400, %399, %cst_161 {dimension_numbers = #tpu.dot_dimension_numbers<[1], [0], [0], [1], [0, 0, 1, 1], [], []>} : vector<16x16xbf16>, vector<16x64xbf16>, vector<16x64xf32> -> vector<16x64xf32>
    %402 = arith.addf %396, %401 : vector<16x64xf32>
    %403 = vector.extract_strided_slice %381 {offsets = [48, 0], sizes = [16, 16], strides = [1, 1]} : vector<64x16xf32> to vector<16x16xf32>
    %cst_162 = arith.constant dense<0.000000e+00> : vector<16x16xf32>
    %404 = tpu.matmul %403, %361, %cst_162 {dimension_numbers = #tpu.dot_dimension_numbers<[1], [0], [0], [1], [0, 0, 1, 1], [], []>} : vector<16x16xf32>, vector<16x16xf32>, vector<16x16xf32> -> vector<16x16xf32>
    %405 = vector.extract_strided_slice %383 {offsets = [48, 0], sizes = [16, 64], strides = [1, 1]} : vector<64x64xbf16> to vector<16x64xbf16>
    %406 = arith.truncf %404 : vector<16x16xf32> to vector<16x16xbf16>
    %cst_163 = arith.constant dense<0.000000e+00> : vector<16x64xf32>
    %407 = tpu.matmul %406, %405, %cst_163 {dimension_numbers = #tpu.dot_dimension_numbers<[1], [0], [0], [1], [0, 0, 1, 1], [], []>} : vector<16x16xbf16>, vector<16x64xbf16>, vector<16x64xf32> -> vector<16x64xf32>
    %408 = arith.addf %402, %407 : vector<16x64xf32>
    %409 = arith.addf %330, %408 : vector<16x64xf32>
    %410 = arith.mulf %409, %409 : vector<16x64xf32>
    %cst_164 = arith.constant dense<0.000000e+00> : vector<16xf32>
    %411 = vector.multi_reduction <add>, %410, %cst_164 [1] : vector<16x64xf32> to vector<16xf32>
    %412 = vector.shape_cast %411 : vector<16xf32> to vector<16x1xf32>
    %cst_165 = arith.constant 6.400000e+01 : f32
    %413 = vector.broadcast %cst_165 : f32 to vector<16x1xf32>
    %414 = arith.divf %412, %413 : vector<16x1xf32>
    %cst_166 = arith.constant 9.99999997E-7 : f32
    %415 = vector.broadcast %cst_166 : f32 to vector<16x1xf32>
    %416 = arith.addf %414, %415 : vector<16x1xf32>
    %417 = math.rsqrt %416 : vector<16x1xf32>
    %418 = vector.broadcast %417 : vector<16x1xf32> to vector<16x64xf32>
    %419 = arith.mulf %409, %418 : vector<16x64xf32>
    %420 = vector.broadcast %334 : vector<1x64xf32> to vector<16x64xf32>
    %421 = arith.mulf %419, %420 : vector<16x64xf32>
    %c3_167 = arith.constant 3 : index
    %c0_168 = arith.constant 0 : index
    %c0_169 = arith.constant 0 : index
    %422 = vector.load %arg6[%c3_167, %c0_168, %c0_169] : memref<4x64x256xbf16, #tpu.memory_space<vmem>>, vector<1x64x256xbf16>
    %423 = vector.shape_cast %422 : vector<1x64x256xbf16> to vector<64x256xbf16>
    %424 = arith.truncf %421 : vector<16x64xf32> to vector<16x64xbf16>
    %cst_170 = arith.constant dense<0.000000e+00> : vector<16x256xf32>
    %425 = tpu.matmul %424, %423, %cst_170 {dimension_numbers = #tpu.dot_dimension_numbers<[1], [0], [0], [1], [0, 0, 1, 1], [], []>} : vector<16x64xbf16>, vector<64x256xbf16>, vector<16x256xf32> -> vector<16x256xf32>
    %c3_171 = arith.constant 3 : index
    %c0_172 = arith.constant 0 : index
    %c0_173 = arith.constant 0 : index
    %426 = vector.load %arg9[%c3_171, %c0_172, %c0_173] : memref<4x1x256xf32, #tpu.memory_space<vmem>>, vector<1x1x256xf32>
    %427 = vector.shape_cast %426 : vector<1x1x256xf32> to vector<1x256xf32>
    %428 = vector.broadcast %427 : vector<1x256xf32> to vector<16x256xf32>
    %429 = arith.addf %425, %428 : vector<16x256xf32>
    %cst_174 = arith.constant 0.000000e+00 : f32
    %430 = vector.broadcast %cst_174 : f32 to vector<16x256xf32>
    %431 = arith.maximumf %429, %430 : vector<16x256xf32>
    %c3_175 = arith.constant 3 : index
    %c0_176 = arith.constant 0 : index
    %c0_177 = arith.constant 0 : index
    %432 = vector.load %arg7[%c3_175, %c0_176, %c0_177] : memref<4x256x64xbf16, #tpu.memory_space<vmem>>, vector<1x256x64xbf16>
    %433 = vector.shape_cast %432 : vector<1x256x64xbf16> to vector<256x64xbf16>
    %434 = arith.truncf %431 : vector<16x256xf32> to vector<16x256xbf16>
    %cst_178 = arith.constant dense<0.000000e+00> : vector<16x64xf32>
    %435 = tpu.matmul %434, %433, %cst_178 {dimension_numbers = #tpu.dot_dimension_numbers<[1], [0], [0], [1], [0, 0, 1, 1], [], []>} : vector<16x256xbf16>, vector<256x64xbf16>, vector<16x64xf32> -> vector<16x64xf32>
    %436 = arith.addf %409, %435 : vector<16x64xf32>
    %437 = vector.broadcast %336 : vector<1x64xf32> to vector<16x64xf32>
    %438 = arith.addf %436, %437 : vector<16x64xf32>
    %c4 = arith.constant 4 : index
    %c0_179 = arith.constant 0 : index
    %c0_180 = arith.constant 0 : index
    %439 = vector.load %arg8[%c4, %c0_179, %c0_180] : memref<5x8x64xf32, #tpu.memory_space<vmem>>, vector<1x8x64xf32>
    %440 = vector.shape_cast %439 : vector<1x8x64xf32> to vector<8x64xf32>
    %441 = vector.extract_strided_slice %440 {offsets = [0, 0], sizes = [1, 64], strides = [1, 1]} : vector<8x64xf32> to vector<1x64xf32>
    %442 = arith.mulf %438, %438 : vector<16x64xf32>
    %cst_181 = arith.constant dense<0.000000e+00> : vector<16xf32>
    %443 = vector.multi_reduction <add>, %442, %cst_181 [1] : vector<16x64xf32> to vector<16xf32>
    %444 = vector.shape_cast %443 : vector<16xf32> to vector<16x1xf32>
    %cst_182 = arith.constant 6.400000e+01 : f32
    %445 = vector.broadcast %cst_182 : f32 to vector<16x1xf32>
    %446 = arith.divf %444, %445 : vector<16x1xf32>
    %cst_183 = arith.constant 9.99999997E-7 : f32
    %447 = vector.broadcast %cst_183 : f32 to vector<16x1xf32>
    %448 = arith.addf %446, %447 : vector<16x1xf32>
    %449 = math.rsqrt %448 : vector<16x1xf32>
    %450 = vector.broadcast %449 : vector<16x1xf32> to vector<16x64xf32>
    %451 = arith.mulf %438, %450 : vector<16x64xf32>
    %452 = vector.broadcast %441 : vector<1x64xf32> to vector<16x64xf32>
    %453 = arith.mulf %451, %452 : vector<16x64xf32>
    %c0_184 = arith.constant 0 : index
    %c0_185 = arith.constant 0 : index
    %454 = vector.load %arg10[%c0_184, %c0_185] : memref<64x128xbf16, #tpu.memory_space<vmem>>, vector<64x128xbf16>
    %455 = arith.truncf %453 : vector<16x64xf32> to vector<16x64xbf16>
    %cst_186 = arith.constant dense<0.000000e+00> : vector<16x128xf32>
    %456 = tpu.matmul %455, %454, %cst_186 {dimension_numbers = #tpu.dot_dimension_numbers<[1], [0], [0], [1], [0, 0, 1, 1], [], []>} : vector<16x64xbf16>, vector<64x128xbf16>, vector<16x128xf32> -> vector<16x128xf32>
    %c0_187 = arith.constant 0 : index
    %c0_188 = arith.constant 0 : index
    %457 = vector.load %arg11[%c0_187, %c0_188] : memref<1x128xf32, #tpu.memory_space<vmem>>, vector<1x128xf32>
    %458 = vector.broadcast %457 : vector<1x128xf32> to vector<16x128xf32>
    %459 = arith.addf %456, %458 : vector<16x128xf32>
    %c0_189 = arith.constant 0 : index
    %c0_190 = arith.constant 0 : index
    %460 = vector.load %arg12[%c0_189, %c0_190] : memref<16x128xf32, #tpu.memory_space<vmem>>, vector<16x128xf32>
    tpu.vector_store %arg12[%c0_189, %c0_190], %459 {strides = array<i32>} : memref<16x128xf32, #tpu.memory_space<vmem>>, vector<16x128xf32>,
    return
  }
}

</mosaic_0001>

<bundles_post_ra>
// kernel: tpu_custom_call.1
= control target key start
LH: loop header
LB: loop body
LE: loop exit
PB: predicated region body
PF: predicated region fallthrough
CT: control target
= control target key end

     0   :  { %vm77_vm0 = vcmask 523264   ;;  %s7379_s0 = inlined_call_operand.vmem [shape: f32[16,64], index: 0, kind: input, shape index: {}]   ;;  %s7380_s1 = inlined_call_operand.vmem [shape: f32[2,16,128], index: 1, kind: input, shape index: {}]   ;;  %s7381_s2 = inlined_call_operand.vmem [shape: f32[128,128], index: 2, kind: input, shape index: {}]   ;;  %s7382_s3 = inlined_call_operand.vmem [shape: f32[64,16], index: 3, kind: input, shape index: {}]   ;;  %s7383_s4 = inlined_call_operand.vmem [shape: bf16[4,64,128], index: 4, kind: input, shape index: {}]   ;;  %s7384_s5 = inlined_call_operand.vmem [shape: bf16[4,64,64], index: 5, kind: input, shape index: {}]   ;;  %s7385_s6 = inlined_call_operand.vmem [shape: bf16[4,64,256], index: 6, kind: input, shape index: {}]   ;;  %s7386_s7 = inlined_call_operand.vmem [shape: bf16[4,256,64], index: 7, kind: input, shape index: {}]   ;;  %s7387_s8 = inlined_call_operand.vmem [shape: f32[5,8,64], index: 8, kind: input, shape index: {}]   ;;  %s7388_s9 = inlined_call_operand.vmem [shape: f32[4,1,256], index: 9, kind: input, shape index: {}]   ;;  %s7389_s10 = inlined_call_operand.vmem [shape: bf16[64,128], index: 10, kind: input, shape index: {}]   ;;  %s7390_s11 = inlined_call_operand.vmem [shape: f32[1,128], index: 11, kind: input, shape index: {}]   ;;  %s7391_s12 = inlined_call_operand.hbm [shape: f32[16,128], index: 12, kind: output, shape index: {}]  }
   0x1   :  { %v5522_v0 = vld [vmem:[%s7379_s0] sm:$0xff] }
   0x2   :  { %v75_v1 = vmul.f32 %v5522_v0, %v5522_v0 }
   0x3   :  { %17 = vsyncpa [#allocation3], 0  ;;  %v5529_v2 = vld [vmem:[%s7379_s0 + $0x8] sm:$0xff]  ;;  %v5443_v6 = vmov 64.0   ;;  %v4999_v10 = vld [vmem:[%s7383_s4 + $0x18] sm:$0xff]  ;;  %s5444_s14 = smov 112  }
   0x4   :  { %v78_v3 = vsel %vm77_vm0, %v75_v1, 0.0  ;;  %v76_v4 = vmul.f32 %v5529_v2, %v5529_v2  ;;  %5182 = vrcp.f32 %v5443_v6  ;;  %160 = vmatpush.bf16.msra.mxu0 %v4999_v10  ;;  %v4998_v12 = vld [vmem:[%s7383_s4 + $0x10] sm:$0xff]  ;;  %v4997_v14 = vld [vmem:[%s7383_s4 + $0x8] sm:$0xff]  ;;  %v4996_v16 = vld [vmem:[%s7383_s4] sm:$0xff]  ;;  %s5445_s19 = smov 48   ;;  %s5446_s20 = smov 64  }
   0x5   :  { %79 = vadd.xlane.f32.xlu0 %v78_v3  ;;  %v5553_v20 = vld [vmem:[%s7381_s2 + $0x78] sm:$0xff]  ;;  %v5558_v21 = vld [vmem:[%s7381_s2 + $0x70] sm:$0xff]  ;;  %v5564_v22 = vld [vmem:[%s7381_s2 + $0x68] sm:$0xff]  ;;  %s5447_s21 = smov 96   ;;  %s5448_s22 = smov 80   ;;  %vm205_vm8 = vcmask 130048  }
   0x6   :  { %v81_v5 = vsel %vm77_vm0, %v76_v4, 0.0  ;;  %172 = vmatpush.msra.mxu1 %v5553_v20  ;;  %v5571_v25 = vld [vmem:[%s7381_s2 + $0x60] sm:$0xff]  ;;  %v5577_v28 = vld [vmem:[%s7381_s2 + $0x58] sm:$0xff]  ;;  %v5583_v30 = vld [vmem:[%s7381_s2 + $0x50] sm:$0xff]  ;;  %s5449_s25 = smov 32   ;;  %s5450_s26 = smov 16  }
   0x7   :  { %v5589_v32 = vld [vmem:[%s7381_s2 + $0x48] sm:$0xff]  ;;  %v5595_v34 = vld [vmem:[%s7381_s2 + $0x40] sm:$0xff]  ;;  %v5601_v37 = vld [vmem:[%s7381_s2 + $0x38] sm:$0xff]  ;;  %s5453_s23 = smov 8  }
   0x8   :  { %161 = vmatpush.bf16.msra.mxu0 %v4998_v12  ;;  %173 = vmatpush.msra.mxu1 %v5558_v21  ;;  %v5607_v39 = vld [vmem:[%s7381_s2 + $0x30] sm:$0xff]  ;;  %v5613_v42 = vld [vmem:[%s7381_s2 + $0x28] sm:$0xff]  ;;  %v5619_v44 = vld [vmem:[%s7381_s2 + $0x20] sm:$0xff] }
   0x9   :  { %v5624_v47 = vld [vmem:[%s7387_s8] sm:$0xff]  ;;  %v5630_v48 = vld [vmem:[%s7381_s2 + $0x18] sm:$0xff]  ;;  %v5638_v52 = vld [vmem:[%s7381_s2 + $0x10] sm:$0xff] }
   0xa   :  { %v5183_v7 = vpop.eup %5182  ;;  %174 = vmatpush.msra.mxu1 %v5564_v22  ;;  %v117_v51 = vperm.slane %v5624_v47, 0  ;;  %v5645_v55 = vld [vmem:[%s7381_s2 + $0x8] sm:$0xff]  ;;  %v5653_v59 = vld [vmem:[%s7381_s2] sm:$0xff]  ;;  %v4166_v63 = vld [vmem:[%s7380_s1 + $0x10] sm:$0xff] }
   0xb   :  { %v85_v8 = vmul.f32 64.0, %v5183_v7  ;;  %vm89_vm1 = vweird.f32 %v5183_v7  ;;  %v45_v62 = vld [vmem:[%s7380_s1] sm:$0xff]  ;;  %v46_v6 = vld [vmem:[%s7380_s1 + $0x8] sm:$0xff] }
   0xc   :  { %162 = vmatpush.bf16.msra.mxu0 %v4997_v14  ;;  %175 = vmatpush.msra.mxu1 %v5571_v25 }
   0xd   :  { %82 = vadd.xlane.f32.xlu0 %v81_v5  ;;  %v86_v9 = vsub.f32 1.0, %v85_v8 }
   0xe   :  { %176 = vmatpush.msra.mxu1 %v5577_v28 }
   0xf   :  { %v87_v11 = vmul.f32 %v5183_v7, %v86_v9 }
  0x10   :  { %163 = vmatpush.bf16.msra.mxu0 %v4996_v16  ;;  %177 = vmatpush.msra.mxu1 %v5583_v30 }
  0x11   :  { %v88_v13 = vadd.f32 %v5183_v7, %v87_v11 }
  0x12   :  { %178 = vmatpush.msra.mxu1 %v5589_v32 }
  0x13   :  { %v5544_v15 = vsel %vm89_vm1, %v5183_v7, %v88_v13  ;;  %v4167_v7 = vld [vmem:[%s7380_s1 + $0x18] sm:$0xff] }
  0x14   :  { %179 = vmatpush.msra.mxu1 %v5595_v34 }
  0x16   :  { %180 = vmatpush.msra.mxu1 %v5601_v37 }
  0x18   :  { %181 = vmatpush.msra.mxu1 %v5607_v39 }
  0x1a   :  { %182 = vmatpush.msra.mxu1 %v5613_v42 }
  0x1c   :  { %183 = vmatpush.msra.mxu1 %v5619_v44 }
  0x1e   :  { %184 = vmatpush.msra.mxu1 %v5630_v48 }
  0x20   :  { %185 = vmatpush.msra.mxu1 %v5638_v52 }
  0x22   :  { %186 = vmatpush.msra.mxu1 %v5645_v55 }
  0x24   :  { %187 = vmatpush.msra.mxu1 %v5653_v59 }
  0x78   :  { %v80_v17 = vpop.xlane.xlu0 %79 }
  0x79   :  { %v91_v18 = vmul.f32 %v5544_v15, %v80_v17 }
  0x7b   :  { %v93_v19 = vadd.f32 1e-06, %v91_v18 }
  0x7d   :  { %5184 = vrsqrt.f32 %v93_v19  ;;  %vm101_vm3 = vweird.f32 %v93_v19 }
  0x80   :  { %v83_v23 = vpop.xlane.xlu0 %82 }
  0x81   :  { %v92_v24 = vmul.f32 %v5544_v15, %v83_v23 }
  0x83   :  { %v5185_v26 = vpop.eup %5184  ;;  %v94_v27 = vadd.f32 1e-06, %v92_v24 }
  0x84   :  { %v96_v29 = vmul.f32 %v5185_v26, %v93_v19  ;;  %vm102_vm2 = vweird.f32 %v5185_v26 }
  0x85   :  { %5186 = vrsqrt.f32 %v94_v27  ;;  %vm103_vm4 = vmor %vm101_vm3, %vm102_vm2  ;;  %vm111_vm6 = vweird.f32 %v94_v27 }
  0x86   :  { %v97_v31 = vmul.f32 %v5185_v26, %v96_v29 }
  0x88   :  { %v98_v33 = vmul.f32 0.5, %v97_v31 }
  0x8a   :  { %v99_v35 = vsub.f32 1.5, %v98_v33 }
  0x8b   :  { %v5187_v36 = vpop.eup %5186 }
  0x8c   :  { %v106_v38 = vmul.f32 %v5187_v36, %v94_v27  ;;  %v100_v40 = vmul.f32 %v5185_v26, %v99_v35  ;;  %vm112_vm5 = vweird.f32 %v5187_v36  ;;  %v66_v27 = vld [vmem:[%s7382_s3] sm:$0xff]  ;;  %v68_v35 = vld [vmem:[%s7382_s3 + $0x10] sm:$0xff] }
  0x8d   :  { %vm113_vm7 = vmor %vm111_vm6, %vm112_vm5 }
  0x8e   :  { %v107_v41 = vmul.f32 %v5187_v36, %v106_v38  ;;  %v104_v45 = vsel %vm103_vm4, %v5185_v26, %v100_v40  ;;  %v67_v40 = vld [vmem:[%s7382_s3 + $0x8] sm:$0xff] }
  0x8f   :  { %v115_v50 = vmul.f32 %v104_v45, %v5522_v0 }
  0x90   :  { %v108_v43 = vmul.f32 0.5, %v107_v41 }
  0x91   :  { %v118_v56 = vmul.f32 %v117_v51, %v115_v50 }
  0x92   :  { %v109_v46 = vsub.f32 1.5, %v108_v43 }
  0x94   :  { %v110_v49 = vmul.f32 %v5187_v36, %v109_v46 }
  0x96   :  { %v114_v53 = vsel %vm113_vm7, %v5187_v36, %v110_v49  ;;  %v69_v36 = vld [vmem:[%s7382_s3 + $0x18] sm:$0xff] }
  0x97   :  { %v116_v54 = vmul.f32 %v114_v53, %v5529_v2 }
  0x99   :  { %v119_v57 = vmul.f32 %v117_v51, %v116_v54  ;;  %v70_v54 = vld [vmem:[%s7382_s3 + $0x20] sm:$0xff] }
  0x9b   :  { %v128_v58 = vpack.c.bf16 %v119_v57, %v118_v56 }
  0x9d   :  { %4184 = vmatmul.msk.bf16.vlgmr.msra.gmra.mxu0 %vm77_vm0, %v128_v58 }
 0x11a   :  { %v165_v60 = vpop.f32.mrf.mxu0 }
 0x11b   :  { %188 = vmatmul.f32.vlgmr.msra.gmra.mxu1 %v165_v60  ;;  %v170_v3 = vmul.f32 %v165_v60, %v45_v62  ;;  %v72_v60 = vld [vmem:[%s7382_s3 + $0x30] sm:$0xff] }
 0x122   :  { %v167_v61 = vpop.f32.mrf.mxu0 }
 0x123   :  { %191 = vmatmul.f32.gmra.mxu1 %v167_v61  ;;  %v171_v9 = vmul.f32 %v167_v61, %v46_v6 }
 0x198   :  { %v189_v1 = vpop.f32.mrf.mxu1 }
 0x199   :  { %v195_v4 = vmul.f32 %v4166_v63, %v189_v1  ;;  %v71_v63 = vld [vmem:[%s7382_s3 + $0x28] sm:$0xff] }
 0x19b   :  { %v5662_v5 = vadd.f32 %v195_v4, %v170_v3 }
 0x19d   :  { %237 = vrot.lane.b32.xlu2 %v5662_v5, %s5444_s14 }
 0x1a0   :  { %v192_v8 = vpop.f32.mrf.mxu1 }
 0x1a1   :  { %v196_v10 = vmul.f32 %v4167_v7, %v192_v8  ;;  %v73_v7 = vld [vmem:[%s7382_s3 + $0x38] sm:$0xff] }
 0x1a3   :  { %v5672_v11 = vadd.f32 %v196_v10, %v171_v9 }
 0x1a5   :  { %239 = vrot.lane.b32.xlu0 %v5672_v11, %s5444_s14  ;;  %274 = vrot.lane.b32.xlu2 %v5672_v11, %s5445_s19 }
 0x1a6   :  { %203 = vrot.lane.b32.xlu1 %v5672_v11, %s5446_s20 }
 0x1ad   :  { %268 = vrot.lane.b32.xlu2 %v5662_v5, %s5447_s21 }
 0x1ae   :  { %201 = vrot.lane.b32.xlu1 %v5662_v5, %s5446_s20 }
 0x1b5   :  { %270 = vrot.lane.b32.xlu2 %v5672_v11, %s5447_s21 }
 0x1b6   :  { %272 = vrot.lane.b32.xlu1 %v5662_v5, %s5445_s19 }
 0x1be   :  { %307 = vrot.lane.b32.xlu1 %v5662_v5, %s5448_s22 }
 0x1c6   :  { %309 = vrot.lane.b32.xlu1 %v5672_v11, %s5448_s22 }
 0x1f7   :  { %v238_v12 = vpop.permute.xlu2 %237 }
 0x1ff   :  { %v275_v14 = vpop.permute.xlu2 %274 }
 0x207   :  { %v269_v19 = vpop.permute.xlu2 %268 }
 0x20f   :  { %v271_v24 = vpop.permute.xlu2 %270 }
 0x217   :  { %v240_v17 = vpop.permute.xlu0 %239 }
 0x218   :  { %v204_v13 = vpop.permute.xlu1 %203 }
 0x219   :  { %4185 = vmatpush.xpose.msk.msrb.mxu1 %vm205_vm8, %v204_v13  ;;  %4189 = vmatpush.xpose.msk.msra.mxu2 %vm205_vm8, %v204_v13 }
 0x21a   :  { %5128 = vmatpush.xpose.msk.msra.mxu3 %vm205_vm8, %v204_v13 }
 0x220   :  { %v202_v16 = vpop.permute.xlu1 %201 }
 0x221   :  { %4186 = vmatpush.xpose.msk.msrb.mxu1 %vm205_vm8, %v202_v16  ;;  %4190 = vmatpush.xpose.msk.msra.mxu2 %vm205_vm8, %v202_v16 }
 0x222   :  { %5129 = vmatpush.xpose.msk.msra.mxu3 %vm205_vm8, %v202_v16 }
 0x224   :  { %4187 = vmatmul.msk.f32.vlgmr.msrb.gmra.mxu1 %vm205_vm8, %v5662_v5  ;;  %4191 = vmatmul.msk.f32.vlgmr.msra.gmra.mxu2 %vm205_vm8, %v238_v12 }
 0x225   :  { %4193 = vmatpush.xpose.msk.msrb.mxu2 %vm205_vm8, %v275_v14  ;;  %4192 = vmatmul.msk.f32.vlgmr.msra.gmra.mxu3 %vm205_vm8, %v240_v17 }
 0x226   :  { %4197 = vmatpush.xpose.msk.msrb.mxu3 %vm205_vm8, %v275_v14 }
 0x228   :  { %v273_v18 = vpop.permute.xlu1 %272 }
 0x229   :  { %4194 = vmatpush.xpose.msk.msrb.mxu2 %vm205_vm8, %v273_v18 }
 0x22a   :  { %4198 = vmatpush.xpose.msk.msrb.mxu3 %vm205_vm8, %v273_v18 }
 0x22c   :  { %4188 = vmatmul.msk.f32.gmra.mxu1 %vm205_vm8, %v5672_v11  ;;  %4195 = vmatmul.msk.f32.vlgmr.msrb.gmra.mxu2 %vm205_vm8, %v269_v19 }
 0x230   :  { %v308_v23 = vpop.permute.xlu1 %307 }
 0x231   :  { %4199 = vmatmul.msk.f32.vlgmr.msrb.gmra.mxu3 %vm205_vm8, %v308_v23 }
 0x234   :  { %4196 = vmatmul.msk.f32.gmra.mxu2 %vm205_vm8, %v271_v24 }
 0x238   :  { %v310_v26 = vpop.permute.xlu1 %309 }
 0x239   :  { %4200 = vmatmul.msk.f32.gmra.mxu3 %vm205_vm8, %v310_v26 }
 0x2a1   :  { %v231_v29 = vpop.f32.mrf.mxu1 }
 0x2a2   :  { %v338_v31 = vadd.f32 %v231_v29, %v66_v27 }
 0x2a4   :  { %v346_v33 = vsel %vm205_vm8, %v338_v31, -inf }
 0x2a5   :  { %347 = vmax.xlane.f32.xlu2 %v346_v33 }
 0x2a7   :  { %v262_v38 = vpop.f32.mrf.mxu2 }
 0x2a8   :  { %v340_v41 = vadd.f32 %v262_v38, %v68_v35  ;;  %v265_v43 = vpop.f32.mrf.mxu3 }
 0x2a9   :  { %v341_v45 = vadd.f32 %v265_v43, %v69_v36  ;;  %v234_v46 = vpop.f32.mrf.mxu1 }
 0x2aa   :  { %v339_v49 = vadd.f32 %v234_v46, %v67_v40  ;;  %v352_v50 = vsel %vm205_vm8, %v340_v41, -inf }
 0x2ab   :  { %353 = vmax.xlane.f32.xlu0 %v352_v50  ;;  %v355_v51 = vsel %vm205_vm8, %v341_v45, -inf }
 0x2ac   :  { %v349_v53 = vsel %vm205_vm8, %v339_v49, -inf }
 0x2ad   :  { %356 = vmax.xlane.f32.xlu2 %v355_v51  ;;  %350 = vmax.xlane.f32.xlu1 %v349_v53 }
 0x2af   :  { %v301_v56 = vpop.f32.mrf.mxu2 }
 0x2b0   :  { %v342_v57 = vadd.f32 %v301_v56, %v70_v54 }
 0x2b2   :  { %v358_v58 = vsel %vm205_vm8, %v342_v57, -inf }
 0x2b3   :  { %359 = vmax.xlane.f32.xlu0 %v358_v58 }
 0x2b4   :  { %v332_v61 = vpop.f32.mrf.mxu3 }
 0x2b5   :  { %v344_v62 = vadd.f32 %v332_v61, %v72_v60 }
 0x2b7   :  { %v304_v1 = vpop.f32.mrf.mxu2  ;;  %v364_v3 = vsel %vm205_vm8, %v344_v62, -inf }
 0x2b8   :  { %v343_v4 = vadd.f32 %v304_v1, %v71_v63  ;;  %365 = vmax.xlane.f32.xlu2 %v364_v3 }
 0x2ba   :  { %v361_v6 = vsel %vm205_vm8, %v343_v4, -inf }
 0x2bb   :  { %362 = vmax.xlane.f32.xlu1 %v361_v6 }
 0x2bc   :  { %v335_v8 = vpop.f32.mrf.mxu3 }
 0x2bd   :  { %v345_v9 = vadd.f32 %v335_v8, %v73_v7 }
 0x2bf   :  { %v367_v10 = vsel %vm205_vm8, %v345_v9, -inf }
 0x2c0   :  { %368 = vmax.xlane.f32.xlu0 %v367_v10 }
 0x318   :  { %v348_v12 = vpop.xlane.xlu2 %347 }
 0x319   :  { %v370_v13 = vsub.f32 %v338_v31, %v348_v12 }
 0x31b   :  { %v378_v14 = vmul.f32 1.442695, %v370_v13 }
 0x31d   :  { %5188 = vpow2.f32 %v378_v14 }
 0x31e   :  { %v354_v16 = vpop.xlane.xlu0 %353 }
 0x31f   :  { %v372_v17 = vsub.f32 %v340_v41, %v354_v16 }
 0x320   :  { %v357_v18 = vpop.xlane.xlu2 %356  ;;  %v351_v19 = vpop.xlane.xlu1 %350 }
 0x321   :  { %v382_v23 = vmul.f32 1.442695, %v372_v17  ;;  %v373_v24 = vsub.f32 %v341_v45, %v357_v18  ;;  %v371_v26 = vsub.f32 %v339_v49, %v351_v19 }
 0x323   :  { %v5744_v27 = vpop.eup %5188  ;;  %5190 = vpow2.f32 %v382_v23  ;;  %v384_v29 = vmul.f32 1.442695, %v373_v24  ;;  %v380_v33 = vmul.f32 1.442695, %v371_v26 }
 0x324   :  { %v394_v35 = vsel %vm205_vm8, %v5744_v27, 0.0 }
 0x325   :  { %5192 = vpow2.f32 %v384_v29  ;;  %395 = vadd.xlane.f32.xlu2 %v394_v35 }
 0x326   :  { %5194 = vpow2.f32 %v380_v33  ;;  %v360_v31 = vpop.xlane.xlu0 %359 }
 0x327   :  { %v374_v36 = vsub.f32 %v342_v57, %v360_v31 }
 0x329   :  { %v5748_v38 = vpop.eup %5190  ;;  %v386_v40 = vmul.f32 1.442695, %v374_v36 }
 0x32a   :  { %v400_v41 = vsel %vm205_vm8, %v5748_v38, 0.0 }
 0x32b   :  { %v5752_v43 = vpop.eup %5192  ;;  %5196 = vpow2.f32 %v386_v40  ;;  %401 = vadd.xlane.f32.xlu1 %v400_v41  ;;  %v366_v45 = vpop.xlane.xlu2 %365 }
 0x32c   :  { %v5754_v46 = vpop.eup %5194  ;;  %v376_v49 = vsub.f32 %v344_v62, %v366_v45  ;;  %v403_v50 = vsel %vm205_vm8, %v5752_v43, 0.0 }
 0x32d   :  { %404 = vadd.xlane.f32.xlu2 %v403_v50  ;;  %v397_v51 = vsel %vm205_vm8, %v5754_v46, 0.0 }
 0x32e   :  { %v390_v53 = vmul.f32 1.442695, %v376_v49  ;;  %398 = vadd.xlane.f32.xlu0 %v397_v51  ;;  %v363_v54 = vpop.xlane.xlu1 %362 }
 0x32f   :  { %v375_v56 = vsub.f32 %v343_v4, %v363_v54 }
 0x330   :  { %5198 = vpow2.f32 %v390_v53 }
 0x331   :  { %v5760_v57 = vpop.eup %5196  ;;  %v388_v58 = vmul.f32 1.442695, %v375_v56 }
 0x332   :  { %v406_v60 = vsel %vm205_vm8, %v5760_v57, 0.0 }
 0x333   :  { %5200 = vpow2.f32 %v388_v58  ;;  %407 = vadd.xlane.f32.xlu1 %v406_v60  ;;  %v369_v61 = vpop.xlane.xlu0 %368 }
 0x334   :  { %v377_v62 = vsub.f32 %v345_v9, %v369_v61  ;;  %v5141_v9 = vpack.i.bf16 %v5662_v5, %v5672_v11 }
 0x336   :  { %v5764_v63 = vpop.eup %5198  ;;  %v392_v1 = vmul.f32 1.442695, %v377_v62 }
 0x337   :  { %v412_v3 = vsel %vm205_vm8, %v5764_v63, 0.0 }
 0x338   :  { %5202 = vpow2.f32 %v392_v1  ;;  %413 = vadd.xlane.f32.xlu2 %v412_v3 }
 0x339   :  { %v5768_v4 = vpop.eup %5200 }
 0x33a   :  { %v409_v6 = vsel %vm205_vm8, %v5768_v4, 0.0 }
 0x33b   :  { %410 = vadd.xlane.f32.xlu1 %v409_v6 }
 0x33e   :  { %v5772_v7 = vpop.eup %5202 }
 0x33f   :  { %v415_v8 = vsel %vm205_vm8, %v5772_v7, 0.0 }
 0x340   :  { %416 = vadd.xlane.f32.xlu2 %v415_v8 }
 0x342   :  { %5142 = vrot.lane.b32.xlu0 %v5141_v9, %s5449_s25 }
 0x354   :  { %5147 = vrot.lane.b32.xlu1 %v5141_v9, %s5450_s26 }
 0x398   :  { %v396_v10 = vpop.xlane.xlu2 %395 }
 0x399   :  { %5204 = vrcp.f32 %v396_v10  ;;  %v427_v40 = vand.u32 2147483647, %v396_v10  ;;  %v429_v41 = vand.u32 2147483648, %v396_v10  ;;  %vm423_vm11 = vweird.f32 %v396_v10 }
 0x39b   :  { %vm5808_vm14 = vcmp.eq.f32.partialorder %v427_v40, 8.507059e+37  ;;  %v430_v6 = vor.u32 1.1754944e-38, %v429_v41 }
 0x39e   :  { %v402_v12 = vpop.xlane.xlu1 %401 }
 0x39f   :  { %v5205_v13 = vpop.eup %5204  ;;  %5206 = vrcp.f32 %v402_v12  ;;  %v455_v53 = vand.u32 2147483647, %v402_v12  ;;  %v457_v54 = vand.u32 2147483648, %v402_v12  ;;  %vm451_vm13 = vweird.f32 %v402_v12 }
 0x3a0   :  { %v5780_v14 = vpop.xlane.xlu2 %404  ;;  %v419_v17 = vmul.f32 %v5205_v13, %v396_v10  ;;  %vm424_vm9 = vweird.f32 %v5205_v13 }
 0x3a1   :  { %5208 = vrcp.f32 %v5780_v14  ;;  %v5783_v16 = vpop.xlane.xlu0 %398  ;;  %vm5802_vm12 = vmor %vm423_vm11, %vm424_vm9  ;;  %vm456_vm1 = vcmp.eq.f32.partialorder %v455_v53, 8.507059e+37  ;;  %vm465_vm2 = vweird.f32 %v5780_v14 }
 0x3a2   :  { %5210 = vrcp.f32 %v5783_v16  ;;  %v420_v11 = vsub.f32 1.0, %v419_v17  ;;  %vm437_vm5 = vweird.f32 %v5783_v16 }
 0x3a4   :  { %v421_v33 = vmul.f32 %v5205_v13, %v420_v11 }
 0x3a5   :  { %v5207_v5 = vpop.eup %5206 }
 0x3a6   :  { %v447_v18 = vmul.f32 %v5207_v5, %v402_v12  ;;  %v5786_v19 = vpop.xlane.xlu1 %407  ;;  %v422_v49 = vadd.f32 %v5205_v13, %v421_v33  ;;  %vm452_vm10 = vweird.f32 %v5207_v5  ;;  %v458_v12 = vor.u32 1.1754944e-38, %v457_v54 }
 0x3a7   :  { %v5788_v23 = vpop.eup %5208  ;;  %5212 = vrcp.f32 %v5786_v19  ;;  %vm5812_vm15 = vmor %vm451_vm13, %vm452_vm10  ;;  %vm479_vm13 = vweird.f32 %v5786_v19 }
 0x3a8   :  { %v5790_v24 = vpop.eup %5210  ;;  %v448_v26 = vsub.f32 1.0, %v447_v18  ;;  %v461_v29 = vmul.f32 %v5788_v23, %v5780_v14  ;;  %v426_v10 = vsel %vm5802_vm12, %v5205_v13, %v422_v49  ;;  %vm466_vm3 = vweird.f32 %v5788_v23 }
 0x3a9   :  { %v433_v31 = vmul.f32 %v5790_v24, %v5783_v16  ;;  %vm438_vm4 = vweird.f32 %v5790_v24  ;;  %v441_v49 = vand.u32 2147483647, %v5783_v16  ;;  %vm5850_vm6 = vmor %vm465_vm2, %vm466_vm3 }
 0x3aa   :  { %v449_v35 = vmul.f32 %v5207_v5, %v448_v26  ;;  %v462_v45 = vsub.f32 1.0, %v461_v29  ;;  %v431_v29 = vsel %vm5808_vm14, %v430_v6, %v426_v10  ;;  %vm5858_vm7 = vmor %vm437_vm5, %vm438_vm4 }
 0x3ab   :  { %v5797_v36 = vpop.xlane.xlu2 %413  ;;  %v434_v51 = vsub.f32 1.0, %v433_v31  ;;  %v443_v31 = vand.u32 2147483648, %v5783_v16  ;;  %v530_v53 = vmul.f32 %v5744_v27, %v431_v29  ;;  %vm442_vm9 = vcmp.eq.f32.partialorder %v441_v49, 8.507059e+37 }
 0x3ac   :  { %5214 = vrcp.f32 %v5797_v36  ;;  %v450_v50 = vadd.f32 %v5207_v5, %v449_v35  ;;  %v463_v1 = vmul.f32 %v5788_v23, %v462_v45  ;;  %v471_v35 = vand.u32 2147483648, %v5780_v14 }
 0x3ad   :  { %v5800_v56 = vpop.eup %5212  ;;  %v435_v9 = vmul.f32 %v5790_v24, %v434_v51  ;;  %v485_v29 = vand.u32 2147483648, %v5786_v19 }
 0x3ae   :  { %v5806_v60 = vpop.xlane.xlu1 %410  ;;  %v454_v8 = vsel %vm5812_vm15, %v5207_v5, %v450_v50  ;;  %v475_v17 = vmul.f32 %v5800_v56, %v5786_v19  ;;  %v464_v33 = vadd.f32 %v5788_v23, %v463_v1  ;;  %v469_v50 = vand.u32 2147483647, %v5780_v14 }
 0x3af   :  { %5216 = vrcp.f32 %v5806_v60  ;;  %v459_v13 = vsel %vm456_vm1, %v458_v12, %v454_v8  ;;  %v436_v40 = vadd.f32 %v5790_v24, %v435_v9  ;;  %v472_v14 = vor.u32 1.1754944e-38, %v471_v35 }
 0x3b0   :  { %v476_v41 = vsub.f32 1.0, %v475_v17  ;;  %v532_v54 = vmul.f32 %v5748_v38, %v459_v13  ;;  %v468_v27 = vsel %vm5850_vm6, %v5788_v23, %v464_v33  ;;  %v444_v1 = vor.u32 1.1754944e-38, %v443_v31 }
 0x3b1   :  { %v440_v62 = vsel %vm5858_vm7, %v5790_v24, %v436_v40  ;;  %vm470_vm10 = vcmp.eq.f32.partialorder %v469_v50, 8.507059e+37  ;;  %vm480_vm11 = vweird.f32 %v5800_v56  ;;  %v513_v33 = vand.u32 2147483648, %v5797_v36 }
 0x3b2   :  { %v5817_v3 = vpop.eup %5214  ;;  %v477_v6 = vmul.f32 %v5800_v56, %v476_v41  ;;  %v473_v10 = vsel %vm470_vm10, %v472_v14, %v468_v27  ;;  %v445_v12 = vsel %vm442_vm9, %v444_v1, %v440_v62  ;;  %vm5887_vm14 = vmor %vm479_vm13, %vm480_vm11  ;;  %v483_v31 = vand.u32 2147483647, %v5786_v19 }
 0x3b3   :  { %v5827_v11 = vpop.xlane.xlu2 %416  ;;  %v503_v18 = vmul.f32 %v5817_v3, %v5797_v36  ;;  %vm508_vm12 = vweird.f32 %v5817_v3  ;;  %v533_v24 = vmul.f32 %v5752_v43, %v473_v10  ;;  %vm507_vm15 = vweird.f32 %v5797_v36  ;;  %v5003_v10 = vld [vmem:[%s7384_s5 + $0x18] sm:$0xff] }
 0x3b4   :  { %5218 = vrcp.f32 %v5827_v11  ;;  %v5143_v5 = vpop.permute.xlu0 %5142  ;;  %v478_v17 = vadd.f32 %v5800_v56, %v477_v6  ;;  %v511_v43 = vand.u32 2147483647, %v5797_v36  ;;  %vm509_vm1 = vmor %vm507_vm15, %vm508_vm12  ;;  %v514_v49 = vor.u32 1.1754944e-38, %v513_v33 }
 0x3b5   :  { %v5144_v26 = vunpack.i.l.bf16 %v5143_v5  ;;  %v5145_v45 = vunpack.i.h.bf16 %v5143_v5  ;;  %v504_v51 = vsub.f32 1.0, %v503_v18  ;;  %v5854_v61 = vpop.eup %5216  ;;  %vm484_vm2 = vcmp.eq.f32.partialorder %v483_v31, 8.507059e+37 }
 0x3b6   :  { %v489_v23 = vmul.f32 %v5854_v61, %v5806_v60  ;;  %vm512_vm3 = vcmp.eq.f32.partialorder %v511_v43, 8.507059e+37  ;;  %vm494_vm4 = vweird.f32 %v5854_v61  ;;  %vm493_vm5 = vweird.f32 %v5806_v60 }
 0x3b7   :  { %572 = vmatpush.msrb.mxu0 %v5144_v26  ;;  %628 = vmatpush.msra.mxu3 %v5144_v26  ;;  %v505_v8 = vmul.f32 %v5817_v3, %v504_v51  ;;  %v531_v26 = vmul.f32 %v5754_v46, %v445_v12  ;;  %v482_v46 = vsel %vm5887_vm14, %v5800_v56, %v478_v17  ;;  %v527_v58 = vand.u32 2147483648, %v5827_v11  ;;  %vm495_vm9 = vmor %vm493_vm5, %vm494_vm4 }
 0x3b8   :  { %v490_v5 = vsub.f32 1.0, %v489_v23  ;;  %v497_v27 = vand.u32 2147483647, %v5806_v60  ;;  %vm521_vm7 = vweird.f32 %v5827_v11  ;;  %v525_v1 = vand.u32 2147483647, %v5827_v11 }
 0x3b9   :  { %573 = vmatpush.msrb.mxu0 %v5145_v45  ;;  %629 = vmatpush.msra.mxu3 %v5145_v45  ;;  %v506_v18 = vadd.f32 %v5817_v3, %v505_v8  ;;  %v486_v45 = vor.u32 1.1754944e-38, %v485_v29  ;;  %v528_v23 = vor.u32 1.1754944e-38, %v527_v58 }
 0x3ba   :  { %v5865_v38 = vpop.eup %5218  ;;  %4201 = vmatmul.msk.f32.vlgmr.msrb.gmra.mxu0 %vm205_vm8, %v530_v53  ;;  %4208 = vmatmul.msk.f32.vlgmr.msra.gmra.mxu3 %vm205_vm8, %v532_v54  ;;  %v491_v41 = vmul.f32 %v5854_v61, %v490_v5  ;;  %v499_v54 = vand.u32 2147483648, %v5806_v60  ;;  %vm498_vm11 = vcmp.eq.f32.partialorder %v497_v27, 8.507059e+37  ;;  %vm526_vm12 = vcmp.eq.f32.partialorder %v525_v1, 8.507059e+37 }
 0x3bb   :  { %v517_v9 = vmul.f32 %v5865_v38, %v5827_v11  ;;  %v510_v40 = vsel %vm509_vm1, %v5817_v3, %v506_v18  ;;  %v487_v50 = vsel %vm484_vm2, %v486_v45, %v482_v46  ;;  %vm522_vm6 = vweird.f32 %v5865_v38 }
 0x3bc   :  { %v515_v51 = vsel %vm512_vm3, %v514_v49, %v510_v40  ;;  %v492_v56 = vadd.f32 %v5854_v61, %v491_v41  ;;  %v534_v14 = vmul.f32 %v5760_v57, %v487_v50  ;;  %vm523_vm10 = vmor %vm521_vm7, %vm522_vm6  ;;  %v500_v8 = vor.u32 1.1754944e-38, %v499_v54 }
 0x3bd   :  { %v518_v13 = vsub.f32 1.0, %v517_v9  ;;  %v536_v62 = vmul.f32 %v5764_v63, %v515_v51  ;;  %v605_v40 = vperm.slane %v5624_v47, 2 }
 0x3be   :  { %v496_v6 = vsel %vm495_vm9, %v5854_v61, %v492_v56  ;;  %v5000_v61 = vld [vmem:[%s7384_s5] sm:$0xff] }
 0x3bf   :  { %v519_v19 = vmul.f32 %v5865_v38, %v518_v13  ;;  %v501_v57 = vsel %vm498_vm11, %v500_v8, %v496_v6  ;;  %598 = vmatpush.bf16.msra.mxu2 %v5000_v61  ;;  %v4255_v8 = vld [vmem:[%s7385_s6 + $0x30] sm:$0xf]  ;;  %v5009_v61 = vld [vmem:[%s7385_s6 + $0x24] sm:$0xf0] }
 0x3c0   :  { %v535_v9 = vmul.f32 %v5768_v4, %v501_v57  ;;  %v5002_v4 = vld [vmem:[%s7384_s5 + $0x10] sm:$0xff] }
 0x3c1   :  { %v520_v3 = vadd.f32 %v5865_v38, %v519_v19  ;;  %v5010_v57 = vld [vmem:[%s7385_s6 + $0x34] sm:$0xf] }
 0x3c2   :  { %4202 = vmatmul.msk.f32.gmra.mxu0 %vm205_vm8, %v531_v26  ;;  %4209 = vmatmul.msk.f32.gmra.mxu3 %vm205_vm8, %v533_v24 }
 0x3c3   :  { %v524_v60 = vsel %vm523_vm10, %v5865_v38, %v520_v3  ;;  %v5001_v38 = vld [vmem:[%s7384_s5 + $0x8] sm:$0xff]  ;;  %715 = vmatpush.bf16.msrb.mxu2 %v5002_v4 }
 0x3c4   :  { %v529_v63 = vsel %vm526_vm12, %v528_v23, %v524_v60  ;;  %654 = vmatpush.bf16.msra.mxu0 %v5001_v38  ;;  %v5011_v23 = vld [vmem:[%s7385_s6 + $0x34] sm:$0xf0]  ;;  %v5008_v38 = vld [vmem:[%s7385_s6 + $0x24] sm:$0xf] }
 0x3c5   :  { %v537_v11 = vmul.f32 %v5772_v7, %v529_v63  ;;  %v4257_v63 = vld [vmem:[%s7385_s6 + $0x38] sm:$0xf0] }
 0x3c6   :  { %v5148_v36 = vpop.permute.xlu1 %5147 }
 0x3c7   :  { %v5149_v53 = vunpack.i.l.bf16 %v5148_v36  ;;  %v5150_v16 = vunpack.i.h.bf16 %v5148_v36 }
 0x3c8   :  { %770 = vmatpush.bf16.msrb.mxu0 %v5003_v10 }
 0x3c9   :  { %689 = vmatpush.msra.mxu1 %v5149_v53  ;;  %744 = vmatpush.msrb.mxu3 %v5149_v53 }
 0x3cb   :  { %690 = vmatpush.msra.mxu1 %v5150_v16  ;;  %745 = vmatpush.msrb.mxu3 %v5150_v16 }
 0x3cc   :  { %4215 = vmatmul.msk.f32.vlgmr.msra.gmra.mxu1 %vm205_vm8, %v534_v14  ;;  %4222 = vmatmul.msk.f32.vlgmr.msrb.gmra.mxu3 %vm205_vm8, %v536_v62 }
 0x3d4   :  { %4216 = vmatmul.msk.f32.gmra.mxu1 %vm205_vm8, %v535_v9  ;;  %4223 = vmatmul.msk.f32.gmra.mxu3 %vm205_vm8, %v537_v11  ;;  %v4260_v9 = vor.u32 %v5010_v57, %v4257_v63  ;;  %v4247_v11 = vld [vmem:[%s7385_s6 + $0x20] sm:$0xf] }
 0x3d5   :  { %v4248_v4 = vor.u32 %v5009_v61, %v4247_v11  ;;  %v5020_v63 = vld [vmem:[%s7386_s7 + $0x40] sm:$0xff] }
 0x437   :  { %v575_v7 = vpop.f32.mrf.mxu0 }
 0x43d   :  { %v631_v12 = vpop.f32.mrf.mxu3 }
 0x43f   :  { %v578_v17 = vpop.f32.mrf.mxu0 }
 0x440   :  { %v581_v24 = vpack.c.bf16 %v578_v17, %v575_v7  ;;  %v4249_v7 = vld [vmem:[%s7385_s6 + $0x28] sm:$0xf0] }
 0x441   :  { %v4252_v10 = vor.u32 %v5008_v38, %v4249_v7 }
 0x442   :  { %4207 = vmatmul.msk.bf16.vlgmr.msra.gmra.mxu2 %vm205_vm8, %v581_v24  ;;  %v4239_v24 = vld [vmem:[%s7385_s6 + $0x10] sm:$0xf] }
 0x443   :  { %894 = vmatpush.bf16.msra.mxu2 %v4260_v9  ;;  %v827_v9 = vld [vmem:[%s7388_s9] sm:$0x3] }
 0x444   :  { %v829_v61 = vperm.slane %v827_v9, 0 }
 0x445   :  { %v634_v18 = vpop.f32.mrf.mxu3 }
 0x446   :  { %v637_v5 = vpack.c.bf16 %v634_v18, %v631_v12  ;;  %v5007_v18 = vld [vmem:[%s7385_s6 + $0x14] sm:$0xf0] }
 0x447   :  { %895 = vmatpush.bf16.msra.mxu2 %v4252_v10  ;;  %v830_v10 = vperm.slane %v827_v9, 1 }
 0x448   :  { %4214 = vmatmul.msk.bf16.vlgmr.msra.gmra.mxu0 %vm205_vm8, %v637_v5  ;;  %v5006_v5 = vld [vmem:[%s7385_s6 + $0x14] sm:$0xf] }
 0x449   :  { %v692_v13 = vpop.f32.mrf.mxu1 }
 0x44f   :  { %v747_v26 = vpop.f32.mrf.mxu3 }
 0x451   :  { %v695_v29 = vpop.f32.mrf.mxu1 }
 0x452   :  { %v698_v33 = vpack.c.bf16 %v695_v29, %v692_v13  ;;  %v4240_v13 = vor.u32 %v5007_v18, %v4239_v24  ;;  %v4231_v29 = vld [vmem:[%s7385_s6] sm:$0xf] }
 0x454   :  { %4221 = vmatmul.msk.bf16.vlgmr.msrb.gmra.mxu2 %vm205_vm8, %v698_v33  ;;  %v5005_v33 = vld [vmem:[%s7385_s6 + $0x4] sm:$0xf0] }
 0x457   :  { %v750_v35 = vpop.f32.mrf.mxu3 }
 0x458   :  { %v753_v31 = vpack.c.bf16 %v750_v35, %v747_v26  ;;  %v4241_v26 = vld [vmem:[%s7385_s6 + $0x18] sm:$0xf0] }
 0x45a   :  { %4228 = vmatmul.msk.bf16.vlgmr.msrb.gmra.mxu0 %vm205_vm8, %v753_v31  ;;  %v4244_v31 = vor.u32 %v5006_v5, %v4241_v26 }
 0x45c   :  { %896 = vmatpush.bf16.msra.mxu2 %v4244_v31 }
 0x4c5   :  { %v600_v43 = vpop.f32.mrf.mxu2  ;;  %v656_v46 = vpop.f32.mrf.mxu0 }
 0x4c6   :  { %v606_v45 = vadd.f32 %v605_v40, %v600_v43  ;;  %v5004_v43 = vld [vmem:[%s7385_s6 + $0x4] sm:$0xf] }
 0x4c8   :  { %v661_v49 = vadd.f32 %v656_v46, %v606_v45  ;;  %v4233_v46 = vld [vmem:[%s7385_s6 + $0x8] sm:$0xf0]  ;;  %v5027_v45 = vld [vmem:[%s7386_s7 + $0x78] sm:$0xff] }
 0x4c9   :  { %1052 = vmatpush.bf16.msra.mxu0 %v5027_v45 }
 0x4cd   :  { %v602_v41 = vpop.f32.mrf.mxu2  ;;  %v658_v19 = vpop.f32.mrf.mxu0 }
 0x4ce   :  { %v607_v53 = vadd.f32 %v605_v40, %v602_v41  ;;  %v4232_v40 = vor.u32 %v5005_v33, %v4231_v29  ;;  %v4236_v41 = vor.u32 %v5004_v43, %v4233_v46 }
 0x4d0   :  { %v662_v54 = vadd.f32 %v658_v19, %v607_v53  ;;  %v5019_v19 = vld [vmem:[%s7386_s7 + $0x38] sm:$0xff]  ;;  %897 = vmatpush.bf16.msra.mxu2 %v4236_v41 }
 0x4d1   :  { %1038 = vmatpush.bf16.msra.mxu3 %v5019_v19 }
 0x4d4   :  { %1163 = vmatpush.msrb.mxu2 %v5553_v20  ;;  %v5016_v20 = vld [vmem:[%s7386_s7 + $0x20] sm:$0xff] }
 0x4d6   :  { %1164 = vmatpush.msrb.mxu2 %v5558_v21 }
 0x4d7   :  { %v717_v36 = vpop.f32.mrf.mxu2  ;;  %v772_v50 = vpop.f32.mrf.mxu0 }
 0x4d8   :  { %v722_v51 = vadd.f32 %v717_v36, %v661_v49  ;;  %v5018_v49 = vld [vmem:[%s7386_s7 + $0x30] sm:$0xff]  ;;  %1165 = vmatpush.msrb.mxu2 %v5564_v22 }
 0x4d9   :  { %v5026_v36 = vld [vmem:[%s7386_s7 + $0x70] sm:$0xff]  ;;  %1039 = vmatpush.bf16.msra.mxu3 %v5018_v49 }
 0x4da   :  { %v777_v56 = vadd.f32 %v772_v50, %v722_v51  ;;  %1053 = vmatpush.bf16.msra.mxu0 %v5026_v36  ;;  %1166 = vmatpush.msrb.mxu2 %v5571_v25 }
 0x4dc   :  { %v5942_v3 = vadd.f32 %v777_v56, %v5522_v0  ;;  %1167 = vmatpush.msrb.mxu2 %v5577_v28 }
 0x4de   :  { %v781_v58 = vmul.f32 %v5942_v3, %v5942_v3  ;;  %1168 = vmatpush.msrb.mxu2 %v5583_v30  ;;  %v815_v30 = vperm.slane %v5624_v47, 1  ;;  %v5023_v47 = vld [vmem:[%s7386_s7 + $0x58] sm:$0xff] }
 0x4df   :  { %v719_v16 = vpop.f32.mrf.mxu2  ;;  %v774_v62 = vpop.f32.mrf.mxu0 }
 0x4e0   :  { %v723_v27 = vadd.f32 %v719_v16, %v662_v54  ;;  %v783_v14 = vsel %vm77_vm0, %v781_v58, 0.0  ;;  %v5017_v54 = vld [vmem:[%s7386_s7 + $0x28] sm:$0xff]  ;;  %1169 = vmatpush.msrb.mxu2 %v5589_v32 }
 0x4e1   :  { %784 = vadd.xlane.f32.xlu2 %v783_v14  ;;  %v5025_v58 = vld [vmem:[%s7386_s7 + $0x68] sm:$0xff]  ;;  %1040 = vmatpush.bf16.msra.mxu3 %v5017_v54 }
 0x4e2   :  { %v778_v1 = vadd.f32 %v774_v62, %v723_v27  ;;  %1054 = vmatpush.bf16.msra.mxu0 %v5025_v58  ;;  %1170 = vmatpush.msrb.mxu2 %v5595_v34 }
 0x4e4   :  { %v5948_v6 = vadd.f32 %v778_v1, %v5529_v2  ;;  %v4256_v2 = vor.u32 %v5011_v23, %v4255_v8  ;;  %1171 = vmatpush.msrb.mxu2 %v5601_v37 }
 0x4e5   :  { %1041 = vmatpush.bf16.msra.mxu3 %v5016_v20 }
 0x4e6   :  { %v782_v60 = vmul.f32 %v5948_v6, %v5948_v6  ;;  %880 = vmatpush.bf16.msrb.mxu1 %v4256_v2  ;;  %1172 = vmatpush.msrb.mxu2 %v5607_v39  ;;  %v5015_v39 = vld [vmem:[%s7386_s7 + $0x18] sm:$0xff] }
 0x4e8   :  { %v786_v0 = vsel %vm77_vm0, %v782_v60, 0.0  ;;  %1173 = vmatpush.msrb.mxu2 %v5613_v42  ;;  %v5024_v42 = vld [vmem:[%s7386_s7 + $0x60] sm:$0xff] }
 0x4e9   :  { %787 = vadd.xlane.f32.xlu0 %v786_v0  ;;  %1042 = vmatpush.bf16.msra.mxu3 %v5015_v39 }
 0x4ea   :  { %881 = vmatpush.bf16.msrb.mxu1 %v4248_v4  ;;  %1174 = vmatpush.msrb.mxu2 %v5619_v44  ;;  %v5014_v44 = vld [vmem:[%s7386_s7 + $0x10] sm:$0xff] }
 0x4eb   :  { %1055 = vmatpush.bf16.msra.mxu0 %v5024_v42 }
 0x4ec   :  { %1175 = vmatpush.msrb.mxu2 %v5630_v48  ;;  %v5013_v48 = vld [vmem:[%s7386_s7 + $0x8] sm:$0xff] }
 0x4ed   :  { %1043 = vmatpush.bf16.msra.mxu3 %v5014_v44 }
 0x4ee   :  { %882 = vmatpush.bf16.msrb.mxu1 %v4240_v13  ;;  %1176 = vmatpush.msrb.mxu2 %v5638_v52  ;;  %v5022_v52 = vld [vmem:[%s7386_s7 + $0x50] sm:$0xff] }
 0x4ef   :  { %1056 = vmatpush.bf16.msra.mxu0 %v5023_v47 }
 0x4f0   :  { %1177 = vmatpush.msrb.mxu2 %v5645_v55  ;;  %v5012_v55 = vld [vmem:[%s7386_s7] sm:$0xff] }
 0x4f1   :  { %1044 = vmatpush.bf16.msra.mxu3 %v5013_v48 }
 0x4f2   :  { %883 = vmatpush.bf16.msrb.mxu1 %v4232_v40  ;;  %1178 = vmatpush.msrb.mxu2 %v5653_v59  ;;  %v5021_v59 = vld [vmem:[%s7386_s7 + $0x48] sm:$0xff]  ;;  %v5348_v40 = vld [vmem:[%s7387_s8] sm:$0xff] }
 0x4f3   :  { %1057 = vmatpush.bf16.msra.mxu0 %v5022_v52  ;;  %v1068_v41 = vperm.slane %v5348_v40, 3 }
 0x4f5   :  { %1045 = vmatpush.bf16.msra.mxu3 %v5012_v55 }
 0x4f7   :  { %1058 = vmatpush.bf16.msra.mxu0 %v5021_v59 }
 0x4fb   :  { %1059 = vmatpush.bf16.msra.mxu0 %v5020_v63 }
 0x554   :  { %v785_v12 = vpop.xlane.xlu2 %784 }
 0x555   :  { %v789_v17 = vmul.f32 %v785_v12, %v5544_v15 }
 0x557   :  { %v791_v35 = vadd.f32 1e-06, %v789_v17 }
 0x559   :  { %5220 = vrsqrt.f32 %v791_v35  ;;  %vm799_vm14 = vweird.f32 %v791_v35 }
 0x55c   :  { %v788_v50 = vpop.xlane.xlu0 %787 }
 0x55d   :  { %v790_v51 = vmul.f32 %v788_v50, %v5544_v15 }
 0x55f   :  { %v5221_v53 = vpop.eup %5220  ;;  %v792_v56 = vadd.f32 1e-06, %v790_v51 }
 0x560   :  { %v794_v16 = vmul.f32 %v5221_v53, %v791_v35  ;;  %vm800_vm13 = vweird.f32 %v5221_v53 }
 0x561   :  { %5222 = vrsqrt.f32 %v792_v56  ;;  %vm801_vm15 = vmor %vm799_vm14, %vm800_vm13  ;;  %vm809_vm2 = vweird.f32 %v792_v56 }
 0x562   :  { %v795_v27 = vmul.f32 %v5221_v53, %v794_v16  ;;  %v5031_v16 = vld [vmem:[%s7383_s4 + $0x38] sm:$0xff] }
 0x563   :  { %1151 = vmatpush.bf16.msra.mxu1 %v5031_v16 }
 0x564   :  { %v796_v14 = vmul.f32 0.5, %v795_v27  ;;  %v5030_v27 = vld [vmem:[%s7383_s4 + $0x30] sm:$0xff] }
 0x566   :  { %v797_v62 = vsub.f32 1.5, %v796_v14  ;;  %v5029_v14 = vld [vmem:[%s7383_s4 + $0x28] sm:$0xff] }
 0x567   :  { %v5223_v1 = vpop.eup %5222  ;;  %1152 = vmatpush.bf16.msra.mxu1 %v5030_v27 }
 0x568   :  { %v804_v60 = vmul.f32 %v5223_v1, %v792_v56  ;;  %v798_v21 = vmul.f32 %v5221_v53, %v797_v62  ;;  %vm810_vm1 = vweird.f32 %v5223_v1 }
 0x569   :  { %vm811_vm3 = vmor %vm809_vm2, %vm810_vm1 }
 0x56a   :  { %v805_v22 = vmul.f32 %v5223_v1, %v804_v60  ;;  %v802_v8 = vsel %vm801_vm15, %v5221_v53, %v798_v21 }
 0x56b   :  { %v813_v23 = vmul.f32 %v802_v8, %v5942_v3  ;;  %1153 = vmatpush.bf16.msra.mxu1 %v5029_v14 }
 0x56c   :  { %v806_v0 = vmul.f32 0.5, %v805_v22 }
 0x56d   :  { %v816_v57 = vmul.f32 %v815_v30, %v813_v23 }
 0x56e   :  { %v807_v25 = vsub.f32 1.5, %v806_v0 }
 0x570   :  { %v808_v28 = vmul.f32 %v5223_v1, %v807_v25 }
 0x572   :  { %v812_v32 = vsel %vm811_vm3, %v5223_v1, %v808_v28  ;;  %v5028_v1 = vld [vmem:[%s7383_s4 + $0x20] sm:$0xff] }
 0x573   :  { %v814_v34 = vmul.f32 %v812_v32, %v5948_v6  ;;  %1154 = vmatpush.bf16.msra.mxu1 %v5028_v1 }
 0x575   :  { %v817_v2 = vmul.f32 %v815_v30, %v814_v34 }
 0x577   :  { %v826_v37 = vpack.c.bf16 %v817_v2, %v816_v57 }
 0x579   :  { %4261 = vmatmul.msk.bf16.vlgmr.msrb.gmra.mxu1 %vm77_vm0, %v826_v37  ;;  %4262 = vmatmul.msk.bf16.vlgmr.msra.gmra.mxu2 %vm77_vm0, %v826_v37  ;;  %v6107_v37 = vld [vmem:[%s7387_s8 + $0x8] sm:$0xff] }
 0x57a   :  { %v1107_v47 = vperm.slane %v6107_v37, 0 }
 0x5f6   :  { %v885_v11 = vpop.f32.mrf.mxu1 }
 0x5f7   :  { %v886_v4 = vadd.f32 %v885_v11, %v829_v61 }
 0x5f9   :  { %v904_v17 = vmax.f32 %v886_v4, 0.0  ;;  %v5349_v4 = vld [vmem:[%s7380_s1] sm:$0xff] }
 0x5fc   :  { %v899_v38 = vpop.f32.mrf.mxu2 }
 0x5fd   :  { %v900_v18 = vadd.f32 %v899_v38, %v830_v10 }
 0x5fe   :  { %v887_v7 = vpop.f32.mrf.mxu1 }
 0x5ff   :  { %v888_v12 = vadd.f32 %v887_v7, %v829_v61  ;;  %v905_v29 = vmax.f32 %v900_v18, 0.0  ;;  %v5351_v18 = vld [vmem:[%s7380_s1 + $0x8] sm:$0xff] }
 0x601   :  { %v906_v24 = vmax.f32 %v888_v12, 0.0 }
 0x603   :  { %v940_v5 = vpack.c.bf16 %v906_v24, %v904_v17 }
 0x604   :  { %v901_v13 = vpop.f32.mrf.mxu2 }
 0x605   :  { %v902_v26 = vadd.f32 %v901_v13, %v830_v10  ;;  %1046 = vmatmul.bf16.vlgmr.msra.gmra.mxu3 %v940_v5  ;;  %v5350_v10 = vld [vmem:[%s7380_s1 + $0x10] sm:$0xff]  ;;  %v5352_v13 = vld [vmem:[%s7380_s1 + $0x18] sm:$0xff] }
 0x607   :  { %v907_v33 = vmax.f32 %v902_v26, 0.0 }
 0x609   :  { %v941_v35 = vpack.c.bf16 %v907_v33, %v905_v29 }
 0x60b   :  { %1060 = vmatmul.bf16.vlgmr.msra.gmra.mxu0 %v941_v35 }
 0x688   :  { %v1047_v31 = vpop.f32.mrf.mxu3  ;;  %v1061_v43 = vpop.f32.mrf.mxu0 }
 0x689   :  { %v1062_v46 = vadd.f32 %v1061_v43, %v1047_v31 }
 0x68b   :  { %v1066_v19 = vadd.f32 %v1062_v46, %v5942_v3 }
 0x68d   :  { %v6079_v45 = vadd.f32 %v1068_v41, %v1066_v19 }
 0x68f   :  { %v1073_v49 = vmul.f32 %v6079_v45, %v6079_v45 }
 0x690   :  { %v1049_v36 = vpop.f32.mrf.mxu3  ;;  %v1063_v50 = vpop.f32.mrf.mxu0 }
 0x691   :  { %v1064_v51 = vadd.f32 %v1063_v50, %v1049_v36  ;;  %v1075_v53 = vsel %vm77_vm0, %v1073_v49, 0.0 }
 0x692   :  { %1076 = vadd.xlane.f32.xlu2 %v1075_v53 }
 0x693   :  { %v1067_v56 = vadd.f32 %v1064_v51, %v5948_v6  ;;  %v5353_v51 = vld [vmem:[%s7382_s3] sm:$0xff] }
 0x695   :  { %v6085_v54 = vadd.f32 %v1068_v41, %v1067_v56 }
 0x697   :  { %v1074_v58 = vmul.f32 %v6085_v54, %v6085_v54 }
 0x699   :  { %v1078_v3 = vsel %vm77_vm0, %v1074_v58, 0.0 }
 0x69a   :  { %1079 = vadd.xlane.f32.xlu2 %v1078_v3  ;;  %v5354_v3 = vld [vmem:[%s7382_s3 + $0x10] sm:$0xff] }
 0x705   :  { %v1077_v20 = vpop.xlane.xlu2 %1076 }
 0x706   :  { %v1081_v6 = vmul.f32 %v1077_v20, %v5544_v15  ;;  %v5355_v20 = vld [vmem:[%s7382_s3 + $0x8] sm:$0xff] }
 0x708   :  { %v1083_v62 = vadd.f32 1e-06, %v1081_v6 }
 0x70a   :  { %5224 = vrsqrt.f32 %v1083_v62  ;;  %vm1091_vm5 = vweird.f32 %v1083_v62 }
 0x70d   :  { %v1080_v60 = vpop.xlane.xlu2 %1079 }
 0x70e   :  { %v1082_v21 = vmul.f32 %v1080_v60, %v5544_v15  ;;  %v5356_v60 = vld [vmem:[%s7382_s3 + $0x18] sm:$0xff] }
 0x710   :  { %v5225_v22 = vpop.eup %5224  ;;  %v1084_v0 = vadd.f32 1e-06, %v1082_v21 }
 0x711   :  { %v1086_v8 = vmul.f32 %v5225_v22, %v1083_v62  ;;  %vm1092_vm4 = vweird.f32 %v5225_v22 }
 0x712   :  { %5226 = vrsqrt.f32 %v1084_v0  ;;  %vm1093_vm6 = vmor %vm1091_vm5, %vm1092_vm4  ;;  %vm1101_vm9 = vweird.f32 %v1084_v0 }
 0x713   :  { %v1087_v25 = vmul.f32 %v5225_v22, %v1086_v8  ;;  %v5357_v8 = vld [vmem:[%s7382_s3 + $0x20] sm:$0xff] }
 0x715   :  { %v1088_v28 = vmul.f32 0.5, %v1087_v25 }
 0x717   :  { %v1089_v30 = vsub.f32 1.5, %v1088_v28 }
 0x718   :  { %v5227_v23 = vpop.eup %5226 }
 0x719   :  { %v1096_v32 = vmul.f32 %v5227_v23, %v1084_v0  ;;  %v1090_v34 = vmul.f32 %v5225_v22, %v1089_v30  ;;  %vm1102_vm7 = vweird.f32 %v5227_v23 }
 0x71a   :  { %vm1103_vm10 = vmor %vm1101_vm9, %vm1102_vm7 }
 0x71b   :  { %v1097_v57 = vmul.f32 %v5227_v23, %v1096_v32  ;;  %v1094_v39 = vsel %vm1093_vm6, %v5225_v22, %v1090_v34 }
 0x71c   :  { %v1105_v48 = vmul.f32 %v1094_v39, %v6079_v45 }
 0x71d   :  { %v1098_v2 = vmul.f32 0.5, %v1097_v57  ;;  %v5359_v57 = vld [vmem:[%s7382_s3 + $0x28] sm:$0xff] }
 0x71e   :  { %v1108_v59 = vmul.f32 %v1107_v47, %v1105_v48 }
 0x71f   :  { %v1099_v42 = vsub.f32 1.5, %v1098_v2 }
 0x721   :  { %v1100_v44 = vmul.f32 %v5227_v23, %v1099_v42 }
 0x723   :  { %v1104_v52 = vsel %vm1103_vm10, %v5227_v23, %v1100_v44  ;;  %v5358_v23 = vld [vmem:[%s7382_s3 + $0x30] sm:$0xff] }
 0x724   :  { %v1106_v55 = vmul.f32 %v1104_v52, %v6085_v54 }
 0x726   :  { %v1109_v63 = vmul.f32 %v1107_v47, %v1106_v55  ;;  %v5360_v47 = vld [vmem:[%s7382_s3 + $0x38] sm:$0xff] }
 0x728   :  { %v1119_v9 = vpack.c.bf16 %v1109_v63, %v1108_v59 }
 0x72a   :  { %4352 = vmatmul.msk.bf16.vlgmr.msra.gmra.mxu1 %vm77_vm0, %v1119_v9 }
 0x7a7   :  { %v1156_v11 = vpop.f32.mrf.mxu1 }
 0x7a8   :  { %1179 = vmatmul.f32.vlgmr.msrb.gmra.mxu2 %v1156_v11  ;;  %v1161_v7 = vmul.f32 %v5349_v4, %v1156_v11 }
 0x7af   :  { %v1158_v61 = vpop.f32.mrf.mxu1 }
 0x7b0   :  { %1182 = vmatmul.f32.gmra.mxu2 %v1158_v61  ;;  %v1162_v5 = vmul.f32 %v5351_v18, %v1158_v61 }
 0x82b   :  { %v1180_v38 = vpop.f32.mrf.mxu2 }
 0x82c   :  { %v1186_v12 = vmul.f32 %v5350_v10, %v1180_v38 }
 0x82e   :  { %v6119_v17 = vadd.f32 %v1186_v12, %v1161_v7 }
 0x830   :  { %1192 = vrot.lane.b32.xlu2 %v6119_v17, %s5446_s20 }
 0x833   :  { %v1183_v24 = vpop.f32.mrf.mxu2 }
 0x834   :  { %v1187_v26 = vmul.f32 %v5352_v13, %v1183_v24 }
 0x836   :  { %v6129_v29 = vadd.f32 %v1187_v26, %v1162_v5 }
 0x838   :  { %1258 = vrot.lane.b32.xlu2 %v6119_v17, %s5447_s21  ;;  %1229 = vrot.lane.b32.xlu0 %v6129_v29, %s5444_s14 }
 0x839   :  { %1194 = vrot.lane.b32.xlu1 %v6129_v29, %s5446_s20 }
 0x840   :  { %1297 = vrot.lane.b32.xlu2 %v6119_v17, %s5448_s22 }
 0x841   :  { %1227 = vrot.lane.b32.xlu1 %v6119_v17, %s5444_s14 }
 0x849   :  { %1264 = vrot.lane.b32.xlu1 %v6129_v29, %s5445_s19 }
 0x851   :  { %1262 = vrot.lane.b32.xlu1 %v6119_v17, %s5445_s19 }
 0x859   :  { %1260 = vrot.lane.b32.xlu1 %v6129_v29, %s5447_s21 }
 0x861   :  { %1299 = vrot.lane.b32.xlu1 %v6129_v29, %s5448_s22 }
 0x88a   :  { %v1193_v35 = vpop.permute.xlu2 %1192 }
 0x892   :  { %v1259_v40 = vpop.permute.xlu2 %1258 }
 0x89a   :  { %v1298_v19 = vpop.permute.xlu2 %1297 }
 0x8aa   :  { %v1230_v43 = vpop.permute.xlu0 %1229 }
 0x8ab   :  { %v1195_v33 = vpop.permute.xlu1 %1194 }
 0x8ac   :  { %4353 = vmatpush.xpose.msk.msrb.mxu1 %vm205_vm8, %v1195_v33  ;;  %4357 = vmatpush.xpose.msk.msrb.mxu3 %vm205_vm8, %v1195_v33 }
 0x8b0   :  { %4354 = vmatpush.xpose.msk.msrb.mxu1 %vm205_vm8, %v1193_v35  ;;  %4358 = vmatpush.xpose.msk.msrb.mxu3 %vm205_vm8, %v1193_v35 }
 0x8b3   :  { %4355 = vmatmul.msk.f32.vlgmr.msrb.gmra.mxu1 %vm205_vm8, %v6119_v17  ;;  %v1228_v31 = vpop.permute.xlu1 %1227 }
 0x8b4   :  { %4359 = vmatmul.msk.f32.vlgmr.msrb.gmra.mxu3 %vm205_vm8, %v1228_v31 }
 0x8bb   :  { %4356 = vmatmul.msk.f32.gmra.mxu1 %vm205_vm8, %v6129_v29  ;;  %v1265_v46 = vpop.permute.xlu1 %1264 }
 0x8bc   :  { %4360 = vmatmul.msk.f32.gmra.mxu3 %vm205_vm8, %v1230_v43  ;;  %4361 = vmatpush.xpose.msk.msrb.mxu0 %vm205_vm8, %v1265_v46 }
 0x8bd   :  { %4365 = vmatpush.xpose.msk.msra.mxu1 %vm205_vm8, %v1265_v46 }
 0x8c3   :  { %v1263_v41 = vpop.permute.xlu1 %1262 }
 0x8c4   :  { %4362 = vmatpush.xpose.msk.msrb.mxu0 %vm205_vm8, %v1263_v41  ;;  %4366 = vmatpush.xpose.msk.msra.mxu1 %vm205_vm8, %v1263_v41 }
 0x8c7   :  { %4363 = vmatmul.msk.f32.vlgmr.msrb.gmra.mxu0 %vm205_vm8, %v1259_v40  ;;  %4367 = vmatmul.msk.f32.vlgmr.msra.gmra.mxu1 %vm205_vm8, %v1298_v19 }
 0x8cb   :  { %v1261_v49 = vpop.permute.xlu1 %1260 }
 0x8cf   :  { %4364 = vmatmul.msk.f32.gmra.mxu0 %vm205_vm8, %v1261_v49 }
 0x8d3   :  { %v1300_v36 = vpop.permute.xlu1 %1299 }
 0x8d4   :  { %4368 = vmatmul.msk.f32.gmra.mxu1 %vm205_vm8, %v1300_v36 }
 0x930   :  { %v1221_v50 = vpop.f32.mrf.mxu1 }
 0x931   :  { %v1328_v53 = vadd.f32 %v5353_v51, %v1221_v50 }
 0x933   :  { %v1336_v56 = vsel %vm205_vm8, %v1328_v53, -inf }
 0x934   :  { %1337 = vmax.xlane.f32.xlu0 %v1336_v56 }
 0x937   :  { %v1252_v58 = vpop.f32.mrf.mxu3 }
 0x938   :  { %v1330_v16 = vadd.f32 %v5354_v3, %v1252_v58  ;;  %v1224_v27 = vpop.f32.mrf.mxu1 }
 0x939   :  { %v1329_v6 = vadd.f32 %v5355_v20, %v1224_v27 }
 0x93a   :  { %v1342_v14 = vsel %vm205_vm8, %v1330_v16, -inf }
 0x93b   :  { %1343 = vmax.xlane.f32.xlu1 %v1342_v14  ;;  %v1339_v62 = vsel %vm205_vm8, %v1329_v6, -inf }
 0x93c   :  { %1340 = vmax.xlane.f32.xlu2 %v1339_v62 }
 0x93f   :  { %v1255_v1 = vpop.f32.mrf.mxu3 }
 0x940   :  { %v1331_v21 = vadd.f32 %v5356_v60, %v1255_v1 }
 0x942   :  { %v1345_v22 = vsel %vm205_vm8, %v1331_v21, -inf }
 0x944   :  { %1346 = vmax.xlane.f32.xlu2 %v1345_v22  ;;  %v1291_v0 = vpop.f32.mrf.mxu0  ;;  %v1322_v30 = vpop.f32.mrf.mxu1 }
 0x945   :  { %v1332_v25 = vadd.f32 %v5357_v8, %v1291_v0  ;;  %v1334_v32 = vadd.f32 %v5358_v23, %v1322_v30 }
 0x947   :  { %v1348_v28 = vsel %vm205_vm8, %v1332_v25, -inf  ;;  %v1354_v39 = vsel %vm205_vm8, %v1334_v32, -inf }
 0x948   :  { %1349 = vmax.xlane.f32.xlu0 %v1348_v28 }
 0x94c   :  { %v1294_v34 = vpop.f32.mrf.mxu0 }
 0x94d   :  { %v1333_v2 = vadd.f32 %v5359_v57, %v1294_v34 }
 0x94f   :  { %v1351_v42 = vsel %vm205_vm8, %v1333_v2, -inf }
 0x950   :  { %1355 = vmax.xlane.f32.xlu0 %v1354_v39  ;;  %1352 = vmax.xlane.f32.xlu1 %v1351_v42 }
 0x951   :  { %v1325_v44 = vpop.f32.mrf.mxu1 }
 0x952   :  { %v1335_v48 = vadd.f32 %v5360_v47, %v1325_v44 }
 0x954   :  { %v1357_v52 = vsel %vm205_vm8, %v1335_v48, -inf }
 0x955   :  { %1358 = vmax.xlane.f32.xlu2 %v1357_v52 }
 0x9a7   :  { %v1338_v55 = vpop.xlane.xlu0 %1337 }
 0x9a8   :  { %v1360_v59 = vsub.f32 %v1328_v53, %v1338_v55 }
 0x9aa   :  { %v1368_v63 = vmul.f32 1.442695, %v1360_v59 }
 0x9ac   :  { %5228 = vpow2.f32 %v1368_v63 }
 0x9ae   :  { %v1344_v9 = vpop.xlane.xlu1 %1343 }
 0x9af   :  { %v1362_v11 = vsub.f32 %v1330_v16, %v1344_v9  ;;  %v1341_v61 = vpop.xlane.xlu2 %1340 }
 0x9b0   :  { %v1361_v38 = vsub.f32 %v1329_v6, %v1341_v61  ;;  %v5151_v6 = vpack.i.bf16 %v6119_v17, %v6129_v29 }
 0x9b1   :  { %v1372_v4 = vmul.f32 1.442695, %v1362_v11 }
 0x9b2   :  { %v6199_v7 = vpop.eup %5228  ;;  %v1370_v10 = vmul.f32 1.442695, %v1361_v38 }
 0x9b3   :  { %5230 = vpow2.f32 %v1372_v4  ;;  %v1384_v12 = vsel %vm205_vm8, %v6199_v7, 0.0 }
 0x9b4   :  { %5232 = vpow2.f32 %v1370_v10  ;;  %1385 = vadd.xlane.f32.xlu1 %v1384_v12 }
 0x9b7   :  { %v1347_v24 = vpop.xlane.xlu2 %1346 }
 0x9b8   :  { %v1363_v18 = vsub.f32 %v1331_v21, %v1347_v24 }
 0x9b9   :  { %v6203_v5 = vpop.eup %5230 }
 0x9ba   :  { %v6205_v13 = vpop.eup %5232  ;;  %v1374_v26 = vmul.f32 1.442695, %v1363_v18  ;;  %v1390_v33 = vsel %vm205_vm8, %v6203_v5, 0.0 }
 0x9bb   :  { %v1350_v35 = vpop.xlane.xlu0 %1349  ;;  %1391 = vadd.xlane.f32.xlu2 %v1390_v33  ;;  %v1387_v31 = vsel %vm205_vm8, %v6205_v13, 0.0 }
 0x9bc   :  { %5234 = vpow2.f32 %v1374_v26  ;;  %v1364_v43 = vsub.f32 %v1332_v25, %v1350_v35  ;;  %1388 = vadd.xlane.f32.xlu0 %v1387_v31 }
 0x9be   :  { %v1376_v46 = vmul.f32 1.442695, %v1364_v43 }
 0x9c0   :  { %5236 = vpow2.f32 %v1376_v46 }
 0x9c2   :  { %v6211_v40 = vpop.eup %5234 }
 0x9c3   :  { %v1356_v41 = vpop.xlane.xlu0 %1355  ;;  %v1353_v19 = vpop.xlane.xlu1 %1352  ;;  %v1393_v49 = vsel %vm205_vm8, %v6211_v40, 0.0 }
 0x9c4   :  { %v1366_v36 = vsub.f32 %v1334_v32, %v1356_v41  ;;  %v1365_v50 = vsub.f32 %v1333_v2, %v1353_v19  ;;  %1394 = vadd.xlane.f32.xlu2 %v1393_v49 }
 0x9c6   :  { %v6215_v51 = vpop.eup %5236  ;;  %v1380_v53 = vmul.f32 1.442695, %v1366_v36  ;;  %v1378_v56 = vmul.f32 1.442695, %v1365_v50 }
 0x9c7   :  { %v1396_v58 = vsel %vm205_vm8, %v6215_v51, 0.0 }
 0x9c8   :  { %5238 = vpow2.f32 %v1380_v53  ;;  %1397 = vadd.xlane.f32.xlu1 %v1396_v58  ;;  %v1359_v3 = vpop.xlane.xlu2 %1358 }
 0x9c9   :  { %5240 = vpow2.f32 %v1378_v56  ;;  %v1367_v16 = vsub.f32 %v1335_v48, %v1359_v3 }
 0x9cb   :  { %v1382_v27 = vmul.f32 1.442695, %v1367_v16 }
 0x9cd   :  { %5242 = vpow2.f32 %v1382_v27 }
 0x9ce   :  { %v6219_v20 = vpop.eup %5238 }
 0x9cf   :  { %v6223_v14 = vpop.eup %5240  ;;  %v1402_v62 = vsel %vm205_vm8, %v6219_v20, 0.0 }
 0x9d0   :  { %5152 = vrot.lane.b32.xlu0 %v5151_v6, %s5449_s25  ;;  %1403 = vadd.xlane.f32.xlu2 %v1402_v62  ;;  %v1399_v1 = vsel %vm205_vm8, %v6223_v14, 0.0 }
 0x9d1   :  { %1400 = vadd.xlane.f32.xlu1 %v1399_v1 }
 0x9d3   :  { %v6230_v60 = vpop.eup %5242 }
 0x9d4   :  { %v1405_v21 = vsel %vm205_vm8, %v6230_v60, 0.0 }
 0x9d8   :  { %1406 = vadd.xlane.f32.xlu2 %v1405_v21 }
 0x9ea   :  { %5157 = vrot.lane.b32.xlu1 %v5151_v6, %s5450_s26  ;;  %v5033_v6 = vld [vmem:[%s7384_s5 + $0x28] sm:$0xff] }
 0x9eb   :  { %1645 = vmatpush.bf16.msrb.mxu1 %v5033_v6 }
 0xa27   :  { %v1386_v17 = vpop.xlane.xlu1 %1385 }
 0xa28   :  { %5244 = vrcp.f32 %v1386_v17  ;;  %vm1413_vm13 = vweird.f32 %v1386_v17  ;;  %v1419_v55 = vand.u32 2147483648, %v1386_v17  ;;  %v1417_v9 = vand.u32 2147483647, %v1386_v17 }
 0xa2a   :  { %v1420_v18 = vor.u32 1.1754944e-38, %v1419_v55  ;;  %vm1418_vm2 = vcmp.eq.f32.partialorder %v1417_v9, 8.507059e+37 }
 0xa2e   :  { %v5245_v29 = vpop.eup %5244  ;;  %v1392_v22 = vpop.xlane.xlu2 %1391 }
 0xa2f   :  { %5246 = vrcp.f32 %v1392_v22  ;;  %v6235_v0 = vpop.xlane.xlu0 %1388  ;;  %v1409_v8 = vmul.f32 %v5245_v29, %v1386_v17  ;;  %vm1414_vm11 = vweird.f32 %v5245_v29  ;;  %v1447_v59 = vand.u32 2147483648, %v1392_v22 }
 0xa30   :  { %5248 = vrcp.f32 %v6235_v0  ;;  %vm6249_vm14 = vmor %vm1413_vm13, %vm1414_vm11  ;;  %vm1441_vm15 = vweird.f32 %v1392_v22  ;;  %v1445_v11 = vand.u32 2147483647, %v1392_v22  ;;  %vm1427_vm5 = vweird.f32 %v6235_v0 }
 0xa31   :  { %v1410_v28 = vsub.f32 1.0, %v1409_v8  ;;  %v1448_v26 = vor.u32 1.1754944e-38, %v1447_v59  ;;  %v1433_v19 = vand.u32 2147483648, %v6235_v0  ;;  %v1431_v58 = vand.u32 2147483647, %v6235_v0 }
 0xa32   :  { %vm1446_vm3 = vcmp.eq.f32.partialorder %v1445_v11, 8.507059e+37 }
 0xa33   :  { %v1411_v57 = vmul.f32 %v5245_v29, %v1410_v28  ;;  %vm1432_vm11 = vcmp.eq.f32.partialorder %v1431_v58, 8.507059e+37 }
 0xa35   :  { %v5247_v25 = vpop.eup %5246  ;;  %v1412_v44 = vadd.f32 %v5245_v29, %v1411_v57 }
 0xa36   :  { %v6238_v30 = vpop.eup %5248  ;;  %v1437_v23 = vmul.f32 %v5247_v25, %v1392_v22  ;;  %vm1442_vm12 = vweird.f32 %v5247_v25 }
 0xa37   :  { %v6240_v32 = vpop.xlane.xlu2 %1394  ;;  %v1423_v2 = vmul.f32 %v6238_v30, %v6235_v0  ;;  %vm6255_vm1 = vmor %vm1441_vm15, %vm1442_vm12  ;;  %v1416_v4 = vsel %vm6249_vm14, %v5245_v29, %v1412_v44  ;;  %vm1428_vm4 = vweird.f32 %v6238_v30  ;;  %v1434_v29 = vor.u32 1.1754944e-38, %v1433_v19 }
 0xa38   :  { %v1438_v34 = vsub.f32 1.0, %v1437_v23  ;;  %5250 = vrcp.f32 %v6240_v32  ;;  %v1421_v43 = vsel %vm1418_vm2, %v1420_v18, %v1416_v4  ;;  %v1461_v50 = vand.u32 2147483648, %v6240_v32  ;;  %vm6288_vm9 = vmor %vm1427_vm5, %vm1428_vm4 }
 0xa39   :  { %v1424_v48 = vsub.f32 1.0, %v1423_v2  ;;  %vm1455_vm7 = vweird.f32 %v6240_v32  ;;  %v1520_v16 = vmul.f32 %v6199_v7, %v1421_v43  ;;  %v1459_v62 = vand.u32 2147483647, %v6240_v32 }
 0xa3a   :  { %v1439_v39 = vmul.f32 %v5247_v25, %v1438_v34  ;;  %v1462_v22 = vor.u32 1.1754944e-38, %v1461_v50 }
 0xa3b   :  { %v6245_v42 = vpop.xlane.xlu1 %1397  ;;  %v1425_v12 = vmul.f32 %v6238_v30, %v1424_v48  ;;  %vm1460_vm12 = vcmp.eq.f32.partialorder %v1459_v62, 8.507059e+37  ;;  %v5032_v62 = vld [vmem:[%s7384_s5 + $0x20] sm:$0xff] }
 0xa3c   :  { %v1440_v47 = vadd.f32 %v5247_v25, %v1439_v39  ;;  %5252 = vrcp.f32 %v6245_v42  ;;  %vm1469_vm15 = vweird.f32 %v6245_v42  ;;  %v1475_v59 = vand.u32 2147483648, %v6245_v42  ;;  %1589 = vmatpush.bf16.msra.mxu3 %v5032_v62  ;;  %v4418_v62 = vld [vmem:[%s7385_s6 + $0x48] sm:$0xf0] }
 0xa3d   :  { %v1426_v49 = vadd.f32 %v6238_v30, %v1425_v12  ;;  %v1473_v9 = vand.u32 2147483647, %v6245_v42 }
 0xa3e   :  { %v6247_v52 = vpop.eup %5250  ;;  %v1444_v10 = vsel %vm6255_vm1, %v5247_v25, %v1440_v47  ;;  %v1476_v12 = vor.u32 1.1754944e-38, %v1475_v59 }
 0xa3f   :  { %v1451_v61 = vmul.f32 %v6247_v52, %v6240_v32  ;;  %v1449_v46 = vsel %vm1446_vm3, %v1448_v26, %v1444_v10  ;;  %vm1456_vm6 = vweird.f32 %v6247_v52  ;;  %vm1474_vm4 = vcmp.eq.f32.partialorder %v1473_v9, 8.507059e+37 }
 0xa40   :  { %v1522_v27 = vmul.f32 %v6203_v5, %v1449_v46  ;;  %vm6295_vm10 = vmor %vm1455_vm7, %vm1456_vm6  ;;  %v1430_v5 = vsel %vm6288_vm9, %v6238_v30, %v1426_v49 }
 0xa41   :  { %v1452_v24 = vsub.f32 1.0, %v1451_v61  ;;  %v1435_v25 = vsel %vm1432_vm11, %v1434_v29, %v1430_v5  ;;  %v5034_v5 = vld [vmem:[%s7384_s5 + $0x30] sm:$0xff] }
 0xa42   :  { %v5153_v33 = vpop.permute.xlu0 %5152  ;;  %v6274_v36 = vpop.eup %5252  ;;  %v1521_v34 = vmul.f32 %v6205_v13, %v1435_v25  ;;  %1706 = vmatpush.bf16.msrb.mxu3 %v5034_v5  ;;  %v5050_v5 = vld [vmem:[%s7386_s7 + $0xb0] sm:$0xff] }
 0xa43   :  { %v1453_v35 = vmul.f32 %v6247_v52, %v1452_v24  ;;  %v6266_v31 = vpop.xlane.xlu2 %1403  ;;  %v5154_v41 = vunpack.i.l.bf16 %v5153_v33  ;;  %v5155_v53 = vunpack.i.h.bf16 %v5153_v33  ;;  %v1465_v7 = vmul.f32 %v6274_v36, %v6245_v42 }
 0xa44   :  { %5254 = vrcp.f32 %v6266_v31  ;;  %v6277_v56 = vpop.xlane.xlu1 %1400  ;;  %vm1470_vm13 = vweird.f32 %v6274_v36  ;;  %v1503_v63 = vand.u32 2147483648, %v6266_v31  ;;  %vm1497_vm2 = vweird.f32 %v6266_v31 }
 0xa45   :  { %1563 = vmatpush.msra.mxu2 %v5154_v41  ;;  %1619 = vmatpush.msra.mxu0 %v5154_v41  ;;  %v1454_v3 = vadd.f32 %v6247_v52, %v1453_v35  ;;  %5256 = vrcp.f32 %v6277_v56  ;;  %v1466_v23 = vsub.f32 1.0, %v1465_v7  ;;  %vm1471_vm1 = vmor %vm1469_vm15, %vm1470_vm13  ;;  %v1501_v11 = vand.u32 2147483647, %v6266_v31 }
 0xa46   :  { %v1504_v24 = vor.u32 1.1754944e-38, %v1503_v63  ;;  %vm1483_vm7 = vweird.f32 %v6277_v56  ;;  %v1489_v43 = vand.u32 2147483648, %v6277_v56  ;;  %v1487_v19 = vand.u32 2147483647, %v6277_v56 }
 0xa47   :  { %1564 = vmatpush.msra.mxu2 %v5155_v53  ;;  %1620 = vmatpush.msra.mxu0 %v5155_v53  ;;  %v1458_v21 = vsel %vm6295_vm10, %v6247_v52, %v1454_v3  ;;  %v1467_v2 = vmul.f32 %v6274_v36, %v1466_v23  ;;  %vm1502_vm5 = vcmp.eq.f32.partialorder %v1501_v11, 8.507059e+37 }
 0xa48   :  { %4377 = vmatmul.msk.f32.vlgmr.msra.gmra.mxu2 %vm205_vm8, %v1520_v16  ;;  %4384 = vmatmul.msk.f32.vlgmr.msra.gmra.mxu0 %vm205_vm8, %v1522_v27  ;;  %v1463_v28 = vsel %vm1460_vm12, %v1462_v22, %v1458_v21  ;;  %vm1488_vm13 = vcmp.eq.f32.partialorder %v1487_v19, 8.507059e+37 }
 0xa49   :  { %v1523_v57 = vmul.f32 %v6211_v40, %v1463_v28  ;;  %v1468_v52 = vadd.f32 %v6274_v36, %v1467_v2 }
 0xa4a   :  { %v5255_v17 = vpop.eup %5254 }
 0xa4b   :  { %v1493_v0 = vmul.f32 %v5255_v17, %v6266_v31  ;;  %v6311_v8 = vpop.xlane.xlu2 %1406  ;;  %v6314_v30 = vpop.eup %5256  ;;  %vm1498_vm14 = vweird.f32 %v5255_v17  ;;  %v1472_v61 = vsel %vm1471_vm1, %v6274_v36, %v1468_v52 }
 0xa4c   :  { %5258 = vrcp.f32 %v6311_v8  ;;  %v1479_v47 = vmul.f32 %v6314_v30, %v6277_v56  ;;  %vm1499_vm3 = vmor %vm1497_vm2, %vm1498_vm14  ;;  %v1477_v26 = vsel %vm1474_vm4, %v1476_v12, %v1472_v61  ;;  %vm1484_vm6 = vweird.f32 %v6314_v30 }
 0xa4d   :  { %v1494_v32 = vsub.f32 1.0, %v1493_v0  ;;  %v1517_v46 = vand.u32 2147483648, %v6311_v8  ;;  %vm1511_vm10 = vweird.f32 %v6311_v8  ;;  %v1524_v49 = vmul.f32 %v6215_v51, %v1477_v26  ;;  %vm1485_vm11 = vmor %vm1483_vm7, %vm1484_vm6  ;;  %v5042_v26 = vld [vmem:[%s7385_s6 + $0x74] sm:$0xf] }
 0xa4e   :  { %v1480_v40 = vsub.f32 1.0, %v1479_v47  ;;  %v1515_v50 = vand.u32 2147483647, %v6311_v8  ;;  %v1490_v56 = vor.u32 1.1754944e-38, %v1489_v43  ;;  %v5040_v43 = vld [vmem:[%s7385_s6 + $0x64] sm:$0xf] }
 0xa4f   :  { %v1495_v44 = vmul.f32 %v5255_v17, %v1494_v32  ;;  %v1518_v3 = vor.u32 1.1754944e-38, %v1517_v46 }
 0xa50   :  { %4378 = vmatmul.msk.f32.gmra.mxu2 %vm205_vm8, %v1521_v34  ;;  %4385 = vmatmul.msk.f32.gmra.mxu0 %vm205_vm8, %v1523_v57  ;;  %v1481_v4 = vmul.f32 %v6314_v30, %v1480_v40  ;;  %vm1516_vm14 = vcmp.eq.f32.partialorder %v1515_v50, 8.507059e+37  ;;  %v1596_v34 = vperm.slane %v6107_v37, 2  ;;  %v5038_v50 = vld [vmem:[%s7385_s6 + $0x54] sm:$0xf] }
 0xa51   :  { %v1496_v13 = vadd.f32 %v5255_v17, %v1495_v44 }
 0xa52   :  { %v5259_v39 = vpop.eup %5258  ;;  %v1482_v42 = vadd.f32 %v6314_v30, %v1481_v4 }
 0xa53   :  { %v1507_v48 = vmul.f32 %v5259_v39, %v6311_v8  ;;  %v1500_v38 = vsel %vm1499_vm3, %v5255_v17, %v1496_v13  ;;  %vm1512_vm9 = vweird.f32 %v5259_v39 }
 0xa54   :  { %v1505_v33 = vsel %vm1502_vm5, %v1504_v24, %v1500_v38  ;;  %vm1513_vm12 = vmor %vm1511_vm10, %vm1512_vm9  ;;  %v1486_v53 = vsel %vm1485_vm11, %v6314_v30, %v1482_v42  ;;  %v4440_v24 = vld [vmem:[%s7385_s6 + $0x70] sm:$0xf]  ;;  %v4432_v42 = vld [vmem:[%s7385_s6 + $0x60] sm:$0xf] }
 0xa55   :  { %v1508_v55 = vsub.f32 1.0, %v1507_v48  ;;  %v1526_v36 = vmul.f32 %v6219_v20, %v1505_v33  ;;  %v1491_v51 = vsel %vm1488_vm13, %v1490_v56, %v1486_v53  ;;  %v4442_v33 = vld [vmem:[%s7385_s6 + $0x78] sm:$0xf0] }
 0xa56   :  { %v1525_v20 = vmul.f32 %v6223_v14, %v1491_v51  ;;  %v5035_v14 = vld [vmem:[%s7384_s5 + $0x38] sm:$0xff] }
 0xa57   :  { %v1509_v10 = vmul.f32 %v5259_v39, %v1508_v55  ;;  %1761 = vmatpush.bf16.msra.mxu1 %v5035_v14  ;;  %v4426_v56 = vld [vmem:[%s7385_s6 + $0x58] sm:$0xf0] }
 0xa58   :  { %v4429_v51 = vor.u32 %v5038_v50, %v4426_v56  ;;  %v5047_v50 = vld [vmem:[%s7386_s7 + $0x98] sm:$0xff]  ;;  %v5054_v56 = vld [vmem:[%s7386_s7 + $0xd0] sm:$0xff] }
 0xa59   :  { %v1510_v31 = vadd.f32 %v5259_v39, %v1509_v10 }
 0xa5b   :  { %v1514_v58 = vsel %vm1513_vm12, %v5259_v39, %v1510_v31  ;;  %v5041_v31 = vld [vmem:[%s7385_s6 + $0x64] sm:$0xf0] }
 0xa5c   :  { %v5158_v18 = vpop.permute.xlu1 %5157  ;;  %v1519_v16 = vsel %vm1516_vm14, %v1518_v3, %v1514_v58  ;;  %v4433_v46 = vor.u32 %v5041_v31, %v4432_v42  ;;  %v5373_v31 = vld [vmem:[%s7381_s2 + $0x18] sm:$0xff] }
 0xa5d   :  { %v5159_v35 = vunpack.i.l.bf16 %v5158_v18  ;;  %v5160_v41 = vunpack.i.h.bf16 %v5158_v18  ;;  %v1527_v27 = vmul.f32 %v6230_v60, %v1519_v16  ;;  %v5043_v18 = vld [vmem:[%s7385_s6 + $0x74] sm:$0xf0]  ;;  %v4416_v16 = vld [vmem:[%s7385_s6 + $0x40] sm:$0xf] }
 0xa5f   :  { %1680 = vmatpush.msrb.mxu2 %v5159_v35  ;;  %1735 = vmatpush.msrb.mxu0 %v5159_v35  ;;  %v4445_v35 = vor.u32 %v5042_v26, %v4442_v33  ;;  %v1806_v26 = vperm.slane %v6107_v37, 1 }
 0xa61   :  { %1681 = vmatpush.msrb.mxu2 %v5160_v41  ;;  %1736 = vmatpush.msrb.mxu0 %v5160_v41  ;;  %v4434_v41 = vld [vmem:[%s7385_s6 + $0x68] sm:$0xf0] }
 0xa62   :  { %4391 = vmatmul.msk.f32.vlgmr.msrb.gmra.mxu2 %vm205_vm8, %v1524_v49  ;;  %4398 = vmatmul.msk.f32.vlgmr.msrb.gmra.mxu0 %vm205_vm8, %v1526_v36  ;;  %v4437_v19 = vor.u32 %v5040_v43, %v4434_v41  ;;  %v4424_v49 = vld [vmem:[%s7385_s6 + $0x50] sm:$0xf]  ;;  %v5039_v36 = vld [vmem:[%s7385_s6 + $0x54] sm:$0xf0] }
 0xa63   :  { %v4425_v58 = vor.u32 %v5039_v36, %v4424_v49  ;;  %v5374_v41 = vld [vmem:[%s7381_s2 + $0x10] sm:$0xff]  ;;  %v5375_v49 = vld [vmem:[%s7381_s2 + $0x8] sm:$0xff]  ;;  %v5376_v36 = vld [vmem:[%s7381_s2] sm:$0xff] }
 0xa6a   :  { %4392 = vmatmul.msk.f32.gmra.mxu2 %vm205_vm8, %v1525_v20  ;;  %4399 = vmatmul.msk.f32.gmra.mxu0 %vm205_vm8, %v1527_v27  ;;  %v5037_v20 = vld [vmem:[%s7385_s6 + $0x44] sm:$0xf0]  ;;  %v5036_v27 = vld [vmem:[%s7385_s6 + $0x44] sm:$0xf] }
 0xa6b   :  { %v4417_v6 = vor.u32 %v5037_v20, %v4416_v16  ;;  %v4421_v14 = vor.u32 %v5036_v27, %v4418_v62  ;;  %v5044_v16 = vld [vmem:[%s7386_s7 + $0x80] sm:$0xff] }
 0xa6c   :  { %v5052_v20 = vld [vmem:[%s7386_s7 + $0xc0] sm:$0xff] }
 0xa6d   :  { %v4413_v27 = vld [vmem:[%s7388_s9 + $0x2] sm:$0x3] }
 0xac5   :  { %v1622_v1 = vpop.f32.mrf.mxu0 }
 0xacb   :  { %v1566_v60 = vpop.f32.mrf.mxu2 }
 0xacd   :  { %v1625_v7 = vpop.f32.mrf.mxu0 }
 0xace   :  { %v1628_v21 = vpack.c.bf16 %v1625_v7, %v1622_v1  ;;  %v5059_v7 = vld [vmem:[%s7386_s7 + $0xf8] sm:$0xff] }
 0xad0   :  { %4390 = vmatmul.msk.bf16.vlgmr.msrb.gmra.mxu1 %vm205_vm8, %v1628_v21 }
 0xad1   :  { %2046 = vmatpush.bf16.msrb.mxu1 %v5059_v7 }
 0xad3   :  { %v1569_v17 = vpop.f32.mrf.mxu2 }
 0xad4   :  { %v1572_v29 = vpack.c.bf16 %v1569_v17, %v1566_v60  ;;  %v5051_v60 = vld [vmem:[%s7386_s7 + $0xb8] sm:$0xff]  ;;  %v5058_v17 = vld [vmem:[%s7386_s7 + $0xf0] sm:$0xff] }
 0xad5   :  { %2032 = vmatpush.bf16.msra.mxu0 %v5051_v60  ;;  %2047 = vmatpush.bf16.msrb.mxu1 %v5058_v17 }
 0xad6   :  { %4383 = vmatmul.msk.bf16.vlgmr.msra.gmra.mxu3 %vm205_vm8, %v1572_v29  ;;  %v5361_v29 = vld [vmem:[%s7381_s2 + $0x78] sm:$0xff] }
 0xad7   :  { %1887 = vmatpush.bf16.msra.mxu3 %v4445_v35  ;;  %v5372_v35 = vld [vmem:[%s7381_s2 + $0x20] sm:$0xff] }
 0xad9   :  { %2033 = vmatpush.bf16.msra.mxu0 %v5050_v5 }
 0xadb   :  { %1888 = vmatpush.bf16.msra.mxu3 %v4437_v19 }
 0xadf   :  { %v1738_v22 = vpop.f32.mrf.mxu0  ;;  %1889 = vmatpush.bf16.msra.mxu3 %v4429_v51  ;;  %v5053_v51 = vld [vmem:[%s7386_s7 + $0xc8] sm:$0xff] }
 0xae3   :  { %1890 = vmatpush.bf16.msra.mxu3 %v4421_v14  ;;  %v1823_v14 = vperm.slane %v4413_v27, 1 }
 0xae5   :  { %v1683_v0 = vpop.f32.mrf.mxu2 }
 0xae7   :  { %v1741_v8 = vpop.f32.mrf.mxu0 }
 0xae8   :  { %v1744_v25 = vpack.c.bf16 %v1741_v8, %v1738_v22 }
 0xaea   :  { %4404 = vmatmul.msk.bf16.vlgmr.msra.gmra.mxu1 %vm205_vm8, %v1744_v25 }
 0xaed   :  { %v1686_v28 = vpop.f32.mrf.mxu2 }
 0xaee   :  { %v1689_v23 = vpack.c.bf16 %v1686_v28, %v1683_v0  ;;  %v5362_v0 = vld [vmem:[%s7381_s2 + $0x70] sm:$0xff]  ;;  %v5049_v28 = vld [vmem:[%s7386_s7 + $0xa8] sm:$0xff] }
 0xaef   :  { %2034 = vmatpush.bf16.msra.mxu0 %v5049_v28 }
 0xaf0   :  { %4397 = vmatmul.msk.bf16.vlgmr.msrb.gmra.mxu3 %vm205_vm8, %v1689_v23 }
 0xaf1   :  { %2157 = vmatpush.msrb.mxu3 %v5361_v29 }
 0xaf3   :  { %2158 = vmatpush.msrb.mxu3 %v5362_v0 }
 0xb4d   :  { %v1647_v32 = vpop.f32.mrf.mxu1 }
 0xb55   :  { %v1649_v57 = vpop.f32.mrf.mxu1 }
 0xb59   :  { %v1591_v30 = vpop.f32.mrf.mxu3 }
 0xb5a   :  { %v1597_v39 = vadd.f32 %v1596_v34, %v1591_v30  ;;  %v5363_v30 = vld [vmem:[%s7381_s2 + $0x68] sm:$0xff] }
 0xb5b   :  { %2159 = vmatpush.msrb.mxu3 %v5363_v30 }
 0xb5c   :  { %v1652_v44 = vadd.f32 %v1647_v32, %v1597_v39  ;;  %v5057_v32 = vld [vmem:[%s7386_s7 + $0xe8] sm:$0xff] }
 0xb5d   :  { %2048 = vmatpush.bf16.msrb.mxu1 %v5057_v32 }
 0xb61   :  { %v1593_v2 = vpop.f32.mrf.mxu3 }
 0xb62   :  { %v1598_v13 = vadd.f32 %v1596_v34, %v1593_v2  ;;  %v5048_v2 = vld [vmem:[%s7386_s7 + $0xa0] sm:$0xff] }
 0xb63   :  { %2035 = vmatpush.bf16.msra.mxu0 %v5048_v2 }
 0xb64   :  { %v1653_v59 = vadd.f32 %v1649_v57, %v1598_v13  ;;  %v5364_v57 = vld [vmem:[%s7381_s2 + $0x60] sm:$0xff] }
 0xb65   :  { %2160 = vmatpush.msrb.mxu3 %v5364_v57  ;;  %v2062_v57 = vperm.slane %v6107_v37, 3 }
 0xb67   :  { %v1763_v47 = vpop.f32.mrf.mxu1  ;;  %2036 = vmatpush.bf16.msra.mxu0 %v5047_v50 }
 0xb6f   :  { %v1765_v38 = vpop.f32.mrf.mxu1 }
 0xb73   :  { %v1708_v48 = vpop.f32.mrf.mxu3 }
 0xb74   :  { %v1713_v52 = vadd.f32 %v1708_v48, %v1652_v44  ;;  %v5056_v44 = vld [vmem:[%s7386_s7 + $0xe0] sm:$0xff] }
 0xb75   :  { %2049 = vmatpush.bf16.msrb.mxu1 %v5056_v44 }
 0xb76   :  { %v1768_v40 = vadd.f32 %v1763_v47, %v1713_v52  ;;  %v5365_v47 = vld [vmem:[%s7381_s2 + $0x58] sm:$0xff]  ;;  %v5366_v52 = vld [vmem:[%s7381_s2 + $0x50] sm:$0xff] }
 0xb77   :  { %2161 = vmatpush.msrb.mxu3 %v5365_v47 }
 0xb78   :  { %v6369_v55 = vadd.f32 %v1768_v40, %v6079_v45 }
 0xb79   :  { %2162 = vmatpush.msrb.mxu3 %v5366_v52 }
 0xb7a   :  { %v1772_v63 = vmul.f32 %v6369_v55, %v6369_v55 }
 0xb7b   :  { %v1710_v9 = vpop.f32.mrf.mxu3 }
 0xb7c   :  { %v1714_v11 = vadd.f32 %v1710_v9, %v1653_v59  ;;  %v1774_v61 = vsel %vm77_vm0, %v1772_v63, 0.0  ;;  %v5367_v59 = vld [vmem:[%s7381_s2 + $0x48] sm:$0xff] }
 0xb7d   :  { %1775 = vadd.xlane.f32.xlu0 %v1774_v61  ;;  %2163 = vmatpush.msrb.mxu3 %v5367_v59 }
 0xb7e   :  { %v1769_v4 = vadd.f32 %v1765_v38, %v1714_v11  ;;  %v5368_v11 = vld [vmem:[%s7381_s2 + $0x40] sm:$0xff]  ;;  %v5369_v38 = vld [vmem:[%s7381_s2 + $0x38] sm:$0xff] }
 0xb7f   :  { %2164 = vmatpush.msrb.mxu3 %v5368_v11 }
 0xb80   :  { %v6375_v10 = vadd.f32 %v1769_v4, %v6085_v54  ;;  %v4441_v54 = vor.u32 %v5043_v18, %v4440_v24  ;;  %v5371_v18 = vld [vmem:[%s7381_s2 + $0x28] sm:$0xff] }
 0xb81   :  { %2165 = vmatpush.msrb.mxu3 %v5369_v38  ;;  %v5060_v38 = vld [vmem:[%s7383_s4 + $0x40] sm:$0xff] }
 0xb82   :  { %v1773_v12 = vmul.f32 %v6375_v10, %v6375_v10  ;;  %1873 = vmatpush.bf16.msra.mxu2 %v4441_v54 }
 0xb84   :  { %v1777_v45 = vsel %vm77_vm0, %v1773_v12, 0.0 }
 0xb85   :  { %1778 = vadd.xlane.f32.xlu2 %v1777_v45  ;;  %v5370_v45 = vld [vmem:[%s7381_s2 + $0x30] sm:$0xff] }
 0xb86   :  { %1874 = vmatpush.bf16.msra.mxu2 %v4433_v46  ;;  %2166 = vmatpush.msrb.mxu3 %v5370_v45 }
 0xb88   :  { %2167 = vmatpush.msrb.mxu3 %v5371_v18 }
 0xb8a   :  { %1875 = vmatpush.bf16.msra.mxu2 %v4425_v58  ;;  %2168 = vmatpush.msrb.mxu3 %v5372_v35  ;;  %v5046_v58 = vld [vmem:[%s7386_s7 + $0x90] sm:$0xff] }
 0xb8b   :  { %2037 = vmatpush.bf16.msra.mxu0 %v5046_v58 }
 0xb8c   :  { %2169 = vmatpush.msrb.mxu3 %v5373_v31 }
 0xb8e   :  { %1876 = vmatpush.bf16.msra.mxu2 %v4417_v6  ;;  %2170 = vmatpush.msrb.mxu3 %v5374_v41 }
 0xb90   :  { %2171 = vmatpush.msrb.mxu3 %v5375_v49 }
 0xb92   :  { %2172 = vmatpush.msrb.mxu3 %v5376_v36 }
 0xbf0   :  { %v1776_v53 = vpop.xlane.xlu0 %1775 }
 0xbf1   :  { %v1780_v3 = vmul.f32 %v1776_v53, %v5544_v15  ;;  %v5055_v53 = vld [vmem:[%s7386_s7 + $0xd8] sm:$0xff] }
 0xbf2   :  { %2050 = vmatpush.bf16.msrb.mxu1 %v5055_v53 }
 0xbf3   :  { %v1782_v1 = vadd.f32 1e-06, %v1780_v3  ;;  %v5045_v3 = vld [vmem:[%s7386_s7 + $0x88] sm:$0xff] }
 0xbf4   :  { %2038 = vmatpush.bf16.msra.mxu0 %v5045_v3 }
 0xbf5   :  { %5260 = vrsqrt.f32 %v1782_v1  ;;  %vm1790_vm1 = vweird.f32 %v1782_v1 }
 0xbf6   :  { %2051 = vmatpush.bf16.msrb.mxu1 %v5054_v56 }
 0xbf8   :  { %v1779_v21 = vpop.xlane.xlu2 %1778  ;;  %2039 = vmatpush.bf16.msra.mxu0 %v5044_v16 }
 0xbf9   :  { %v1781_v22 = vmul.f32 %v1779_v21, %v5544_v15 }
 0xbfa   :  { %2052 = vmatpush.bf16.msrb.mxu1 %v5053_v51 }
 0xbfb   :  { %v5261_v8 = vpop.eup %5260  ;;  %v1783_v25 = vadd.f32 1e-06, %v1781_v22 }
 0xbfc   :  { %v1785_v23 = vmul.f32 %v5261_v8, %v1782_v1  ;;  %vm1791_vm15 = vweird.f32 %v5261_v8  ;;  %v1822_v1 = vperm.slane %v4413_v27, 0 }
 0xbfd   :  { %5262 = vrsqrt.f32 %v1783_v25  ;;  %vm1792_vm2 = vmor %vm1790_vm1, %vm1791_vm15  ;;  %vm1800_vm4 = vweird.f32 %v1783_v25 }
 0xbfe   :  { %v1786_v34 = vmul.f32 %v5261_v8, %v1785_v23  ;;  %2053 = vmatpush.bf16.msrb.mxu1 %v5052_v20 }
 0xc00   :  { %v1787_v39 = vmul.f32 0.5, %v1786_v34 }
 0xc02   :  { %v1788_v48 = vsub.f32 1.5, %v1787_v39 }
 0xc03   :  { %v5263_v13 = vpop.eup %5262 }
 0xc04   :  { %v1795_v40 = vmul.f32 %v5263_v13, %v1783_v25  ;;  %v1789_v63 = vmul.f32 %v5261_v8, %v1788_v48  ;;  %vm1801_vm3 = vweird.f32 %v5263_v13 }
 0xc05   :  { %vm1802_vm5 = vmor %vm1800_vm4, %vm1801_vm3 }
 0xc06   :  { %v1796_v9 = vmul.f32 %v5263_v13, %v1795_v40  ;;  %v1793_v4 = vsel %vm1792_vm2, %v5261_v8, %v1789_v63  ;;  %v5063_v63 = vld [vmem:[%s7383_s4 + $0x58] sm:$0xff] }
 0xc07   :  { %v1804_v54 = vmul.f32 %v1793_v4, %v6369_v55  ;;  %2145 = vmatpush.bf16.msrb.mxu2 %v5063_v63 }
 0xc08   :  { %v1797_v61 = vmul.f32 0.5, %v1796_v9  ;;  %v5062_v9 = vld [vmem:[%s7383_s4 + $0x50] sm:$0xff] }
 0xc09   :  { %v1807_v43 = vmul.f32 %v1806_v26, %v1804_v54 }
 0xc0a   :  { %v1798_v12 = vsub.f32 1.5, %v1797_v61 }
 0xc0b   :  { %2146 = vmatpush.bf16.msrb.mxu2 %v5062_v9 }
 0xc0c   :  { %v1799_v24 = vmul.f32 %v5263_v13, %v1798_v12 }
 0xc0e   :  { %v1803_v33 = vsel %vm1802_vm5, %v5263_v13, %v1799_v24 }
 0xc0f   :  { %v1805_v42 = vmul.f32 %v1803_v33, %v6375_v10 }
 0xc11   :  { %v1808_v46 = vmul.f32 %v1806_v26, %v1805_v42 }
 0xc13   :  { %v1818_v19 = vpack.c.bf16 %v1808_v46, %v1807_v43 }
 0xc15   :  { %4446 = vmatmul.msk.bf16.vlgmr.msra.gmra.mxu2 %vm77_vm0, %v1818_v19  ;;  %4447 = vmatmul.msk.bf16.vlgmr.msra.gmra.mxu3 %vm77_vm0, %v1818_v19  ;;  %v6564_v19 = vld [vmem:[%s7387_s8 + $0x10] sm:$0xff] }
 0xc16   :  { %v2101_v53 = vperm.slane %v6564_v19, 0 }
 0xc98   :  { %v1878_v6 = vpop.f32.mrf.mxu2  ;;  %v1892_v62 = vpop.f32.mrf.mxu3 }
 0xc99   :  { %v1879_v60 = vadd.f32 %v1878_v6, %v1822_v1  ;;  %v1893_v7 = vadd.f32 %v1892_v62, %v1823_v14 }
 0xc9b   :  { %v1897_v22 = vmax.f32 %v1879_v60, 0.0  ;;  %v1898_v0 = vmax.f32 %v1893_v7, 0.0  ;;  %v5378_v60 = vld [vmem:[%s7380_s1 + $0x10] sm:$0xff] }
 0xca0   :  { %v1880_v5 = vpop.f32.mrf.mxu2  ;;  %v1894_v21 = vpop.f32.mrf.mxu3 }
 0xca1   :  { %v1881_v17 = vadd.f32 %v1880_v5, %v1822_v1  ;;  %v1895_v29 = vadd.f32 %v1894_v21, %v1823_v14  ;;  %v5377_v1 = vld [vmem:[%s7380_s1] sm:$0xff] }
 0xca3   :  { %v1899_v8 = vmax.f32 %v1881_v17, 0.0  ;;  %v1900_v25 = vmax.f32 %v1895_v29, 0.0  ;;  %v5379_v17 = vld [vmem:[%s7380_s1 + $0x8] sm:$0xff] }
 0xca5   :  { %v1934_v28 = vpack.c.bf16 %v1899_v8, %v1897_v22  ;;  %v1935_v23 = vpack.c.bf16 %v1900_v25, %v1898_v0  ;;  %v5380_v22 = vld [vmem:[%s7380_s1 + $0x18] sm:$0xff] }
 0xca7   :  { %2040 = vmatmul.bf16.vlgmr.msra.gmra.mxu0 %v1934_v28  ;;  %2054 = vmatmul.bf16.vlgmr.msrb.gmra.mxu1 %v1935_v23 }
 0xd24   :  { %v2041_v32 = vpop.f32.mrf.mxu0  ;;  %v2055_v30 = vpop.f32.mrf.mxu1 }
 0xd25   :  { %v2056_v34 = vadd.f32 %v2055_v30, %v2041_v32 }
 0xd27   :  { %v2060_v2 = vadd.f32 %v2056_v34, %v6369_v55 }
 0xd29   :  { %v6536_v39 = vadd.f32 %v2062_v57, %v2060_v2 }
 0xd2b   :  { %v2067_v44 = vmul.f32 %v6536_v39, %v6536_v39 }
 0xd2c   :  { %v2043_v47 = vpop.f32.mrf.mxu0  ;;  %v2057_v48 = vpop.f32.mrf.mxu1 }
 0xd2d   :  { %v2058_v52 = vadd.f32 %v2057_v48, %v2043_v47  ;;  %v2069_v13 = vsel %vm77_vm0, %v2067_v44, 0.0 }
 0xd2e   :  { %2070 = vadd.xlane.f32.xlu2 %v2069_v13 }
 0xd2f   :  { %v2061_v40 = vadd.f32 %v2058_v52, %v6375_v10  ;;  %v5061_v10 = vld [vmem:[%s7383_s4 + $0x48] sm:$0xff]  ;;  %v5381_v52 = vld [vmem:[%s7382_s3 + $0x10] sm:$0xff] }
 0xd30   :  { %2147 = vmatpush.bf16.msrb.mxu2 %v5061_v10  ;;  %v5383_v10 = vld [vmem:[%s7382_s3 + $0x18] sm:$0xff] }
 0xd31   :  { %v6542_v59 = vadd.f32 %v2062_v57, %v2061_v40 }
 0xd33   :  { %v2068_v37 = vmul.f32 %v6542_v59, %v6542_v59 }
 0xd34   :  { %2148 = vmatpush.bf16.msrb.mxu2 %v5060_v38 }
 0xd35   :  { %v2072_v55 = vsel %vm77_vm0, %v2068_v37, 0.0 }
 0xd36   :  { %2073 = vadd.xlane.f32.xlu1 %v2072_v55  ;;  %v5382_v55 = vld [vmem:[%s7382_s3] sm:$0xff] }
 0xda1   :  { %v2071_v11 = vpop.xlane.xlu2 %2070 }
 0xda2   :  { %v2075_v61 = vmul.f32 %v2071_v11, %v5544_v15 }
 0xda4   :  { %v2077_v4 = vadd.f32 1e-06, %v2075_v61 }
 0xda6   :  { %5264 = vrsqrt.f32 %v2077_v4  ;;  %vm2085_vm7 = vweird.f32 %v2077_v4 }
 0xda9   :  { %v2074_v12 = vpop.xlane.xlu1 %2073 }
 0xdaa   :  { %v2076_v45 = vmul.f32 %v2074_v12, %v5544_v15  ;;  %v5384_v12 = vld [vmem:[%s7382_s3 + $0x20] sm:$0xff] }
 0xdac   :  { %v5265_v24 = vpop.eup %5264  ;;  %v2078_v18 = vadd.f32 1e-06, %v2076_v45 }
 0xdad   :  { %v2080_v26 = vmul.f32 %v5265_v24, %v2077_v4  ;;  %vm2086_vm6 = vweird.f32 %v5265_v24 }
 0xdae   :  { %5266 = vrsqrt.f32 %v2078_v18  ;;  %vm2087_vm9 = vmor %vm2085_vm7, %vm2086_vm6  ;;  %vm2095_vm11 = vweird.f32 %v2078_v18 }
 0xdaf   :  { %v2081_v54 = vmul.f32 %v5265_v24, %v2080_v26 }
 0xdb1   :  { %v2082_v33 = vmul.f32 0.5, %v2081_v54 }
 0xdb3   :  { %v2083_v35 = vsub.f32 1.5, %v2082_v33 }
 0xdb4   :  { %v5267_v42 = vpop.eup %5266 }
 0xdb5   :  { %v2090_v31 = vmul.f32 %v5267_v42, %v2078_v18  ;;  %v2084_v43 = vmul.f32 %v5265_v24, %v2083_v35  ;;  %vm2096_vm10 = vweird.f32 %v5267_v42 }
 0xdb6   :  { %vm2097_vm12 = vmor %vm2095_vm11, %vm2096_vm10 }
 0xdb7   :  { %v2091_v46 = vmul.f32 %v5267_v42, %v2090_v31  ;;  %v2088_v49 = vsel %vm2087_vm9, %v5265_v24, %v2084_v43  ;;  %v5385_v24 = vld [vmem:[%s7382_s3 + $0x8] sm:$0xff] }
 0xdb8   :  { %v2099_v58 = vmul.f32 %v2088_v49, %v6536_v39  ;;  %v5386_v31 = vld [vmem:[%s7382_s3 + $0x28] sm:$0xff] }
 0xdb9   :  { %v2092_v41 = vmul.f32 0.5, %v2091_v46  ;;  %v5387_v46 = vld [vmem:[%s7382_s3 + $0x30] sm:$0xff] }
 0xdba   :  { %v2102_v51 = vmul.f32 %v2101_v53, %v2099_v58 }
 0xdbb   :  { %v2093_v36 = vsub.f32 1.5, %v2092_v41 }
 0xdbd   :  { %v2094_v50 = vmul.f32 %v5267_v42, %v2093_v36 }
 0xdbf   :  { %v2098_v56 = vsel %vm2097_vm12, %v5267_v42, %v2094_v50 }
 0xdc0   :  { %v2100_v3 = vmul.f32 %v2098_v56, %v6542_v59 }
 0xdc2   :  { %v2103_v16 = vmul.f32 %v2101_v53, %v2100_v3  ;;  %v5388_v53 = vld [vmem:[%s7382_s3 + $0x38] sm:$0xff] }
 0xdc4   :  { %v2113_v20 = vpack.c.bf16 %v2103_v16, %v2102_v51 }
 0xdc6   :  { %4569 = vmatmul.msk.bf16.vlgmr.msrb.gmra.mxu2 %vm77_vm0, %v2113_v20 }
 0xe49   :  { %v2150_v27 = vpop.f32.mrf.mxu2 }
 0xe4a   :  { %2173 = vmatmul.f32.vlgmr.msrb.gmra.mxu3 %v2150_v27  ;;  %v2155_v14 = vmul.f32 %v5377_v1, %v2150_v27 }
 0xe51   :  { %v2152_v6 = vpop.f32.mrf.mxu2 }
 0xe52   :  { %2176 = vmatmul.f32.gmra.mxu3 %v2152_v6  ;;  %v2156_v29 = vmul.f32 %v5379_v17, %v2152_v6 }
 0xecd   :  { %v2174_v62 = vpop.f32.mrf.mxu3 }
 0xece   :  { %v2180_v7 = vmul.f32 %v5378_v60, %v2174_v62 }
 0xed0   :  { %v6576_v5 = vadd.f32 %v2180_v7, %v2155_v14 }
 0xed2   :  { %2256 = vrot.lane.b32.xlu1 %v6576_v5, %s5445_s19  ;;  %2186 = vrot.lane.b32.xlu0 %v6576_v5, %s5446_s20 }
 0xed5   :  { %v2177_v21 = vpop.f32.mrf.mxu3 }
 0xed6   :  { %v2181_v0 = vmul.f32 %v5380_v22, %v2177_v21 }
 0xed8   :  { %v6588_v8 = vadd.f32 %v2181_v0, %v2156_v29 }
 0xeda   :  { %2291 = vrot.lane.b32.xlu0 %v6576_v5, %s5448_s22  ;;  %2188 = vrot.lane.b32.xlu2 %v6588_v8, %s5446_s20 }
 0xee2   :  { %2293 = vrot.lane.b32.xlu0 %v6588_v8, %s5448_s22  ;;  %2221 = vrot.lane.b32.xlu2 %v6576_v5, %s5444_s14 }
 0xeea   :  { %2258 = vrot.lane.b32.xlu2 %v6588_v8, %s5445_s19 }
 0xef2   :  { %2223 = vrot.lane.b32.xlu2 %v6588_v8, %s5444_s14 }
 0xefa   :  { %2252 = vrot.lane.b32.xlu2 %v6576_v5, %s5447_s21 }
 0xf02   :  { %2254 = vrot.lane.b32.xlu2 %v6588_v8, %s5447_s21 }
 0xf34   :  { %v2189_v25 = vpop.permute.xlu2 %2188 }
 0xf35   :  { %4570 = vmatpush.xpose.msk.msra.mxu2 %vm205_vm8, %v2189_v25  ;;  %4574 = vmatpush.xpose.msk.msrb.mxu0 %vm205_vm8, %v2189_v25 }
 0xf3c   :  { %v2222_v28 = vpop.permute.xlu2 %2221 }
 0xf44   :  { %v2187_v23 = vpop.permute.xlu0 %2186  ;;  %v2259_v32 = vpop.permute.xlu2 %2258 }
 0xf45   :  { %4571 = vmatpush.xpose.msk.msra.mxu2 %vm205_vm8, %v2187_v23  ;;  %4575 = vmatpush.xpose.msk.msrb.mxu0 %vm205_vm8, %v2187_v23  ;;  %v2257_v30 = vpop.permute.xlu1 %2256 }
 0xf46   :  { %4578 = vmatpush.xpose.msk.msra.mxu1 %vm205_vm8, %v2259_v32 }
 0xf48   :  { %4572 = vmatmul.msk.f32.vlgmr.msra.gmra.mxu2 %vm205_vm8, %v6576_v5  ;;  %4576 = vmatmul.msk.f32.vlgmr.msrb.gmra.mxu0 %vm205_vm8, %v2222_v28 }
 0xf49   :  { %4582 = vmatpush.xpose.msk.msrb.mxu2 %vm205_vm8, %v2259_v32 }
 0xf4a   :  { %4579 = vmatpush.xpose.msk.msra.mxu1 %vm205_vm8, %v2257_v30 }
 0xf4c   :  { %v2224_v34 = vpop.permute.xlu2 %2223  ;;  %v2292_v57 = vpop.permute.xlu0 %2291 }
 0xf4d   :  { %4583 = vmatpush.xpose.msk.msrb.mxu2 %vm205_vm8, %v2257_v30 }
 0xf50   :  { %4573 = vmatmul.msk.f32.gmra.mxu2 %vm205_vm8, %v6588_v8  ;;  %4577 = vmatmul.msk.f32.gmra.mxu0 %vm205_vm8, %v2224_v34 }
 0xf54   :  { %v2253_v2 = vpop.permute.xlu2 %2252  ;;  %v2294_v47 = vpop.permute.xlu0 %2293 }
 0xf55   :  { %4580 = vmatmul.msk.f32.vlgmr.msra.gmra.mxu1 %vm205_vm8, %v2253_v2 }
 0xf58   :  { %4584 = vmatmul.msk.f32.vlgmr.msrb.gmra.mxu2 %vm205_vm8, %v2292_v57 }
 0xf5c   :  { %v2255_v44 = vpop.permute.xlu2 %2254 }
 0xf5d   :  { %4581 = vmatmul.msk.f32.gmra.mxu1 %vm205_vm8, %v2255_v44 }
 0xf60   :  { %4585 = vmatmul.msk.f32.gmra.mxu2 %vm205_vm8, %v2294_v47 }
 0xfc5   :  { %v2246_v48 = vpop.f32.mrf.mxu0 }
 0xfc6   :  { %v2324_v13 = vadd.f32 %v5381_v52, %v2246_v48 }
 0xfc8   :  { %v2336_v40 = vsel %vm205_vm8, %v2324_v13, -inf }
 0xfc9   :  { %2337 = vmax.xlane.f32.xlu1 %v2336_v40 }
 0xfcb   :  { %v2215_v37 = vpop.f32.mrf.mxu2 }
 0xfcc   :  { %v2322_v63 = vadd.f32 %v5382_v55, %v2215_v37 }
 0xfcd   :  { %v2249_v11 = vpop.f32.mrf.mxu0 }
 0xfce   :  { %v2330_v9 = vsel %vm205_vm8, %v2322_v63, -inf  ;;  %v2325_v61 = vadd.f32 %v5383_v10, %v2249_v11 }
 0xfcf   :  { %2331 = vmax.xlane.f32.xlu0 %v2330_v9 }
 0xfd0   :  { %v2339_v33 = vsel %vm205_vm8, %v2325_v61, -inf }
 0xfd2   :  { %v2285_v38 = vpop.f32.mrf.mxu1 }
 0xfd3   :  { %v2218_v4 = vpop.f32.mrf.mxu2  ;;  %v2326_v45 = vadd.f32 %v5384_v12, %v2285_v38 }
 0xfd4   :  { %v2323_v18 = vadd.f32 %v5385_v24, %v2218_v4 }
 0xfd5   :  { %v2342_v26 = vsel %vm205_vm8, %v2326_v45, -inf }
 0xfd6   :  { %v2333_v54 = vsel %vm205_vm8, %v2323_v18, -inf  ;;  %2343 = vmax.xlane.f32.xlu1 %v2342_v26 }
 0xfd7   :  { %2334 = vmax.xlane.f32.xlu2 %v2333_v54  ;;  %2340 = vmax.xlane.f32.xlu0 %v2339_v33 }
 0xfda   :  { %v2288_v35 = vpop.f32.mrf.mxu1 }
 0xfdb   :  { %v2316_v42 = vpop.f32.mrf.mxu2  ;;  %v2327_v43 = vadd.f32 %v5386_v31, %v2288_v35 }
 0xfdc   :  { %v2328_v41 = vadd.f32 %v5387_v46, %v2316_v42 }
 0xfdd   :  { %v2345_v36 = vsel %vm205_vm8, %v2327_v43, -inf }
 0xfde   :  { %v2348_v49 = vsel %vm205_vm8, %v2328_v41, -inf }
 0xfdf   :  { %2349 = vmax.xlane.f32.xlu2 %v2348_v49  ;;  %2346 = vmax.xlane.f32.xlu0 %v2345_v36 }
 0xfe3   :  { %v2319_v50 = vpop.f32.mrf.mxu2 }
 0xfe4   :  { %v2329_v58 = vadd.f32 %v5388_v53, %v2319_v50 }
 0xfe6   :  { %v2351_v56 = vsel %vm205_vm8, %v2329_v58, -inf }
 0xfe7   :  { %2352 = vmax.xlane.f32.xlu1 %v2351_v56 }
0x103c   :  { %v2338_v3 = vpop.xlane.xlu1 %2337 }
0x103d   :  { %v2356_v51 = vsub.f32 %v2324_v13, %v2338_v3 }
0x103f   :  { %v2366_v16 = vmul.f32 1.442695, %v2356_v51 }
0x1041   :  { %5268 = vpow2.f32 %v2366_v16 }
0x1042   :  { %v2332_v20 = vpop.xlane.xlu0 %2331 }
0x1043   :  { %v2354_v27 = vsub.f32 %v2322_v63, %v2332_v20 }
0x1045   :  { %v2362_v6 = vmul.f32 1.442695, %v2354_v27 }
0x1047   :  { %v6656_v62 = vpop.eup %5268  ;;  %5270 = vpow2.f32 %v2362_v6 }
0x1048   :  { %v2384_v1 = vsel %vm205_vm8, %v6656_v62, 0.0 }
0x1049   :  { %2385 = vadd.xlane.f32.xlu0 %v2384_v1  ;;  %v2344_v14 = vpop.xlane.xlu1 %2343 }
0x104a   :  { %v2335_v60 = vpop.xlane.xlu2 %2334  ;;  %v2358_v7 = vsub.f32 %v2326_v45, %v2344_v14  ;;  %v2341_v21 = vpop.xlane.xlu0 %2340  ;;  %v5161_v45 = vpack.i.bf16 %v6576_v5, %v6588_v8 }
0x104b   :  { %v2355_v17 = vsub.f32 %v2323_v18, %v2335_v60  ;;  %v2357_v29 = vsub.f32 %v2325_v61, %v2341_v21 }
0x104c   :  { %v2370_v0 = vmul.f32 1.442695, %v2358_v7 }
0x104d   :  { %v6660_v22 = vpop.eup %5270  ;;  %v2364_v25 = vmul.f32 1.442695, %v2355_v17  ;;  %v2368_v28 = vmul.f32 1.442695, %v2357_v29 }
0x104e   :  { %v2378_v23 = vsel %vm205_vm8, %v6660_v22, 0.0  ;;  %5272 = vpow2.f32 %v2370_v0 }
0x104f   :  { %2379 = vadd.xlane.f32.xlu2 %v2378_v23  ;;  %5274 = vpow2.f32 %v2368_v28 }
0x1050   :  { %5276 = vpow2.f32 %v2364_v25 }
0x1052   :  { %v2350_v32 = vpop.xlane.xlu2 %2349  ;;  %v2347_v30 = vpop.xlane.xlu0 %2346 }
0x1053   :  { %v2360_v34 = vsub.f32 %v2328_v41, %v2350_v32  ;;  %v2359_v57 = vsub.f32 %v2327_v43, %v2347_v30 }
0x1054   :  { %v6664_v2 = vpop.eup %5272 }
0x1055   :  { %v2374_v44 = vmul.f32 1.442695, %v2360_v34  ;;  %v6666_v47 = vpop.eup %5274  ;;  %v2372_v48 = vmul.f32 1.442695, %v2359_v57  ;;  %v2390_v52 = vsel %vm205_vm8, %v6664_v2, 0.0 }
0x1056   :  { %v6670_v13 = vpop.eup %5276  ;;  %2391 = vadd.xlane.f32.xlu0 %v2390_v52  ;;  %v2387_v40 = vsel %vm205_vm8, %v6666_v47, 0.0 }
0x1057   :  { %5278 = vpow2.f32 %v2374_v44  ;;  %2388 = vadd.xlane.f32.xlu2 %v2387_v40  ;;  %v2381_v37 = vsel %vm205_vm8, %v6670_v13, 0.0 }
0x1058   :  { %5280 = vpow2.f32 %v2372_v48  ;;  %2382 = vadd.xlane.f32.xlu1 %v2381_v37 }
0x105a   :  { %v2353_v55 = vpop.xlane.xlu1 %2352 }
0x105b   :  { %v2361_v63 = vsub.f32 %v2329_v58, %v2353_v55 }
0x105d   :  { %v6676_v9 = vpop.eup %5278  ;;  %v2376_v11 = vmul.f32 1.442695, %v2361_v63 }
0x105e   :  { %v6678_v10 = vpop.eup %5280  ;;  %v2396_v61 = vsel %vm205_vm8, %v6676_v9, 0.0 }
0x105f   :  { %5282 = vpow2.f32 %v2376_v11  ;;  %v2393_v38 = vsel %vm205_vm8, %v6678_v10, 0.0  ;;  %2397 = vadd.xlane.f32.xlu2 %v2396_v61 }
0x1060   :  { %2394 = vadd.xlane.f32.xlu0 %v2393_v38 }
0x1065   :  { %v6684_v4 = vpop.eup %5282 }
0x1066   :  { %v2399_v12 = vsel %vm205_vm8, %v6684_v4, 0.0 }
0x1067   :  { %2400 = vadd.xlane.f32.xlu2 %v2399_v12 }
0x1071   :  { %5162 = vrot.lane.b32.xlu1 %v5161_v45, %s5449_s25 }
0x1074   :  { %5167 = vrot.lane.b32.xlu0 %v5161_v45, %s5450_s26 }
0x10bc   :  { %v2386_v18 = vpop.xlane.xlu0 %2385 }
0x10bd   :  { %5284 = vrcp.f32 %v2386_v18  ;;  %vm2435_vm15 = vweird.f32 %v2386_v18  ;;  %v2441_v27 = vand.u32 2147483648, %v2386_v18  ;;  %v2439_v21 = vand.u32 2147483647, %v2386_v18 }
0x10bf   :  { %v2442_v23 = vor.u32 1.1754944e-38, %v2441_v27  ;;  %vm2440_vm4 = vcmp.eq.f32.partialorder %v2439_v21, 8.507059e+37 }
0x10c2   :  { %v2380_v24 = vpop.xlane.xlu2 %2379 }
0x10c3   :  { %5286 = vrcp.f32 %v2380_v24  ;;  %v5285_v54 = vpop.eup %5284  ;;  %v2413_v6 = vand.u32 2147483648, %v2380_v24  ;;  %vm2407_vm2 = vweird.f32 %v2380_v24  ;;  %v2411_v17 = vand.u32 2147483647, %v2380_v24 }
0x10c4   :  { %v2431_v42 = vmul.f32 %v5285_v54, %v2386_v18  ;;  %vm2436_vm13 = vweird.f32 %v5285_v54 }
0x10c5   :  { %vm6720_vm1 = vmor %vm2435_vm15, %vm2436_vm13  ;;  %v2414_v32 = vor.u32 1.1754944e-38, %v2413_v6  ;;  %vm2412_vm5 = vcmp.eq.f32.partialorder %v2411_v17, 8.507059e+37 }
0x10c6   :  { %v2432_v8 = vsub.f32 1.0, %v2431_v42 }
0x10c8   :  { %v2433_v36 = vmul.f32 %v5285_v54, %v2432_v8 }
0x10c9   :  { %v5287_v33 = vpop.eup %5286  ;;  %v6698_v5 = vpop.xlane.xlu0 %2391 }
0x10ca   :  { %v6692_v26 = vpop.xlane.xlu2 %2388  ;;  %v2403_v31 = vmul.f32 %v5287_v33, %v2380_v24  ;;  %v2434_v56 = vadd.f32 %v5285_v54, %v2433_v36  ;;  %vm2408_vm14 = vweird.f32 %v5287_v33  ;;  %v2469_v7 = vand.u32 2147483648, %v6698_v5 }
0x10cb   :  { %v6694_v35 = vpop.xlane.xlu1 %2382  ;;  %5288 = vrcp.f32 %v6692_v26  ;;  %vm2409_vm3 = vmor %vm2407_vm2, %vm2408_vm14  ;;  %vm2449_vm6 = vweird.f32 %v6692_v26  ;;  %v2455_v45 = vand.u32 2147483648, %v6692_v26  ;;  %v2453_v8 = vand.u32 2147483647, %v6692_v26 }
0x10cc   :  { %5290 = vrcp.f32 %v6694_v35  ;;  %v2404_v46 = vsub.f32 1.0, %v2403_v31  ;;  %v2438_v29 = vsel %vm6720_vm1, %v5285_v54, %v2434_v56  ;;  %vm2421_vm9 = vweird.f32 %v6694_v35 }
0x10cd   :  { %5292 = vrcp.f32 %v6698_v5  ;;  %v2443_v57 = vsel %vm2440_vm4, %v2442_v23, %v2438_v29  ;;  %v2427_v12 = vand.u32 2147483648, %v6694_v35  ;;  %v2425_v42 = vand.u32 2147483647, %v6694_v35 }
0x10ce   :  { %v2405_v50 = vmul.f32 %v5287_v33, %v2404_v46  ;;  %vm2454_vm14 = vcmp.eq.f32.partialorder %v2453_v8, 8.507059e+37  ;;  %vm2463_vm2 = vweird.f32 %v6698_v5 }
0x10cf   :  { %vm2426_vm13 = vcmp.eq.f32.partialorder %v2425_v42, 8.507059e+37 }
0x10d0   :  { %v2406_v3 = vadd.f32 %v5287_v33, %v2405_v50 }
0x10d1   :  { %v6702_v41 = vpop.eup %5288 }
0x10d2   :  { %v6700_v43 = vpop.xlane.xlu2 %2397  ;;  %v6704_v49 = vpop.eup %5290  ;;  %v2445_v53 = vmul.f32 %v6702_v41, %v6692_v26  ;;  %v2410_v0 = vsel %vm2409_vm3, %v5287_v33, %v2406_v3  ;;  %vm2450_vm7 = vweird.f32 %v6702_v41  ;;  %v2516_v33 = vmul.f32 %v6656_v62, %v2443_v57 }
0x10d3   :  { %5294 = vrcp.f32 %v6700_v43  ;;  %v2417_v58 = vmul.f32 %v6704_v49, %v6694_v35  ;;  %v6712_v16 = vpop.xlane.xlu0 %2394  ;;  %v6714_v20 = vpop.eup %5292  ;;  %v2415_v44 = vsel %vm2412_vm5, %v2414_v32, %v2410_v0  ;;  %vm2422_vm10 = vweird.f32 %v6704_v49  ;;  %vm6754_vm11 = vmor %vm2449_vm6, %vm2450_vm7 }
0x10d4   :  { %v2446_v51 = vsub.f32 1.0, %v2445_v53  ;;  %5296 = vrcp.f32 %v6712_v16  ;;  %v2459_v25 = vmul.f32 %v6714_v20, %v6698_v5  ;;  %v2514_v54 = vmul.f32 %v6660_v22, %v2415_v44  ;;  %vm6766_vm12 = vmor %vm2421_vm9, %vm2422_vm10 }
0x10d5   :  { %v2418_v1 = vsub.f32 1.0, %v2417_v58  ;;  %v2428_v53 = vor.u32 1.1754944e-38, %v2427_v12  ;;  %v2456_v58 = vor.u32 1.1754944e-38, %v2455_v45  ;;  %vm2464_vm15 = vweird.f32 %v6714_v20 }
0x10d6   :  { %v2447_v28 = vmul.f32 %v6702_v41, %v2446_v51  ;;  %v2460_v52 = vsub.f32 1.0, %v2459_v25  ;;  %v2497_v21 = vand.u32 2147483648, %v6700_v43  ;;  %vm6789_vm3 = vmor %vm2463_vm2, %vm2464_vm15  ;;  %vm2491_vm4 = vweird.f32 %v6700_v43 }
0x10d7   :  { %v2419_v30 = vmul.f32 %v6704_v49, %v2418_v1  ;;  %v2467_v1 = vand.u32 2147483647, %v6698_v5  ;;  %v2495_v29 = vand.u32 2147483647, %v6700_v43  ;;  %v2481_v44 = vand.u32 2147483647, %v6712_v16 }
0x10d8   :  { %v2448_v37 = vadd.f32 %v6702_v41, %v2447_v28  ;;  %v2461_v46 = vmul.f32 %v6714_v20, %v2460_v52 }
0x10d9   :  { %v6718_v60 = vpop.eup %5294  ;;  %v2420_v61 = vadd.f32 %v6704_v49, %v2419_v30  ;;  %v2498_v30 = vor.u32 1.1754944e-38, %v2497_v21  ;;  %vm2468_vm6 = vcmp.eq.f32.partialorder %v2467_v1, 8.507059e+37  ;;  %vm2496_vm7 = vcmp.eq.f32.partialorder %v2495_v29, 8.507059e+37 }
0x10da   :  { %v6716_v14 = vpop.xlane.xlu2 %2400  ;;  %v2487_v34 = vmul.f32 %v6718_v60, %v6700_v43  ;;  %v6738_v55 = vpop.eup %5296  ;;  %v2452_v22 = vsel %vm6754_vm11, %v6702_v41, %v2448_v37  ;;  %v2462_v41 = vadd.f32 %v6714_v20, %v2461_v46  ;;  %vm2492_vm1 = vweird.f32 %v6718_v60 }
0x10db   :  { %5298 = vrcp.f32 %v6716_v14  ;;  %v2473_v36 = vmul.f32 %v6738_v55, %v6712_v16  ;;  %v2424_v35 = vsel %vm6766_vm12, %v6704_v49, %v2420_v61  ;;  %v2457_v51 = vsel %vm2454_vm14, %v2456_v58, %v2452_v22  ;;  %vm2493_vm5 = vmor %vm2491_vm4, %vm2492_vm1 }
0x10dc   :  { %v2488_v63 = vsub.f32 1.0, %v2487_v34  ;;  %v2429_v3 = vsel %vm2426_vm13, %v2428_v53, %v2424_v35  ;;  %v2517_v25 = vmul.f32 %v6666_v47, %v2457_v51  ;;  %v2466_v28 = vsel %vm6789_vm3, %v6714_v20, %v2462_v41 }
0x10dd   :  { %v2474_v27 = vsub.f32 1.0, %v2473_v36  ;;  %v2515_v0 = vmul.f32 %v6670_v13, %v2429_v3  ;;  %v2470_v43 = vor.u32 1.1754944e-38, %v2469_v7  ;;  %vm2478_vm9 = vweird.f32 %v6738_v55 }
0x10de   :  { %v2489_v26 = vmul.f32 %v6718_v60, %v2488_v63  ;;  %vm2477_vm11 = vweird.f32 %v6712_v16  ;;  %v2483_v34 = vand.u32 2147483648, %v6712_v16  ;;  %v2511_v57 = vand.u32 2147483648, %v6716_v14 }
0x10df   :  { %v2475_v5 = vmul.f32 %v6738_v55, %v2474_v27  ;;  %v2471_v47 = vsel %vm2468_vm6, %v2470_v43, %v2466_v28  ;;  %vm2505_vm12 = vweird.f32 %v6716_v14  ;;  %v2509_v52 = vand.u32 2147483647, %v6716_v14  ;;  %vm2479_vm13 = vmor %vm2477_vm11, %vm2478_vm9  ;;  %v5074_v43 = vld [vmem:[%s7385_s6 + $0xb4] sm:$0xf] }
0x10e0   :  { %v2490_v6 = vadd.f32 %v6718_v60, %v2489_v26  ;;  %v2512_v16 = vor.u32 1.1754944e-38, %v2511_v57  ;;  %vm2482_vm1 = vcmp.eq.f32.partialorder %v2481_v44, 8.507059e+37 }
0x10e1   :  { %v6743_v38 = vpop.eup %5298  ;;  %vm2510_vm15 = vcmp.eq.f32.partialorder %v2509_v52, 8.507059e+37 }
0x10e2   :  { %v2501_v50 = vmul.f32 %v6743_v38, %v6716_v14  ;;  %v2494_v23 = vsel %vm2493_vm5, %v6718_v60, %v2490_v6  ;;  %vm2506_vm10 = vweird.f32 %v6743_v38  ;;  %v2476_v60 = vadd.f32 %v6738_v55, %v2475_v5 }
0x10e3   :  { %v5163_v48 = vpop.permute.xlu1 %5162  ;;  %v2499_v13 = vsel %vm2496_vm7, %v2498_v30, %v2494_v23  ;;  %vm2507_vm14 = vmor %vm2505_vm12, %vm2506_vm10  ;;  %v4657_v23 = vld [vmem:[%s7385_s6 + $0xb0] sm:$0xf]  ;;  %v4659_v30 = vld [vmem:[%s7385_s6 + $0xb8] sm:$0xf0] }
0x10e4   :  { %v5164_v40 = vunpack.i.l.bf16 %v5163_v48  ;;  %v5165_v24 = vunpack.i.h.bf16 %v5163_v48  ;;  %v2502_v49 = vsub.f32 1.0, %v2501_v50  ;;  %v2520_v48 = vmul.f32 %v6676_v9, %v2499_v13 }
0x10e5   :  { %v2480_v37 = vsel %vm2479_vm13, %v6738_v55, %v2476_v60  ;;  %v5065_v55 = vld [vmem:[%s7384_s5 + $0x48] sm:$0xff]  ;;  %v2590_v50 = vperm.slane %v6564_v19, 2 }
0x10e6   :  { %v5168_v11 = vpop.permute.xlu0 %5167  ;;  %2557 = vmatpush.msra.mxu3 %v5164_v40  ;;  %2613 = vmatpush.msrb.mxu1 %v5164_v40  ;;  %v2503_v32 = vmul.f32 %v6743_v38, %v2502_v49  ;;  %v2518_v40 = vmul.f32 %v6664_v2, %v2471_v47  ;;  %v4662_v47 = vor.u32 %v5074_v43, %v4659_v30  ;;  %v5073_v60 = vld [vmem:[%s7385_s6 + $0xa4] sm:$0xf0] }
0x10e7   :  { %v5169_v18 = vunpack.i.l.bf16 %v5168_v11  ;;  %v5170_v56 = vunpack.i.h.bf16 %v5168_v11  ;;  %v2484_v11 = vor.u32 1.1754944e-38, %v2483_v34  ;;  %2639 = vmatpush.bf16.msra.mxu2 %v5065_v55  ;;  %v5072_v34 = vld [vmem:[%s7385_s6 + $0xa4] sm:$0xf] }
0x10e8   :  { %2558 = vmatpush.msra.mxu3 %v5165_v24  ;;  %2614 = vmatpush.msrb.mxu1 %v5165_v24  ;;  %v2504_v20 = vadd.f32 %v6743_v38, %v2503_v32  ;;  %v5075_v32 = vld [vmem:[%s7385_s6 + $0xb4] sm:$0xf0]  ;;  %v5068_v55 = vld [vmem:[%s7385_s6 + $0x84] sm:$0xf] }
0x10e9   :  { %4594 = vmatmul.msk.f32.vlgmr.msra.gmra.mxu3 %vm205_vm8, %v2514_v54  ;;  %4601 = vmatmul.msk.f32.vlgmr.msrb.gmra.mxu1 %vm205_vm8, %v2516_v33  ;;  %v2485_v9 = vsel %vm2482_vm1, %v2484_v11, %v2480_v37  ;;  %v4641_v37 = vld [vmem:[%s7385_s6 + $0x90] sm:$0xf] }
0x10ea   :  { %2674 = vmatpush.msrb.mxu3 %v5169_v18  ;;  %2729 = vmatpush.msra.mxu1 %v5169_v18  ;;  %v2508_v63 = vsel %vm2507_vm14, %v6743_v38, %v2504_v20  ;;  %v2519_v14 = vmul.f32 %v6678_v10, %v2485_v9  ;;  %v5064_v38 = vld [vmem:[%s7384_s5 + $0x40] sm:$0xff]  ;;  %v5067_v10 = vld [vmem:[%s7384_s5 + $0x58] sm:$0xff] }
0x10eb   :  { %v2513_v61 = vsel %vm2510_vm15, %v2512_v16, %v2508_v63  ;;  %2583 = vmatpush.bf16.msra.mxu0 %v5064_v38  ;;  %2755 = vmatpush.bf16.msrb.mxu2 %v5067_v10  ;;  %v4649_v20 = vld [vmem:[%s7385_s6 + $0xa0] sm:$0xf]  ;;  %v5071_v63 = vld [vmem:[%s7385_s6 + $0x94] sm:$0xf0]  ;;  %v5070_v16 = vld [vmem:[%s7385_s6 + $0x94] sm:$0xf] }
0x10ec   :  { %2675 = vmatpush.msrb.mxu3 %v5170_v56  ;;  %2730 = vmatpush.msra.mxu1 %v5170_v56  ;;  %v2521_v2 = vmul.f32 %v6684_v4, %v2513_v61  ;;  %v5066_v4 = vld [vmem:[%s7384_s5 + $0x50] sm:$0xff]  ;;  %v4650_v44 = vor.u32 %v5073_v60, %v4649_v20  ;;  %v4642_v11 = vor.u32 %v5071_v63, %v4641_v37  ;;  %v4643_v9 = vld [vmem:[%s7385_s6 + $0x98] sm:$0xf0]  ;;  %v4633_v61 = vld [vmem:[%s7385_s6 + $0x80] sm:$0xf] }
0x10ed   :  { %v4635_v38 = vld [vmem:[%s7385_s6 + $0x88] sm:$0xf0]  ;;  %v5091_v10 = vld [vmem:[%s7386_s7 + $0x178] sm:$0xff]  ;;  %v5400_v60 = vld [vmem:[%s7381_s2 + $0x20] sm:$0xff] }
0x10ee   :  { %v5086_v37 = vld [vmem:[%s7386_s7 + $0x150] sm:$0xff]  ;;  %v5079_v63 = vld [vmem:[%s7386_s7 + $0x118] sm:$0xff] }
0x10ef   :  { %2700 = vmatpush.bf16.msrb.mxu0 %v5066_v4  ;;  %v5083_v4 = vld [vmem:[%s7386_s7 + $0x138] sm:$0xff] }
0x10f0   :  { %3026 = vmatpush.bf16.msrb.mxu1 %v5083_v4 }
0x10f1   :  { %4595 = vmatmul.msk.f32.gmra.mxu3 %vm205_vm8, %v2515_v0  ;;  %4602 = vmatmul.msk.f32.gmra.mxu1 %vm205_vm8, %v2517_v25 }
0x10f9   :  { %4608 = vmatmul.msk.f32.vlgmr.msrb.gmra.mxu3 %vm205_vm8, %v2518_v40  ;;  %4615 = vmatmul.msk.f32.vlgmr.msra.gmra.mxu1 %vm205_vm8, %v2520_v48  ;;  %v4651_v48 = vld [vmem:[%s7385_s6 + $0xa8] sm:$0xf0] }
0x10fa   :  { %v4654_v52 = vor.u32 %v5072_v34, %v4651_v48  ;;  %v5401_v34 = vld [vmem:[%s7381_s2 + $0x18] sm:$0xff]  ;;  %v5404_v48 = vld [vmem:[%s7381_s2] sm:$0xff] }
0x1101   :  { %4609 = vmatmul.msk.f32.gmra.mxu3 %vm205_vm8, %v2519_v14  ;;  %4616 = vmatmul.msk.f32.gmra.mxu1 %vm205_vm8, %v2521_v2  ;;  %v4646_v14 = vor.u32 %v5070_v16, %v4643_v9  ;;  %v5069_v2 = vld [vmem:[%s7385_s6 + $0x84] sm:$0xf0]  ;;  %v5078_v16 = vld [vmem:[%s7386_s7 + $0x110] sm:$0xff]  ;;  %v5084_v9 = vld [vmem:[%s7386_s7 + $0x140] sm:$0xff] }
0x1166   :  { %v2616_v12 = vpop.f32.mrf.mxu1 }
0x116c   :  { %v2560_v45 = vpop.f32.mrf.mxu3 }
0x116e   :  { %v2619_v24 = vpop.f32.mrf.mxu1 }
0x116f   :  { %v2622_v18 = vpack.c.bf16 %v2619_v24, %v2616_v12  ;;  %v4634_v12 = vor.u32 %v5069_v2, %v4633_v61  ;;  %v4638_v24 = vor.u32 %v5068_v55, %v4635_v38  ;;  %v5077_v61 = vld [vmem:[%s7386_s7 + $0x108] sm:$0xff]  ;;  %v4630_v2 = vld [vmem:[%s7388_s9 + $0x4] sm:$0x3] }
0x1170   :  { %v2817_v38 = vperm.slane %v4630_v2, 1 }
0x1171   :  { %4607 = vmatmul.msk.bf16.vlgmr.msra.gmra.mxu2 %vm205_vm8, %v2622_v18  ;;  %v5090_v18 = vld [vmem:[%s7386_s7 + $0x170] sm:$0xff] }
0x1172   :  { %3040 = vmatpush.bf16.msra.mxu2 %v5091_v10 }
0x1174   :  { %v2563_v54 = vpop.f32.mrf.mxu3 }
0x1175   :  { %v2566_v33 = vpack.c.bf16 %v2563_v54, %v2560_v45 }
0x1176   :  { %v2732_v42 = vpop.f32.mrf.mxu1  ;;  %3041 = vmatpush.bf16.msra.mxu2 %v5090_v18 }
0x1177   :  { %4600 = vmatmul.msk.bf16.vlgmr.msra.gmra.mxu0 %vm205_vm8, %v2566_v33  ;;  %v5082_v33 = vld [vmem:[%s7386_s7 + $0x130] sm:$0xff] }
0x1178   :  { %2881 = vmatpush.bf16.msra.mxu0 %v4662_v47  ;;  %3027 = vmatpush.bf16.msrb.mxu1 %v5082_v33 }
0x117c   :  { %v2677_v31 = vpop.f32.mrf.mxu3  ;;  %2882 = vmatpush.bf16.msra.mxu0 %v4654_v52  ;;  %v5087_v52 = vld [vmem:[%s7386_s7 + $0x158] sm:$0xff] }
0x117e   :  { %v2735_v8 = vpop.f32.mrf.mxu1 }
0x117f   :  { %v2738_v46 = vpack.c.bf16 %v2735_v8, %v2732_v42 }
0x1180   :  { %2883 = vmatpush.bf16.msra.mxu0 %v4646_v14  ;;  %v5076_v14 = vld [vmem:[%s7386_s7 + $0x100] sm:$0xff] }
0x1181   :  { %4621 = vmatmul.msk.bf16.vlgmr.msrb.gmra.mxu2 %vm205_vm8, %v2738_v46  ;;  %v5089_v46 = vld [vmem:[%s7386_s7 + $0x168] sm:$0xff] }
0x1182   :  { %3042 = vmatpush.bf16.msra.mxu2 %v5089_v46 }
0x1184   :  { %v2680_v36 = vpop.f32.mrf.mxu3  ;;  %2884 = vmatpush.bf16.msra.mxu0 %v4638_v24 }
0x1185   :  { %v2683_v62 = vpack.c.bf16 %v2680_v36, %v2677_v31  ;;  %v5081_v36 = vld [vmem:[%s7386_s7 + $0x128] sm:$0xff] }
0x1186   :  { %3028 = vmatpush.bf16.msrb.mxu1 %v5081_v36 }
0x1187   :  { %4614 = vmatmul.msk.bf16.vlgmr.msrb.gmra.mxu0 %vm205_vm8, %v2683_v62  ;;  %v5389_v62 = vld [vmem:[%s7381_s2 + $0x78] sm:$0xff] }
0x1188   :  { %3151 = vmatpush.msrb.mxu0 %v5389_v62 }
0x11f4   :  { %v2585_v22 = vpop.f32.mrf.mxu0  ;;  %v2641_v26 = vpop.f32.mrf.mxu2 }
0x11f5   :  { %v2591_v58 = vadd.f32 %v2590_v50, %v2585_v22 }
0x11f7   :  { %v2646_v56 = vadd.f32 %v2641_v26, %v2591_v58  ;;  %v5390_v26 = vld [vmem:[%s7381_s2 + $0x70] sm:$0xff] }
0x11f8   :  { %3152 = vmatpush.msrb.mxu0 %v5390_v26 }
0x11fc   :  { %v2587_v35 = vpop.f32.mrf.mxu0  ;;  %v2643_v53 = vpop.f32.mrf.mxu2 }
0x11fd   :  { %v2592_v27 = vadd.f32 %v2590_v50, %v2587_v35  ;;  %v5088_v35 = vld [vmem:[%s7386_s7 + $0x160] sm:$0xff] }
0x11fe   :  { %3043 = vmatpush.bf16.msra.mxu2 %v5088_v35  ;;  %v3056_v35 = vperm.slane %v6564_v19, 3 }
0x11ff   :  { %v2647_v1 = vadd.f32 %v2643_v53, %v2592_v27  ;;  %v5391_v53 = vld [vmem:[%s7381_s2 + $0x68] sm:$0xff] }
0x1200   :  { %3153 = vmatpush.msrb.mxu0 %v5391_v53 }
0x1202   :  { %3044 = vmatpush.bf16.msra.mxu2 %v5087_v52 }
0x1204   :  { %v2702_v41 = vpop.f32.mrf.mxu0  ;;  %v2757_v3 = vpop.f32.mrf.mxu2 }
0x1205   :  { %v2707_v51 = vadd.f32 %v2702_v41, %v2646_v56  ;;  %v5392_v41 = vld [vmem:[%s7381_s2 + $0x60] sm:$0xff] }
0x1206   :  { %3154 = vmatpush.msrb.mxu0 %v5392_v41  ;;  %3045 = vmatpush.bf16.msra.mxu2 %v5086_v37 }
0x1207   :  { %v2762_v6 = vadd.f32 %v2757_v3, %v2707_v51  ;;  %v5393_v51 = vld [vmem:[%s7381_s2 + $0x58] sm:$0xff] }
0x1208   :  { %3155 = vmatpush.msrb.mxu0 %v5393_v51 }
0x1209   :  { %v6843_v49 = vadd.f32 %v2762_v6, %v6536_v39 }
0x120b   :  { %v2766_v7 = vmul.f32 %v6843_v49, %v6843_v49 }
0x120c   :  { %v2704_v21 = vpop.f32.mrf.mxu0  ;;  %v2759_v0 = vpop.f32.mrf.mxu2 }
0x120d   :  { %v2708_v17 = vadd.f32 %v2704_v21, %v2647_v1  ;;  %v2768_v29 = vsel %vm77_vm0, %v2766_v7, 0.0  ;;  %v5394_v1 = vld [vmem:[%s7381_s2 + $0x50] sm:$0xff]  ;;  %v5395_v21 = vld [vmem:[%s7381_s2 + $0x48] sm:$0xff] }
0x120e   :  { %2769 = vadd.xlane.f32.xlu2 %v2768_v29  ;;  %3156 = vmatpush.msrb.mxu0 %v5394_v1 }
0x120f   :  { %v2763_v25 = vadd.f32 %v2759_v0, %v2708_v17  ;;  %v5396_v0 = vld [vmem:[%s7381_s2 + $0x40] sm:$0xff] }
0x1210   :  { %3157 = vmatpush.msrb.mxu0 %v5395_v21 }
0x1211   :  { %v6849_v28 = vadd.f32 %v2763_v25, %v6542_v59  ;;  %v4658_v59 = vor.u32 %v5075_v32, %v4657_v23  ;;  %v5397_v23 = vld [vmem:[%s7381_s2 + $0x38] sm:$0xff] }
0x1212   :  { %3158 = vmatpush.msrb.mxu0 %v5396_v0  ;;  %v5093_v0 = vld [vmem:[%s7383_s4 + $0x68] sm:$0xff] }
0x1213   :  { %v2767_v5 = vmul.f32 %v6849_v28, %v6849_v28  ;;  %2867 = vmatpush.bf16.msra.mxu3 %v4658_v59  ;;  %v5398_v59 = vld [vmem:[%s7381_s2 + $0x30] sm:$0xff] }
0x1214   :  { %3159 = vmatpush.msrb.mxu0 %v5397_v23 }
0x1215   :  { %v2771_v39 = vsel %vm77_vm0, %v2767_v5, 0.0  ;;  %v2800_v5 = vperm.slane %v6564_v19, 1 }
0x1216   :  { %2772 = vadd.xlane.f32.xlu2 %v2771_v39  ;;  %3160 = vmatpush.msrb.mxu0 %v5398_v59 }
0x1217   :  { %2868 = vmatpush.bf16.msra.mxu3 %v4650_v44  ;;  %v5403_v44 = vld [vmem:[%s7381_s2 + $0x8] sm:$0xff] }
0x121b   :  { %2869 = vmatpush.bf16.msra.mxu3 %v4642_v11  ;;  %v5085_v11 = vld [vmem:[%s7386_s7 + $0x148] sm:$0xff] }
0x121c   :  { %3046 = vmatpush.bf16.msra.mxu2 %v5085_v11 }
0x121f   :  { %2870 = vmatpush.bf16.msra.mxu3 %v4634_v12 }
0x1220   :  { %3047 = vmatpush.bf16.msra.mxu2 %v5084_v9 }
0x1281   :  { %v2770_v13 = vpop.xlane.xlu2 %2769 }
0x1282   :  { %v2774_v57 = vmul.f32 %v2770_v13, %v5544_v15  ;;  %v5399_v13 = vld [vmem:[%s7381_s2 + $0x28] sm:$0xff] }
0x1283   :  { %3161 = vmatpush.msrb.mxu0 %v5399_v13 }
0x1284   :  { %v2776_v40 = vadd.f32 1e-06, %v2774_v57  ;;  %v5402_v57 = vld [vmem:[%s7381_s2 + $0x10] sm:$0xff] }
0x1285   :  { %3162 = vmatpush.msrb.mxu0 %v5400_v60 }
0x1286   :  { %5300 = vrsqrt.f32 %v2776_v40  ;;  %vm2784_vm3 = vweird.f32 %v2776_v40 }
0x1287   :  { %3163 = vmatpush.msrb.mxu0 %v5401_v34 }
0x1289   :  { %v2773_v45 = vpop.xlane.xlu2 %2772  ;;  %3164 = vmatpush.msrb.mxu0 %v5402_v57 }
0x128a   :  { %v2775_v54 = vmul.f32 %v2773_v45, %v5544_v15  ;;  %v2816_v45 = vperm.slane %v4630_v2, 0 }
0x128b   :  { %3165 = vmatpush.msrb.mxu0 %v5403_v44  ;;  %v7038_v44 = vld [vmem:[%s7387_s8 + $0x18] sm:$0xff] }
0x128c   :  { %v5301_v42 = vpop.eup %5300  ;;  %v2777_v31 = vadd.f32 1e-06, %v2775_v54  ;;  %v3095_v37 = vperm.slane %v7038_v44, 0 }
0x128d   :  { %v2779_v8 = vmul.f32 %v5301_v42, %v2776_v40  ;;  %vm2785_vm2 = vweird.f32 %v5301_v42  ;;  %3166 = vmatpush.msrb.mxu0 %v5404_v48  ;;  %v5080_v40 = vld [vmem:[%s7386_s7 + $0x120] sm:$0xff] }
0x128e   :  { %5302 = vrsqrt.f32 %v2777_v31  ;;  %vm2786_vm4 = vmor %vm2784_vm3, %vm2785_vm2  ;;  %vm2794_vm6 = vweird.f32 %v2777_v31  ;;  %3029 = vmatpush.bf16.msrb.mxu1 %v5080_v40 }
0x128f   :  { %v2780_v22 = vmul.f32 %v5301_v42, %v2779_v8 }
0x1291   :  { %v2781_v50 = vmul.f32 0.5, %v2780_v22 }
0x1292   :  { %3030 = vmatpush.bf16.msrb.mxu1 %v5079_v63 }
0x1293   :  { %v2782_v58 = vsub.f32 1.5, %v2781_v50 }
0x1294   :  { %v5303_v56 = vpop.eup %5302 }
0x1295   :  { %v2789_v3 = vmul.f32 %v5303_v56, %v2777_v31  ;;  %v2783_v27 = vmul.f32 %v5301_v42, %v2782_v58  ;;  %vm2795_vm5 = vweird.f32 %v5303_v56 }
0x1296   :  { %vm2796_vm7 = vmor %vm2794_vm6, %vm2795_vm5  ;;  %3031 = vmatpush.bf16.msrb.mxu1 %v5078_v16 }
0x1297   :  { %v2790_v6 = vmul.f32 %v5303_v56, %v2789_v3  ;;  %v2787_v17 = vsel %vm2786_vm4, %v5301_v42, %v2783_v27 }
0x1298   :  { %v2798_v39 = vmul.f32 %v2787_v17, %v6843_v49 }
0x1299   :  { %v2791_v7 = vmul.f32 0.5, %v2790_v6 }
0x129a   :  { %v2801_v30 = vmul.f32 %v2800_v5, %v2798_v39  ;;  %3032 = vmatpush.bf16.msrb.mxu1 %v5077_v61 }
0x129b   :  { %v2792_v29 = vsub.f32 1.5, %v2791_v7  ;;  %v5095_v7 = vld [vmem:[%s7383_s4 + $0x78] sm:$0xff] }
0x129c   :  { %3139 = vmatpush.bf16.msrb.mxu3 %v5095_v7 }
0x129d   :  { %v2793_v25 = vmul.f32 %v5303_v56, %v2792_v29 }
0x129e   :  { %3033 = vmatpush.bf16.msrb.mxu1 %v5076_v14 }
0x129f   :  { %v2797_v32 = vsel %vm2796_vm7, %v5303_v56, %v2793_v25  ;;  %v5092_v25 = vld [vmem:[%s7383_s4 + $0x60] sm:$0xff] }
0x12a0   :  { %v2799_v43 = vmul.f32 %v2797_v32, %v6849_v28 }
0x12a2   :  { %v2802_v47 = vmul.f32 %v2800_v5, %v2799_v43 }
0x12a4   :  { %v2812_v20 = vpack.c.bf16 %v2802_v47, %v2801_v30 }
0x12a6   :  { %4663 = vmatmul.msk.bf16.vlgmr.msra.gmra.mxu3 %vm77_vm0, %v2812_v20  ;;  %4664 = vmatmul.msk.bf16.vlgmr.msra.gmra.mxu0 %vm77_vm0, %v2812_v20 }
0x1323   :  { %v2886_v55 = vpop.f32.mrf.mxu0 }
0x1324   :  { %v2887_v4 = vadd.f32 %v2886_v55, %v2817_v38 }
0x1326   :  { %v2892_v18 = vmax.f32 %v2887_v4, 0.0 }
0x1329   :  { %v2872_v10 = vpop.f32.mrf.mxu3 }
0x132a   :  { %v2873_v33 = vadd.f32 %v2872_v10, %v2816_v45  ;;  %v5405_v10 = vld [vmem:[%s7380_s1] sm:$0xff] }
0x132b   :  { %v2888_v12 = vpop.f32.mrf.mxu0 }
0x132c   :  { %v2889_v24 = vadd.f32 %v2888_v12, %v2817_v38  ;;  %v2891_v46 = vmax.f32 %v2873_v33, 0.0  ;;  %v5406_v12 = vld [vmem:[%s7380_s1 + $0x10] sm:$0xff] }
0x132e   :  { %v2894_v54 = vmax.f32 %v2889_v24, 0.0 }
0x1330   :  { %v2929_v42 = vpack.c.bf16 %v2894_v54, %v2892_v18  ;;  %v5407_v54 = vld [vmem:[%s7380_s1 + $0x8] sm:$0xff] }
0x1331   :  { %v2874_v31 = vpop.f32.mrf.mxu3 }
0x1332   :  { %v2875_v8 = vadd.f32 %v2874_v31, %v2816_v45  ;;  %3048 = vmatmul.bf16.vlgmr.msra.gmra.mxu2 %v2929_v42  ;;  %v5408_v42 = vld [vmem:[%s7380_s1 + $0x18] sm:$0xff] }
0x1334   :  { %v2893_v36 = vmax.f32 %v2875_v8, 0.0 }
0x1336   :  { %v2928_v62 = vpack.c.bf16 %v2893_v36, %v2891_v46 }
0x1338   :  { %3034 = vmatmul.bf16.vlgmr.msrb.gmra.mxu1 %v2928_v62 }
0x13b5   :  { %v3035_v22 = vpop.f32.mrf.mxu1  ;;  %v3049_v26 = vpop.f32.mrf.mxu2 }
0x13b6   :  { %v3050_v50 = vadd.f32 %v3049_v26, %v3035_v22 }
0x13b8   :  { %v3054_v53 = vadd.f32 %v3050_v50, %v6843_v49 }
0x13ba   :  { %v7010_v58 = vadd.f32 %v3056_v35, %v3054_v53 }
0x13bc   :  { %v3061_v56 = vmul.f32 %v7010_v58, %v7010_v58 }
0x13bd   :  { %v3037_v41 = vpop.f32.mrf.mxu1  ;;  %v3051_v3 = vpop.f32.mrf.mxu2 }
0x13be   :  { %v3052_v51 = vadd.f32 %v3051_v3, %v3037_v41  ;;  %v3063_v27 = vsel %vm77_vm0, %v3061_v56, 0.0 }
0x13bf   :  { %3064 = vadd.xlane.f32.xlu1 %v3063_v27 }
0x13c0   :  { %v3055_v6 = vadd.f32 %v3052_v51, %v6849_v28  ;;  %v5094_v28 = vld [vmem:[%s7383_s4 + $0x70] sm:$0xff] }
0x13c1   :  { %3140 = vmatpush.bf16.msrb.mxu3 %v5094_v28  ;;  %v5409_v51 = vld [vmem:[%s7382_s3 + $0x10] sm:$0xff]  ;;  %v5411_v28 = vld [vmem:[%s7382_s3 + $0x18] sm:$0xff] }
0x13c2   :  { %v7016_v1 = vadd.f32 %v3056_v35, %v3055_v6 }
0x13c4   :  { %v3062_v19 = vmul.f32 %v7016_v1, %v7016_v1 }
0x13c5   :  { %3141 = vmatpush.bf16.msrb.mxu3 %v5093_v0 }
0x13c6   :  { %v3066_v49 = vsel %vm77_vm0, %v3062_v19, 0.0 }
0x13c7   :  { %3067 = vadd.xlane.f32.xlu0 %v3066_v49  ;;  %v5410_v49 = vld [vmem:[%s7382_s3] sm:$0xff] }
0x13c9   :  { %3142 = vmatpush.bf16.msrb.mxu3 %v5092_v25 }
0x1432   :  { %v3065_v21 = vpop.xlane.xlu1 %3064 }
0x1433   :  { %v3069_v17 = vmul.f32 %v3065_v21, %v5544_v15 }
0x1435   :  { %v3071_v29 = vadd.f32 1e-06, %v3069_v17 }
0x1437   :  { %5304 = vrsqrt.f32 %v3071_v29  ;;  %vm3079_vm10 = vweird.f32 %v3071_v29 }
0x143a   :  { %v3068_v5 = vpop.xlane.xlu0 %3067 }
0x143b   :  { %v3070_v39 = vmul.f32 %v3068_v5, %v5544_v15  ;;  %v5412_v5 = vld [vmem:[%s7382_s3 + $0x8] sm:$0xff] }
0x143d   :  { %v5305_v23 = vpop.eup %5304  ;;  %v3072_v32 = vadd.f32 1e-06, %v3070_v39 }
0x143e   :  { %v3074_v43 = vmul.f32 %v5305_v23, %v3071_v29  ;;  %vm3080_vm9 = vweird.f32 %v5305_v23 }
0x143f   :  { %5306 = vrsqrt.f32 %v3072_v32  ;;  %vm3081_vm11 = vmor %vm3079_vm10, %vm3080_vm9  ;;  %vm3089_vm13 = vweird.f32 %v3072_v32 }
0x1440   :  { %v3075_v59 = vmul.f32 %v5305_v23, %v3074_v43 }
0x1442   :  { %v3076_v30 = vmul.f32 0.5, %v3075_v59  ;;  %v5413_v59 = vld [vmem:[%s7382_s3 + $0x30] sm:$0xff] }
0x1444   :  { %v3077_v47 = vsub.f32 1.5, %v3076_v30 }
0x1445   :  { %v5307_v13 = vpop.eup %5306 }
0x1446   :  { %v3084_v20 = vmul.f32 %v5307_v13, %v3072_v32  ;;  %v3078_v60 = vmul.f32 %v5305_v23, %v3077_v47  ;;  %vm3090_vm12 = vweird.f32 %v5307_v13 }
0x1447   :  { %vm3091_vm14 = vmor %vm3089_vm13, %vm3090_vm12 }
0x1448   :  { %v3085_v34 = vmul.f32 %v5307_v13, %v3084_v20  ;;  %v3082_v48 = vsel %vm3081_vm11, %v5305_v23, %v3078_v60 }
0x1449   :  { %v3093_v63 = vmul.f32 %v3082_v48, %v7010_v58 }
0x144a   :  { %v3086_v57 = vmul.f32 0.5, %v3085_v34 }
0x144b   :  { %v3096_v9 = vmul.f32 %v3095_v37, %v3093_v63 }
0x144c   :  { %v3087_v52 = vsub.f32 1.5, %v3086_v57  ;;  %v5415_v57 = vld [vmem:[%s7382_s3 + $0x38] sm:$0xff] }
0x144e   :  { %v3088_v40 = vmul.f32 %v5307_v13, %v3087_v52  ;;  %v5416_v52 = vld [vmem:[%s7382_s3 + $0x28] sm:$0xff] }
0x1450   :  { %v3092_v11 = vsel %vm3091_vm14, %v5307_v13, %v3088_v40  ;;  %v5414_v13 = vld [vmem:[%s7382_s3 + $0x20] sm:$0xff] }
0x1451   :  { %v3094_v16 = vmul.f32 %v3092_v11, %v7016_v1 }
0x1453   :  { %v3097_v61 = vmul.f32 %v3095_v37, %v3094_v16 }
0x1455   :  { %v3107_v14 = vpack.c.bf16 %v3097_v61, %v3096_v9 }
0x1457   :  { %4786 = vmatmul.msk.bf16.vlgmr.msrb.gmra.mxu3 %vm77_vm0, %v3107_v14 }
0x14da   :  { %v3144_v2 = vpop.f32.mrf.mxu3 }
0x14db   :  { %3167 = vmatmul.f32.vlgmr.msrb.gmra.mxu0 %v3144_v2  ;;  %v3149_v4 = vmul.f32 %v5405_v10, %v3144_v2 }
0x14e2   :  { %v3146_v55 = vpop.f32.mrf.mxu3 }
0x14e3   :  { %3170 = vmatmul.f32.gmra.mxu0 %v3146_v55  ;;  %v3150_v33 = vmul.f32 %v5407_v54, %v3146_v55 }
0x1558   :  { %v3168_v38 = vpop.f32.mrf.mxu0 }
0x1559   :  { %v3174_v45 = vmul.f32 %v5406_v12, %v3168_v38 }
0x155b   :  { %v7050_v24 = vadd.f32 %v3174_v45, %v3149_v4 }
0x155d   :  { %3180 = vrot.lane.b32.xlu2 %v7050_v24, %s5446_s20 }
0x1560   :  { %v3171_v18 = vpop.f32.mrf.mxu0 }
0x1561   :  { %v3175_v31 = vmul.f32 %v5408_v42, %v3171_v18 }
0x1563   :  { %v7060_v8 = vadd.f32 %v3175_v31, %v3150_v33 }
0x1565   :  { %3217 = vrot.lane.b32.xlu0 %v7060_v8, %s5444_s14  ;;  %3252 = vrot.lane.b32.xlu1 %v7060_v8, %s5445_s19 }
0x1566   :  { %3182 = vrot.lane.b32.xlu2 %v7060_v8, %s5446_s20 }
0x156d   :  { %3248 = vrot.lane.b32.xlu0 %v7060_v8, %s5447_s21  ;;  %3246 = vrot.lane.b32.xlu1 %v7050_v24, %s5447_s21  ;;  %s4154_s21 = sshll.u32 %s7391_s12, 4  ;;  %s4155_s21 = int_to_ptr.hbm [resolvable:$true] %s4154_s21 }
0x156e   :  { %3215 = vrot.lane.b32.xlu2 %v7050_v24, %s5444_s14 }
0x1576   :  { %3250 = vrot.lane.b32.xlu2 %v7050_v24, %s5445_s19 }
0x157e   :  { %3285 = vrot.lane.b32.xlu2 %v7050_v24, %s5448_s22 }
0x1586   :  { %3287 = vrot.lane.b32.xlu2 %v7060_v8, %s5448_s22  ;;  %s5452_s22 = smov 128  }
0x15b7   :  { %v3181_v46 = vpop.permute.xlu2 %3180 }
0x15c0   :  { %v3183_v36 = vpop.permute.xlu2 %3182 }
0x15c1   :  { %4787 = vmatpush.xpose.msk.msra.mxu3 %vm205_vm8, %v3183_v36  ;;  %4791 = vmatpush.xpose.msk.msra.mxu1 %vm205_vm8, %v3183_v36 }
0x15c5   :  { %4788 = vmatpush.xpose.msk.msra.mxu3 %vm205_vm8, %v3181_v46  ;;  %4792 = vmatpush.xpose.msk.msra.mxu1 %vm205_vm8, %v3181_v46 }
0x15c8   :  { %4789 = vmatmul.msk.f32.vlgmr.msra.gmra.mxu3 %vm205_vm8, %v7050_v24  ;;  %v3216_v62 = vpop.permute.xlu2 %3215 }
0x15c9   :  { %4793 = vmatmul.msk.f32.vlgmr.msra.gmra.mxu1 %vm205_vm8, %v3216_v62 }
0x15d0   :  { %4790 = vmatmul.msk.f32.gmra.mxu3 %vm205_vm8, %v7060_v8  ;;  %v3251_v22 = vpop.permute.xlu2 %3250 }
0x15d7   :  { %v3218_v26 = vpop.permute.xlu0 %3217  ;;  %v3253_v50 = vpop.permute.xlu1 %3252 }
0x15d8   :  { %4794 = vmatmul.msk.f32.gmra.mxu1 %vm205_vm8, %v3218_v26  ;;  %4795 = vmatpush.xpose.msk.msrb.mxu2 %vm205_vm8, %v3253_v50  ;;  %v3286_v35 = vpop.permute.xlu2 %3285 }
0x15d9   :  { %4799 = vmatpush.xpose.msk.msrb.mxu3 %vm205_vm8, %v3253_v50 }
0x15dc   :  { %4796 = vmatpush.xpose.msk.msrb.mxu2 %vm205_vm8, %v3251_v22 }
0x15dd   :  { %4800 = vmatpush.xpose.msk.msrb.mxu3 %vm205_vm8, %v3251_v22 }
0x15df   :  { %v3247_v53 = vpop.permute.xlu1 %3246  ;;  %v3249_v56 = vpop.permute.xlu0 %3248 }
0x15e0   :  { %4801 = vmatmul.msk.f32.vlgmr.msrb.gmra.mxu3 %vm205_vm8, %v3286_v35  ;;  %4797 = vmatmul.msk.f32.vlgmr.msrb.gmra.mxu2 %vm205_vm8, %v3247_v53  ;;  %v3288_v41 = vpop.permute.xlu2 %3287 }
0x15e8   :  { %4802 = vmatmul.msk.f32.gmra.mxu3 %vm205_vm8, %v3288_v41  ;;  %4798 = vmatmul.msk.f32.gmra.mxu2 %vm205_vm8, %v3249_v56 }
0x1646   :  { %v3240_v3 = vpop.f32.mrf.mxu1 }
0x1647   :  { %v3318_v27 = vadd.f32 %v5409_v51, %v3240_v3 }
0x1649   :  { %v3330_v6 = vsel %vm205_vm8, %v3318_v27, -inf }
0x164a   :  { %3331 = vmax.xlane.f32.xlu2 %v3330_v6 }
0x164b   :  { %v3209_v19 = vpop.f32.mrf.mxu3 }
0x164c   :  { %v3316_v7 = vadd.f32 %v5410_v49, %v3209_v19 }
0x164e   :  { %v3324_v21 = vsel %vm205_vm8, %v3316_v7, -inf }
0x164f   :  { %3325 = vmax.xlane.f32.xlu0 %v3324_v21 }
0x1653   :  { %v3212_v25 = vpop.f32.mrf.mxu3 }
0x1654   :  { %v3317_v39 = vadd.f32 %v5412_v5, %v3212_v25  ;;  %v5171_v25 = vpack.i.bf16 %v7050_v24, %v7060_v8 }
0x1655   :  { %v3243_v17 = vpop.f32.mrf.mxu1 }
0x1656   :  { %v3319_v29 = vadd.f32 %v5411_v28, %v3243_v17  ;;  %v3327_v23 = vsel %vm205_vm8, %v3317_v39, -inf }
0x1658   :  { %v3333_v0 = vsel %vm205_vm8, %v3319_v29, -inf }
0x1659   :  { %3334 = vmax.xlane.f32.xlu1 %v3333_v0 }
0x1661   :  { %3328 = vmax.xlane.f32.xlu1 %v3327_v23 }
0x1663   :  { %v3310_v32 = vpop.f32.mrf.mxu3  ;;  %v3279_v43 = vpop.f32.mrf.mxu2 }
0x1664   :  { %v3322_v30 = vadd.f32 %v5413_v59, %v3310_v32  ;;  %v3320_v20 = vadd.f32 %v5414_v13, %v3279_v43 }
0x1666   :  { %v3342_v47 = vsel %vm205_vm8, %v3322_v30, -inf  ;;  %v3336_v37 = vsel %vm205_vm8, %v3320_v20, -inf }
0x1667   :  { %3343 = vmax.xlane.f32.xlu2 %v3342_v47 }
0x166b   :  { %v3313_v60 = vpop.f32.mrf.mxu3  ;;  %v3282_v34 = vpop.f32.mrf.mxu2 }
0x166c   :  { %v3323_v48 = vadd.f32 %v5415_v57, %v3313_v60  ;;  %v3321_v40 = vadd.f32 %v5416_v52, %v3282_v34 }
0x166e   :  { %v3345_v63 = vsel %vm205_vm8, %v3323_v48, -inf  ;;  %v3339_v11 = vsel %vm205_vm8, %v3321_v40, -inf }
0x166f   :  { %3337 = vmax.xlane.f32.xlu2 %v3336_v37  ;;  %3346 = vmax.xlane.f32.xlu0 %v3345_v63 }
0x1670   :  { %3340 = vmax.xlane.f32.xlu1 %v3339_v11 }
0x16bd   :  { %v3332_v16 = vpop.xlane.xlu2 %3331 }
0x16be   :  { %v3350_v9 = vsub.f32 %v3318_v27, %v3332_v16 }
0x16c0   :  { %v3360_v61 = vmul.f32 1.442695, %v3350_v9 }
0x16c2   :  { %5308 = vpow2.f32 %v3360_v61  ;;  %v3326_v14 = vpop.xlane.xlu0 %3325 }
0x16c3   :  { %v3348_v2 = vsub.f32 %v3316_v7, %v3326_v14 }
0x16c5   :  { %v3356_v55 = vmul.f32 1.442695, %v3348_v2 }
0x16c7   :  { %5310 = vpow2.f32 %v3356_v55 }
0x16c8   :  { %v7130_v38 = vpop.eup %5308 }
0x16c9   :  { %v3378_v10 = vsel %vm205_vm8, %v7130_v38, 0.0 }
0x16ca   :  { %3379 = vadd.xlane.f32.xlu0 %v3378_v10 }
0x16cc   :  { %v3335_v4 = vpop.xlane.xlu1 %3334 }
0x16cd   :  { %v7134_v12 = vpop.eup %5310  ;;  %v3351_v45 = vsub.f32 %v3319_v29, %v3335_v4 }
0x16ce   :  { %v3372_v18 = vsel %vm205_vm8, %v7134_v12, 0.0 }
0x16cf   :  { %v3362_v54 = vmul.f32 1.442695, %v3351_v45  ;;  %3373 = vadd.xlane.f32.xlu1 %v3372_v18 }
0x16d1   :  { %5312 = vpow2.f32 %v3362_v54 }
0x16d4   :  { %v3329_v33 = vpop.xlane.xlu1 %3328 }
0x16d5   :  { %v3349_v42 = vsub.f32 %v3317_v39, %v3329_v33 }
0x16d7   :  { %v7138_v31 = vpop.eup %5312  ;;  %v3358_v46 = vmul.f32 1.442695, %v3349_v42 }
0x16d8   :  { %v3381_v36 = vsel %vm205_vm8, %v7138_v31, 0.0 }
0x16d9   :  { %5314 = vpow2.f32 %v3358_v46  ;;  %3382 = vadd.xlane.f32.xlu2 %v3381_v36 }
0x16da   :  { %v3344_v62 = vpop.xlane.xlu2 %3343 }
0x16db   :  { %v3354_v22 = vsub.f32 %v3322_v30, %v3344_v62 }
0x16dd   :  { %v3368_v26 = vmul.f32 1.442695, %v3354_v22 }
0x16df   :  { %v7142_v50 = vpop.eup %5314  ;;  %5316 = vpow2.f32 %v3368_v26 }
0x16e0   :  { %v3375_v35 = vsel %vm205_vm8, %v7142_v50, 0.0 }
0x16e1   :  { %3376 = vadd.xlane.f32.xlu1 %v3375_v35 }
0x16e2   :  { %v3347_v53 = vpop.xlane.xlu0 %3346  ;;  %v3338_v56 = vpop.xlane.xlu2 %3337 }
0x16e3   :  { %v3355_v41 = vsub.f32 %v3323_v48, %v3347_v53  ;;  %v3352_v3 = vsub.f32 %v3320_v20, %v3338_v56  ;;  %v3341_v51 = vpop.xlane.xlu1 %3340 }
0x16e4   :  { %v3353_v49 = vsub.f32 %v3321_v40, %v3341_v51 }
0x16e5   :  { %v7146_v27 = vpop.eup %5316  ;;  %v3370_v6 = vmul.f32 1.442695, %v3355_v41  ;;  %v3364_v19 = vmul.f32 1.442695, %v3352_v3 }
0x16e6   :  { %v3390_v7 = vsel %vm205_vm8, %v7146_v27, 0.0  ;;  %v3366_v21 = vmul.f32 1.442695, %v3353_v49 }
0x16e7   :  { %5318 = vpow2.f32 %v3370_v6  ;;  %3391 = vadd.xlane.f32.xlu0 %v3390_v7 }
0x16e8   :  { %5320 = vpow2.f32 %v3364_v19 }
0x16e9   :  { %5322 = vpow2.f32 %v3366_v21 }
0x16ed   :  { %v7150_v17 = vpop.eup %5318 }
0x16ee   :  { %v7152_v28 = vpop.eup %5320  ;;  %v3393_v29 = vsel %vm205_vm8, %v7150_v17, 0.0 }
0x16ef   :  { %3394 = vadd.xlane.f32.xlu0 %v3393_v29  ;;  %v3384_v0 = vsel %vm205_vm8, %v7152_v28, 0.0  ;;  %v7161_v5 = vpop.eup %5322 }
0x16f0   :  { %3385 = vadd.xlane.f32.xlu1 %v3384_v0  ;;  %v3387_v39 = vsel %vm205_vm8, %v7161_v5, 0.0 }
0x16f1   :  { %5172 = vrot.lane.b32.xlu2 %v5171_v25, %s5449_s25 }
0x16f8   :  { %3388 = vadd.xlane.f32.xlu1 %v3387_v39 }
0x1703   :  { %5177 = vrot.lane.b32.xlu0 %v5171_v25, %s5450_s26 }
0x173d   :  { %v3380_v23 = vpop.xlane.xlu0 %3379 }
0x173e   :  { %5324 = vrcp.f32 %v3380_v23  ;;  %vm3429_vm2 = vweird.f32 %v3380_v23  ;;  %v3435_v57 = vand.u32 2147483648, %v3380_v23  ;;  %v3433_v37 = vand.u32 2147483647, %v3380_v23 }
0x1740   :  { %v3436_v61 = vor.u32 1.1754944e-38, %v3435_v57  ;;  %vm3434_vm6 = vcmp.eq.f32.partialorder %v3433_v37, 8.507059e+37 }
0x1742   :  { %v3374_v32 = vpop.xlane.xlu1 %3373 }
0x1743   :  { %5326 = vrcp.f32 %v3374_v32  ;;  %v3407_v52 = vand.u32 2147483648, %v3374_v32  ;;  %vm3401_vm4 = vweird.f32 %v3374_v32  ;;  %v3405_v63 = vand.u32 2147483647, %v3374_v32 }
0x1744   :  { %v5325_v43 = vpop.eup %5324 }
0x1745   :  { %v3425_v59 = vmul.f32 %v5325_v43, %v3380_v23  ;;  %vm3430_vm15 = vweird.f32 %v5325_v43  ;;  %v3408_v14 = vor.u32 1.1754944e-38, %v3407_v52  ;;  %vm3406_vm7 = vcmp.eq.f32.partialorder %v3405_v63, 8.507059e+37 }
0x1746   :  { %vm7166_vm3 = vmor %vm3429_vm2, %vm3430_vm15 }
0x1747   :  { %v3426_v30 = vsub.f32 1.0, %v3425_v59 }
0x1749   :  { %v5327_v47 = vpop.eup %5326  ;;  %v3427_v8 = vmul.f32 %v5325_v43, %v3426_v30 }
0x174a   :  { %v3397_v24 = vmul.f32 %v5327_v47, %v3374_v32  ;;  %vm3402_vm1 = vweird.f32 %v5327_v47 }
0x174b   :  { %v3428_v34 = vadd.f32 %v5325_v43, %v3427_v8  ;;  %vm3403_vm5 = vmor %vm3401_vm4, %vm3402_vm1 }
0x174c   :  { %v3398_v13 = vsub.f32 1.0, %v3397_v24  ;;  %v3383_v20 = vpop.xlane.xlu2 %3382 }
0x174d   :  { %5328 = vrcp.f32 %v3383_v20  ;;  %v3432_v16 = vsel %vm7166_vm3, %v5325_v43, %v3428_v34  ;;  %v3449_v42 = vand.u32 2147483648, %v3383_v20  ;;  %v3447_v22 = vand.u32 2147483647, %v3383_v20 }
0x174e   :  { %v3399_v60 = vmul.f32 %v5327_v47, %v3398_v13  ;;  %v3437_v4 = vsel %vm3434_vm6, %v3436_v61, %v3432_v16  ;;  %vm3443_vm10 = vweird.f32 %v3383_v20 }
0x174f   :  { %v3510_v36 = vmul.f32 %v7130_v38, %v3437_v4  ;;  %v3450_v56 = vor.u32 1.1754944e-38, %v3449_v42  ;;  %vm3448_vm12 = vcmp.eq.f32.partialorder %v3447_v22, 8.507059e+37 }
0x1750   :  { %v3400_v48 = vadd.f32 %v5327_v47, %v3399_v60 }
0x1752   :  { %v3404_v9 = vsel %vm3403_vm5, %v5327_v47, %v3400_v48 }
0x1753   :  { %v5329_v11 = vpop.eup %5328  ;;  %v3409_v45 = vsel %vm3406_vm7, %v3408_v14, %v3404_v9 }
0x1754   :  { %v3439_v2 = vmul.f32 %v5329_v11, %v3383_v20  ;;  %v3377_v55 = vpop.xlane.xlu1 %3376  ;;  %v5173_v10 = vpop.permute.xlu2 %5172  ;;  %vm3444_vm9 = vweird.f32 %v5329_v11  ;;  %v3508_v62 = vmul.f32 %v7134_v12, %v3409_v45 }
0x1755   :  { %5330 = vrcp.f32 %v3377_v55  ;;  %v5174_v54 = vunpack.i.l.bf16 %v5173_v10  ;;  %v5175_v46 = vunpack.i.h.bf16 %v5173_v10  ;;  %vm3445_vm11 = vmor %vm3443_vm10, %vm3444_vm9  ;;  %v3421_v6 = vand.u32 2147483648, %v3377_v55 }
0x1756   :  { %v3440_v18 = vsub.f32 1.0, %v3439_v2  ;;  %v3419_v49 = vand.u32 2147483647, %v3377_v55  ;;  %vm3415_vm14 = vweird.f32 %v3377_v55 }
0x1757   :  { %3551 = vmatpush.msra.mxu0 %v5174_v54  ;;  %3607 = vmatpush.msra.mxu2 %v5174_v54  ;;  %v3422_v39 = vor.u32 1.1754944e-38, %v3421_v6 }
0x1758   :  { %v3441_v33 = vmul.f32 %v5329_v11, %v3440_v18  ;;  %vm3420_vm1 = vcmp.eq.f32.partialorder %v3419_v49, 8.507059e+37  ;;  %v5097_v49 = vld [vmem:[%s7384_s5 + $0x68] sm:$0xff] }
0x1759   :  { %3552 = vmatpush.msra.mxu0 %v5175_v46  ;;  %3608 = vmatpush.msra.mxu2 %v5175_v46 }
0x175a   :  { %v3442_v26 = vadd.f32 %v5329_v11, %v3441_v33  ;;  %v7174_v35 = vpop.xlane.xlu0 %3391  ;;  %4811 = vmatmul.msk.f32.vlgmr.msra.gmra.mxu0 %vm205_vm8, %v3508_v62  ;;  %4818 = vmatmul.msk.f32.vlgmr.msra.gmra.mxu2 %vm205_vm8, %v3510_v36 }
0x175b   :  { %v5331_v53 = vpop.eup %5330  ;;  %5332 = vrcp.f32 %v7174_v35  ;;  %v3491_v34 = vand.u32 2147483648, %v7174_v35  ;;  %vm3485_vm4 = vweird.f32 %v7174_v35  ;;  %3633 = vmatpush.bf16.msra.mxu3 %v5097_v49  ;;  %v4852_v49 = vld [vmem:[%s7385_s6 + $0xc8] sm:$0xf0] }
0x175c   :  { %v3411_v41 = vmul.f32 %v5331_v53, %v3377_v55  ;;  %v3446_v38 = vsel %vm3445_vm11, %v5329_v11, %v3442_v26  ;;  %vm3416_vm13 = vweird.f32 %v5331_v53  ;;  %v4868_v26 = vld [vmem:[%s7385_s6 + $0xe8] sm:$0xf0] }
0x175d   :  { %v3451_v3 = vsel %vm3448_vm12, %v3450_v56, %v3446_v38  ;;  %vm3417_vm15 = vmor %vm3415_vm14, %vm3416_vm13  ;;  %v3492_v16 = vor.u32 1.1754944e-38, %v3491_v34 }
0x175e   :  { %v3412_v12 = vsub.f32 1.0, %v3411_v41  ;;  %v3511_v7 = vmul.f32 %v7138_v31, %v3451_v3 }
0x1760   :  { %v3413_v51 = vmul.f32 %v5331_v53, %v3412_v12 }
0x1761   :  { %v5333_v19 = vpop.eup %5332 }
0x1762   :  { %v3414_v21 = vadd.f32 %v5331_v53, %v3413_v51  ;;  %v3481_v29 = vmul.f32 %v5333_v19, %v7174_v35  ;;  %v7181_v0 = vpop.xlane.xlu0 %3394  ;;  %4819 = vmatmul.msk.f32.gmra.mxu2 %vm205_vm8, %v3511_v7  ;;  %vm3486_vm2 = vweird.f32 %v5333_v19 }
0x1763   :  { %5334 = vrcp.f32 %v7181_v0  ;;  %v3386_v25 = vpop.xlane.xlu1 %3385  ;;  %vm3487_vm5 = vmor %vm3485_vm4, %vm3486_vm2  ;;  %vm3499_vm11 = vweird.f32 %v7181_v0  ;;  %v3503_v33 = vand.u32 2147483647, %v7181_v0  ;;  %v3505_v36 = vand.u32 2147483648, %v7181_v0 }
0x1764   :  { %5336 = vrcp.f32 %v3386_v25  ;;  %v3418_v23 = vsel %vm3417_vm15, %v5331_v53, %v3414_v21  ;;  %v3482_v32 = vsub.f32 1.0, %v3481_v29  ;;  %v3463_v52 = vand.u32 2147483648, %v3386_v25 }
0x1765   :  { %v3423_v43 = vsel %vm3420_vm1, %v3422_v39, %v3418_v23  ;;  %vm3457_vm6 = vweird.f32 %v3386_v25  ;;  %v3461_v37 = vand.u32 2147483647, %v3386_v25  ;;  %v3506_v38 = vor.u32 1.1754944e-38, %v3505_v36  ;;  %v5099_v39 = vld [vmem:[%s7384_s5 + $0x78] sm:$0xff]  ;;  %v5104_v36 = vld [vmem:[%s7385_s6 + $0xe4] sm:$0xf] }
0x1766   :  { %v3509_v31 = vmul.f32 %v7142_v50, %v3423_v43  ;;  %v3483_v47 = vmul.f32 %v5333_v19, %v3482_v32  ;;  %v3489_v50 = vand.u32 2147483647, %v7174_v35  ;;  %v3464_v2 = vor.u32 1.1754944e-38, %v3463_v52  ;;  %3749 = vmatpush.bf16.msrb.mxu3 %v5099_v39 }
0x1767   :  { %vm3462_vm10 = vcmp.eq.f32.partialorder %v3461_v37, 8.507059e+37  ;;  %vm3504_vm2 = vcmp.eq.f32.partialorder %v3503_v33, 8.507059e+37 }
0x1768   :  { %4812 = vmatmul.msk.f32.gmra.mxu0 %vm205_vm8, %v3509_v31  ;;  %v3484_v60 = vadd.f32 %v5333_v19, %v3483_v47  ;;  %vm3490_vm9 = vcmp.eq.f32.partialorder %v3489_v50, 8.507059e+37 }
0x1769   :  { %v7186_v59 = vpop.eup %5334 }
0x176a   :  { %v5337_v30 = vpop.eup %5336  ;;  %v3495_v24 = vmul.f32 %v7186_v59, %v7181_v0  ;;  %v3488_v11 = vsel %vm3487_vm5, %v5333_v19, %v3484_v60  ;;  %vm3500_vm12 = vweird.f32 %v7186_v59  ;;  %v5096_v19 = vld [vmem:[%s7384_s5 + $0x60] sm:$0xff] }
0x176b   :  { %v3453_v8 = vmul.f32 %v5337_v30, %v3386_v25  ;;  %v3389_v13 = vpop.xlane.xlu1 %3388  ;;  %vm3458_vm3 = vweird.f32 %v5337_v30  ;;  %v3493_v55 = vsel %vm3490_vm9, %v3492_v16, %v3488_v11  ;;  %vm7201_vm14 = vmor %vm3499_vm11, %vm3500_vm12  ;;  %3577 = vmatpush.bf16.msrb.mxu1 %v5096_v19  ;;  %v5100_v19 = vld [vmem:[%s7385_s6 + $0xc4] sm:$0xf] }
0x176c   :  { %5338 = vrcp.f32 %v3389_v13  ;;  %v3496_v57 = vsub.f32 1.0, %v3495_v24  ;;  %vm3459_vm7 = vmor %vm3457_vm6, %vm3458_vm3  ;;  %v3514_v46 = vmul.f32 %v7146_v27, %v3493_v55  ;;  %v3477_v62 = vand.u32 2147483648, %v3389_v13 }
0x176d   :  { %v3454_v20 = vsub.f32 1.0, %v3453_v8  ;;  %vm3471_vm15 = vweird.f32 %v3389_v13  ;;  %v3475_v56 = vand.u32 2147483647, %v3389_v13 }
0x176e   :  { %v3497_v9 = vmul.f32 %v7186_v59, %v3496_v57  ;;  %v3478_v12 = vor.u32 1.1754944e-38, %v3477_v62 }
0x176f   :  { %v3455_v48 = vmul.f32 %v5337_v30, %v3454_v20  ;;  %vm3476_vm3 = vcmp.eq.f32.partialorder %v3475_v56, 8.507059e+37 }
0x1770   :  { %v3498_v54 = vadd.f32 %v7186_v59, %v3497_v9 }
0x1771   :  { %v3456_v40 = vadd.f32 %v5337_v30, %v3455_v48 }
0x1772   :  { %v5339_v63 = vpop.eup %5338  ;;  %v3502_v41 = vsel %vm7201_vm14, %v7186_v59, %v3498_v54  ;;  %v4876_v54 = vld [vmem:[%s7385_s6 + $0xf8] sm:$0xf0] }
0x1773   :  { %v3460_v61 = vsel %vm3459_vm7, %v5337_v30, %v3456_v40  ;;  %v3467_v14 = vmul.f32 %v5339_v63, %v3389_v13  ;;  %vm3472_vm13 = vweird.f32 %v5339_v63  ;;  %v3507_v3 = vsel %vm3504_vm2, %v3506_v38, %v3502_v41  ;;  %v5103_v41 = vld [vmem:[%s7385_s6 + $0xd4] sm:$0xf0] }
0x1774   :  { %v3465_v45 = vsel %vm3462_vm10, %v3464_v2, %v3460_v61  ;;  %vm3473_vm1 = vmor %vm3471_vm15, %vm3472_vm13  ;;  %v3515_v6 = vmul.f32 %v7150_v17, %v3507_v3  ;;  %v5098_v17 = vld [vmem:[%s7384_s5 + $0x70] sm:$0xff]  ;;  %v3584_v13 = vperm.slane %v7038_v44, 2  ;;  %v4850_v3 = vld [vmem:[%s7385_s6 + $0xc0] sm:$0xf] }
0x1775   :  { %v3468_v10 = vsub.f32 1.0, %v3467_v14  ;;  %v5178_v4 = vpop.permute.xlu0 %5177  ;;  %v3512_v35 = vmul.f32 %v7152_v28, %v3465_v45  ;;  %3694 = vmatpush.bf16.msra.mxu1 %v5098_v17  ;;  %v5107_v45 = vld [vmem:[%s7385_s6 + $0xf4] sm:$0xf0] }
0x1776   :  { %v5179_v18 = vunpack.i.l.bf16 %v5178_v4  ;;  %v5180_v22 = vunpack.i.h.bf16 %v5178_v4  ;;  %v4874_v4 = vld [vmem:[%s7385_s6 + $0xf0] sm:$0xf]  ;;  %v5123_v17 = vld [vmem:[%s7386_s7 + $0x1f8] sm:$0xff] }
0x1777   :  { %v3469_v42 = vmul.f32 %v5339_v63, %v3468_v10 }
0x1778   :  { %3668 = vmatpush.msrb.mxu0 %v5179_v18  ;;  %3723 = vmatpush.msrb.mxu2 %v5179_v18  ;;  %v5106_v18 = vld [vmem:[%s7385_s6 + $0xf4] sm:$0xf] }
0x1779   :  { %v3470_v53 = vadd.f32 %v5339_v63, %v3469_v42  ;;  %v4879_v33 = vor.u32 %v5106_v18, %v4876_v54  ;;  %v4866_v42 = vld [vmem:[%s7385_s6 + $0xe0] sm:$0xf]  ;;  %v5109_v18 = vld [vmem:[%s7386_s7 + $0x188] sm:$0xff] }
0x177a   :  { %3669 = vmatpush.msrb.mxu0 %v5180_v22  ;;  %3724 = vmatpush.msrb.mxu2 %v5180_v22  ;;  %v5108_v54 = vld [vmem:[%s7386_s7 + $0x180] sm:$0xff] }
0x177b   :  { %4825 = vmatmul.msk.f32.vlgmr.msrb.gmra.mxu0 %vm205_vm8, %v3512_v35  ;;  %4832 = vmatmul.msk.f32.vlgmr.msrb.gmra.mxu2 %vm205_vm8, %v3514_v46  ;;  %v3474_v27 = vsel %vm3473_vm1, %v5339_v63, %v3470_v53  ;;  %v5105_v46 = vld [vmem:[%s7385_s6 + $0xe4] sm:$0xf0]  ;;  %v4871_v53 = vor.u32 %v5104_v36, %v4868_v26 }
0x177c   :  { %v3479_v28 = vsel %vm3476_vm3, %v3478_v12, %v3474_v27  ;;  %v4867_v22 = vor.u32 %v5105_v46, %v4866_v42  ;;  %v4858_v27 = vld [vmem:[%s7385_s6 + $0xd0] sm:$0xf]  ;;  %v5102_v12 = vld [vmem:[%s7385_s6 + $0xd4] sm:$0xf]  ;;  %v4847_v42 = vld [vmem:[%s7388_s9 + $0x6] sm:$0x3] }
0x177d   :  { %v3513_v51 = vmul.f32 %v7161_v5, %v3479_v28  ;;  %v4859_v38 = vor.u32 %v5103_v41, %v4858_v27  ;;  %v4860_v28 = vld [vmem:[%s7385_s6 + $0xd8] sm:$0xf0] }
0x1783   :  { %4826 = vmatmul.msk.f32.gmra.mxu0 %vm205_vm8, %v3513_v51  ;;  %4833 = vmatmul.msk.f32.gmra.mxu2 %vm205_vm8, %v3515_v6  ;;  %v4863_v51 = vor.u32 %v5102_v12, %v4860_v28  ;;  %v5101_v6 = vld [vmem:[%s7385_s6 + $0xc4] sm:$0xf0] }
0x17d7   :  { %v3554_v7 = vpop.f32.mrf.mxu0 }
0x17dd   :  { %v3610_v21 = vpop.f32.mrf.mxu2 }
0x17e5   :  { %v3557_v5 = vpop.f32.mrf.mxu0  ;;  %v3613_v29 = vpop.f32.mrf.mxu2 }
0x17e6   :  { %v3560_v0 = vpack.c.bf16 %v3557_v5, %v3554_v7  ;;  %v3616_v25 = vpack.c.bf16 %v3613_v29, %v3610_v21  ;;  %v4851_v7 = vor.u32 %v5101_v6, %v4850_v3  ;;  %v5115_v21 = vld [vmem:[%s7386_s7 + $0x1b8] sm:$0xff]  ;;  %v4855_v5 = vor.u32 %v5100_v19, %v4852_v49 }
0x17e7   :  { %4020 = vmatpush.bf16.msra.mxu2 %v5115_v21  ;;  %v4050_v21 = vperm.slane %v7038_v44, 3 }
0x17e8   :  { %4817 = vmatmul.msk.bf16.vlgmr.msrb.gmra.mxu1 %vm205_vm8, %v3560_v0  ;;  %4824 = vmatmul.msk.bf16.vlgmr.msra.gmra.mxu3 %vm205_vm8, %v3616_v25  ;;  %v5114_v0 = vld [vmem:[%s7386_s7 + $0x1b0] sm:$0xff] }
0x17e9   :  { %3875 = vmatpush.bf16.msrb.mxu1 %v4879_v33  ;;  %4034 = vmatpush.bf16.msra.mxu3 %v5123_v17  ;;  %v5122_v25 = vld [vmem:[%s7386_s7 + $0x1f0] sm:$0xff]  ;;  %v5116_v33 = vld [vmem:[%s7386_s7 + $0x1c0] sm:$0xff] }
0x17eb   :  { %4021 = vmatpush.bf16.msra.mxu2 %v5114_v0 }
0x17ed   :  { %3876 = vmatpush.bf16.msrb.mxu1 %v4871_v53  ;;  %4035 = vmatpush.bf16.msra.mxu3 %v5122_v25 }
0x17f1   :  { %3877 = vmatpush.bf16.msrb.mxu1 %v4863_v51 }
0x17f5   :  { %3878 = vmatpush.bf16.msrb.mxu1 %v4855_v5 }
0x17f8   :  { %v3671_v23 = vpop.f32.mrf.mxu0 }
0x17fe   :  { %v3726_v32 = vpop.f32.mrf.mxu2 }
0x1800   :  { %v3674_v43 = vpop.f32.mrf.mxu0 }
0x1801   :  { %v3677_v31 = vpack.c.bf16 %v3674_v43, %v3671_v23 }
0x1803   :  { %4831 = vmatmul.msk.bf16.vlgmr.msra.gmra.mxu1 %vm205_vm8, %v3677_v31  ;;  %v5113_v31 = vld [vmem:[%s7386_s7 + $0x1a8] sm:$0xff] }
0x1804   :  { %4022 = vmatpush.bf16.msra.mxu2 %v5113_v31 }
0x1806   :  { %v3729_v59 = vpop.f32.mrf.mxu2 }
0x1807   :  { %v3732_v30 = vpack.c.bf16 %v3729_v59, %v3726_v32  ;;  %v5121_v59 = vld [vmem:[%s7386_s7 + $0x1e8] sm:$0xff] }
0x1808   :  { %4036 = vmatpush.bf16.msra.mxu3 %v5121_v59 }
0x1809   :  { %4838 = vmatmul.msk.bf16.vlgmr.msrb.gmra.mxu3 %vm205_vm8, %v3732_v30 }
0x1865   :  { %v3579_v47 = vpop.f32.mrf.mxu1 }
0x1866   :  { %v3585_v34 = vadd.f32 %v3584_v13, %v3579_v47 }
0x186b   :  { %v3635_v24 = vpop.f32.mrf.mxu3 }
0x186c   :  { %v3640_v57 = vadd.f32 %v3635_v24, %v3585_v34  ;;  %v5112_v24 = vld [vmem:[%s7386_s7 + $0x1a0] sm:$0xff] }
0x186d   :  { %v3581_v8 = vpop.f32.mrf.mxu1  ;;  %4023 = vmatpush.bf16.msra.mxu2 %v5112_v24 }
0x186e   :  { %v3586_v40 = vadd.f32 %v3584_v13, %v3581_v8  ;;  %v5120_v8 = vld [vmem:[%s7386_s7 + $0x1e0] sm:$0xff] }
0x186f   :  { %4037 = vmatpush.bf16.msra.mxu3 %v5120_v8  ;;  %v5124_v8 = vld [vmem:[%s7389_s10] sm:$0xff] }
0x1873   :  { %v3637_v20 = vpop.f32.mrf.mxu3 }
0x1874   :  { %v3641_v11 = vadd.f32 %v3637_v20, %v3586_v40 }
0x1880   :  { %v3696_v60 = vpop.f32.mrf.mxu1 }
0x1881   :  { %v3701_v48 = vadd.f32 %v3696_v60, %v3640_v57 }
0x1888   :  { %v3698_v63 = vpop.f32.mrf.mxu1 }
0x1889   :  { %v3702_v9 = vadd.f32 %v3698_v63, %v3641_v11  ;;  %v3794_v63 = vperm.slane %v7038_v44, 1  ;;  %v5127_v44 = vld [vmem:[%s7389_s10 + $0x18] sm:$0xff] }
0x188c   :  { %v3751_v50 = vpop.f32.mrf.mxu3 }
0x188d   :  { %v3756_v52 = vadd.f32 %v3751_v50, %v3701_v48 }
0x188f   :  { %v7233_v37 = vadd.f32 %v3756_v52, %v7010_v58 }
0x1891   :  { %v3760_v16 = vmul.f32 %v7233_v37, %v7233_v37 }
0x1893   :  { %v3762_v61 = vsel %vm77_vm0, %v3760_v16, 0.0 }
0x1894   :  { %v3753_v14 = vpop.f32.mrf.mxu3  ;;  %3763 = vadd.xlane.f32.xlu2 %v3762_v61 }
0x1895   :  { %v3757_v2 = vadd.f32 %v3753_v14, %v3702_v9 }
0x1897   :  { %v7239_v55 = vadd.f32 %v3757_v2, %v7016_v1  ;;  %v4875_v1 = vor.u32 %v5107_v45, %v4874_v4  ;;  %v5110_v4 = vld [vmem:[%s7386_s7 + $0x190] sm:$0xff] }
0x1898   :  { %v5118_v45 = vld [vmem:[%s7386_s7 + $0x1d0] sm:$0xff] }
0x1899   :  { %v3761_v10 = vmul.f32 %v7239_v55, %v7239_v55  ;;  %3861 = vmatpush.bf16.msra.mxu0 %v4875_v1  ;;  %v5117_v1 = vld [vmem:[%s7386_s7 + $0x1c8] sm:$0xff] }
0x189b   :  { %v3765_v58 = vsel %vm77_vm0, %v3761_v10, 0.0  ;;  %v5111_v10 = vld [vmem:[%s7386_s7 + $0x198] sm:$0xff] }
0x189c   :  { %3766 = vadd.xlane.f32.xlu1 %v3765_v58  ;;  %v5119_v58 = vld [vmem:[%s7386_s7 + $0x1d8] sm:$0xff]  ;;  %4024 = vmatpush.bf16.msra.mxu2 %v5111_v10 }
0x189d   :  { %3862 = vmatpush.bf16.msra.mxu0 %v4867_v22  ;;  %4038 = vmatpush.bf16.msra.mxu3 %v5119_v58  ;;  %v3811_v22 = vperm.slane %v4847_v42, 1 }
0x18a0   :  { %4025 = vmatpush.bf16.msra.mxu2 %v5110_v4 }
0x18a1   :  { %3863 = vmatpush.bf16.msra.mxu0 %v4859_v38  ;;  %4039 = vmatpush.bf16.msra.mxu3 %v5118_v45 }
0x18a4   :  { %4026 = vmatpush.bf16.msra.mxu2 %v5109_v18 }
0x18a5   :  { %3864 = vmatpush.bf16.msra.mxu0 %v4851_v7  ;;  %4040 = vmatpush.bf16.msra.mxu3 %v5117_v1 }
0x18a8   :  { %4027 = vmatpush.bf16.msra.mxu2 %v5108_v54 }
0x18a9   :  { %4041 = vmatpush.bf16.msra.mxu3 %v5116_v33  ;;  %4136 = vmatpush.bf16.msrb.mxu0 %v5127_v44  ;;  %v5181_v33 = vld [vmem:[%s7390_s11] ss:$0 sm:$0xff] }
0x1907   :  { %v3764_v62 = vpop.xlane.xlu2 %3763 }
0x1908   :  { %v3768_v35 = vmul.f32 %v3764_v62, %v5544_v15  ;;  %v3810_v62 = vperm.slane %v4847_v42, 0 }
0x190a   :  { %v3770_v56 = vadd.f32 1e-06, %v3768_v35 }
0x190c   :  { %5340 = vrsqrt.f32 %v3770_v56  ;;  %vm3778_vm4 = vweird.f32 %v3770_v56 }
0x190f   :  { %v3767_v29 = vpop.xlane.xlu1 %3766 }
0x1910   :  { %v3769_v39 = vmul.f32 %v3767_v29, %v5544_v15 }
0x1912   :  { %v5341_v23 = vpop.eup %5340  ;;  %v3771_v32 = vadd.f32 1e-06, %v3769_v39 }
0x1913   :  { %v3773_v43 = vmul.f32 %v5341_v23, %v3770_v56  ;;  %vm3779_vm8 = vweird.f32 %v5341_v23 }
0x1914   :  { %5342 = vrsqrt.f32 %v3771_v32  ;;  %vm3780_vm5 = vmor %vm3778_vm4, %vm3779_vm8  ;;  %vm3788_vm7 = vweird.f32 %v3771_v32 }
0x1915   :  { %v3774_v30 = vmul.f32 %v5341_v23, %v3773_v43 }
0x1917   :  { %v3775_v47 = vmul.f32 0.5, %v3774_v30  ;;  %v5126_v30 = vld [vmem:[%s7389_s10 + $0x10] sm:$0xff] }
0x1918   :  { %4137 = vmatpush.bf16.msrb.mxu0 %v5126_v30 }
0x1919   :  { %v3776_v13 = vsub.f32 1.5, %v3775_v47 }
0x191a   :  { %v5343_v20 = vpop.eup %5342 }
0x191b   :  { %v3783_v60 = vmul.f32 %v5343_v20, %v3771_v32  ;;  %v3777_v34 = vmul.f32 %v5341_v23, %v3776_v13  ;;  %vm3789_vm6 = vweird.f32 %v5343_v20 }
0x191c   :  { %vm3790_vm9 = vmor %vm3788_vm7, %vm3789_vm6 }
0x191d   :  { %v3784_v57 = vmul.f32 %v5343_v20, %v3783_v60  ;;  %v3781_v50 = vsel %vm3780_vm5, %v5341_v23, %v3777_v34 }
0x191e   :  { %v3792_v11 = vmul.f32 %v3781_v50, %v7233_v37 }
0x191f   :  { %v3785_v48 = vmul.f32 0.5, %v3784_v57 }
0x1920   :  { %v3795_v61 = vmul.f32 %v3794_v63, %v3792_v11 }
0x1921   :  { %v3786_v52 = vsub.f32 1.5, %v3785_v48 }
0x1923   :  { %v3787_v40 = vmul.f32 %v5343_v20, %v3786_v52 }
0x1925   :  { %v3791_v16 = vsel %vm3790_vm9, %v5343_v20, %v3787_v40 }
0x1926   :  { %v3793_v9 = vmul.f32 %v3791_v16, %v7239_v55 }
0x1928   :  { %v3796_v14 = vmul.f32 %v3794_v63, %v3793_v9 }
0x192a   :  { %v3806_v2 = vpack.c.bf16 %v3796_v14, %v3795_v61 }
0x192c   :  { %4880 = vmatmul.msk.bf16.vlgmr.msra.gmra.mxu0 %vm77_vm0, %v3806_v2  ;;  %4881 = vmatmul.msk.bf16.vlgmr.msrb.gmra.mxu1 %vm77_vm0, %v3806_v2 }
0x19a9   :  { %v3866_v46 = vpop.f32.mrf.mxu0  ;;  %v3880_v36 = vpop.f32.mrf.mxu1 }
0x19aa   :  { %v3867_v26 = vadd.f32 %v3866_v46, %v3810_v62  ;;  %v3881_v35 = vadd.f32 %v3880_v36, %v3811_v22 }
0x19ac   :  { %v3885_v38 = vmax.f32 %v3867_v26, 0.0  ;;  %v3886_v12 = vmax.f32 %v3881_v35, 0.0 }
0x19b1   :  { %v3868_v53 = vpop.f32.mrf.mxu0  ;;  %v3882_v56 = vpop.f32.mrf.mxu1 }
0x19b2   :  { %v3869_v27 = vadd.f32 %v3868_v53, %v3810_v62  ;;  %v3883_v41 = vadd.f32 %v3882_v56, %v3811_v22 }
0x19b4   :  { %v3887_v28 = vmax.f32 %v3869_v27, 0.0  ;;  %v3888_v3 = vmax.f32 %v3883_v41, 0.0 }
0x19b6   :  { %v3922_v51 = vpack.c.bf16 %v3887_v28, %v3885_v38  ;;  %v3923_v6 = vpack.c.bf16 %v3888_v3, %v3886_v12 }
0x19b8   :  { %4028 = vmatmul.bf16.vlgmr.msra.gmra.mxu2 %v3922_v51  ;;  %4042 = vmatmul.bf16.vlgmr.msra.gmra.mxu3 %v3923_v6 }
0x1a3b   :  { %v4029_v19 = vpop.f32.mrf.mxu2  ;;  %v4043_v49 = vpop.f32.mrf.mxu3 }
0x1a3c   :  { %v4044_v7 = vadd.f32 %v4043_v49, %v4029_v19 }
0x1a3e   :  { %v4048_v17 = vadd.f32 %v4044_v7, %v7233_v37 }
0x1a40   :  { %v4051_v5 = vadd.f32 %v4050_v21, %v4048_v17 }
0x1a42   :  { %v4055_v29 = vmul.f32 %v4051_v5, %v4051_v5 }
0x1a43   :  { %v4031_v0 = vpop.f32.mrf.mxu2  ;;  %v4045_v25 = vpop.f32.mrf.mxu3 }
0x1a44   :  { %v4046_v39 = vadd.f32 %v4045_v25, %v4031_v0  ;;  %v4057_v23 = vsel %vm77_vm0, %v4055_v29, 0.0 }
0x1a45   :  { %4058 = vadd.xlane.f32.xlu0 %v4057_v23 }
0x1a46   :  { %v4049_v32 = vadd.f32 %v4046_v39, %v7239_v55  ;;  %v5125_v55 = vld [vmem:[%s7389_s10 + $0x8] sm:$0xff] }
0x1a47   :  { %4138 = vmatpush.bf16.msrb.mxu0 %v5125_v55 }
0x1a48   :  { %v4052_v43 = vadd.f32 %v4050_v21, %v4049_v32 }
0x1a4a   :  { %v4056_v31 = vmul.f32 %v4052_v43, %v4052_v43 }
0x1a4b   :  { %4139 = vmatpush.bf16.msrb.mxu0 %v5124_v8 }
0x1a4c   :  { %v4060_v59 = vsel %vm77_vm0, %v4056_v31, 0.0 }
0x1a4d   :  { %4061 = vadd.xlane.f32.xlu1 %v4060_v59 }
0x1ab8   :  { %v4059_v37 = vpop.xlane.xlu0 %4058 }
0x1ab9   :  { %v4063_v47 = vmul.f32 %v4059_v37, %v5544_v15 }
0x1abb   :  { %v4065_v24 = vadd.f32 1e-06, %v4063_v47 }
0x1abd   :  { %5344 = vrsqrt.f32 %v4065_v24  ;;  %vm4073_vm11 = vweird.f32 %v4065_v24 }
0x1ac0   :  { %v4062_v13 = vpop.xlane.xlu1 %4061 }
0x1ac1   :  { %v4064_v20 = vmul.f32 %v4062_v13, %v5544_v15  ;;  %v4978_v15 = vld [vmem:[%s7387_s8 + $0x20] sm:$0xff]  ;;  %s5451_s8 = smov [#allocation2]  }
0x1ac2   :  { %v4089_v10 = vperm.slane %v4978_v15, 0  ;;  %s4152_s14 = sshll.u32 %s5451_s8, 4  ;;  %s4153_s14 = int_to_ptr.vmem [resolvable:$true] %s4152_s14 }
0x1ac3   :  { %v5345_v60 = vpop.eup %5344  ;;  %v4066_v34 = vadd.f32 1e-06, %v4064_v20 }
0x1ac4   :  { %v4068_v57 = vmul.f32 %v5345_v60, %v4065_v24  ;;  %vm4074_vm10 = vweird.f32 %v5345_v60 }
0x1ac5   :  { %5346 = vrsqrt.f32 %v4066_v34  ;;  %vm4075_vm12 = vmor %vm4073_vm11, %vm4074_vm10  ;;  %vm4083_vm14 = vweird.f32 %v4066_v34 }
0x1ac6   :  { %v4069_v48 = vmul.f32 %v5345_v60, %v4068_v57 }
0x1ac8   :  { %v4070_v50 = vmul.f32 0.5, %v4069_v48 }
0x1aca   :  { %v4071_v52 = vsub.f32 1.5, %v4070_v50 }
0x1acb   :  { %v5347_v40 = vpop.eup %5346 }
0x1acc   :  { %v4078_v63 = vmul.f32 %v5347_v40, %v4066_v34  ;;  %v4072_v11 = vmul.f32 %v5345_v60, %v4071_v52  ;;  %vm4084_vm13 = vweird.f32 %v5347_v40 }
0x1acd   :  { %vm4085_vm15 = vmor %vm4083_vm14, %vm4084_vm13 }
0x1ace   :  { %v4079_v16 = vmul.f32 %v5347_v40, %v4078_v63  ;;  %v4076_v61 = vsel %vm4075_vm12, %v5345_v60, %v4072_v11 }
0x1acf   :  { %v4087_v58 = vmul.f32 %v4076_v61, %v4051_v5 }
0x1ad0   :  { %v4080_v9 = vmul.f32 0.5, %v4079_v16 }
0x1ad1   :  { %v4090_v18 = vmul.f32 %v4089_v10, %v4087_v58 }
0x1ad2   :  { %v4081_v14 = vsub.f32 1.5, %v4080_v9 }
0x1ad4   :  { %v4082_v2 = vmul.f32 %v5347_v40, %v4081_v14 }
0x1ad6   :  { %v4086_v4 = vsel %vm4085_vm15, %v5347_v40, %v4082_v2 }
0x1ad7   :  { %v4088_v45 = vmul.f32 %v4086_v4, %v4052_v43 }
0x1ad9   :  { %v4091_v1 = vmul.f32 %v4089_v10, %v4088_v45 }
0x1adb   :  { %v4100_v54 = vpack.c.bf16 %v4091_v1, %v4090_v18 }
0x1add   :  { %4995 = vmatmul.msk.bf16.vlgmr.msrb.gmra.mxu0 %vm77_vm0, %v4100_v54 }
0x1b5a   :  { %v4141_v42 = vpop.f32.mrf.mxu0 }
0x1b5b   :  { %v4142_v46 = vadd.f32 %v5181_v33, %v4141_v42 }
0x1b5d   :  { %4146 = vst [vmem:[#allocation2] sm:$0xff] %v4142_v46 }
0x1b62   :  { %v4143_v36 = vpop.f32.mrf.mxu0 }
0x1b63   :  { %v4144_v62 = vadd.f32 %v5181_v33, %v4143_v36 }
0x1b65   :  { %4147 = vst [vmem:[#allocation2 + $0x8] sm:$0xff] %v4144_v62 }
0x1b66   :  { %4160 = dma.vmem_to_hbm [thread:$0]  %s4153_s14, 256, %s4155_s21, [#allocation3], %s5452_s22, %s5452_s22, %s5453_s23  }
0x1b67   :  { %5441 = dma.done.wait [#allocation3], 256  }
0x1b68   :  { %5442 = vsyncadd [#allocation3], 4294967040 }
0x1b69   :  { %4165 = vsyncpa [#allocation3], 1 }

</bundles_post_ra>
